<compile_context>
chip_gen: v5e
topology: v5e:2x2
jax: 0.10.0
libtpu: 0.0.40
codegen_flags: <defaults>
</compile_context>

<pallas_src>
import functools

import jax
import jax.numpy as jnp
from jax.experimental import pallas as pl
from jax.experimental.pallas import tpu as pltpu


# ------------------------------- helpers ----------------------------------- #

def _round_up(x, m):
    return (x + m - 1) // m * m


def _pick_tm(M):
    """Largest row tile (multiple of 8, <=128) dividing M; whole M if small."""
    if M <= 128:
        return M
    for cand in (128, 64, 32, 16, 8):
        if M % cand == 0:
            return cand
    return M


# ----------------------------- Pallas kernels ------------------------------ #

def _enc_conv_pool_kernel(p_ref, w_ref, b_ref, o_ref):
    """Fused 3x3 conv (wide-K matmul per pool phase) + bias + ReLU + 2x2 maxpool.

    p_ref: (4, tm, K)   im2col patches, one slab per 2x2-pool-window phase
    w_ref: (K, Np)      taps flattened on K; output channels zero-padded to Np
    b_ref: (1, Np)
    o_ref: (tm, Np)     pooled activation (lane-dense, Np multiple of 128)
    """
    w = w_ref[...]
    r = jnp.dot(p_ref[0], w, preferred_element_type=jnp.float32)
    for t in range(1, 4):
        r = jnp.maximum(r, jnp.dot(p_ref[t], w, preferred_element_type=jnp.float32))
    # maxpool commutes with the per-channel bias add and with ReLU (monotone)
    o_ref[...] = jnp.maximum(r + b_ref[...], 0.0).astype(o_ref.dtype)


def _dec_convT_kernel(p_ref, w_ref, b_ref, o_ref, *, act):
    """ConvTranspose2d(3x3, s=2, p=1, op=1) as one matmul over 2x2 input patches,
    producing all 4 output phases on the lane axis.

    p_ref: (tm, 4*Cin); w_ref: (4*Cin, Np); b_ref: (1, Np); o_ref: (tm, Np)
    """
    r = jnp.dot(p_ref[...], w_ref[...], preferred_element_type=jnp.float32)
    r = r + b_ref[...]
    if act == "relu":
        r = jnp.maximum(r, 0.0)
    else:  # sigmoid: exp + approximate reciprocal, both on the EUP slot
        r = pl.reciprocal(1.0 + jnp.exp(-r), approx=True)
    o_ref[...] = r.astype(o_ref.dtype)


# --------------------------- weight preparation ---------------------------- #

def _enc_weight(w_torch, b):
    """Conv2d weight (Cout, Cin, 3, 3) -> (9*Cin, Np) with Np = round_up(Cout,128)."""
    Cout, Cin = w_torch.shape[0], w_torch.shape[1]
    K = 9 * Cin
    Np = _round_up(Cout, 128)
    w = jnp.transpose(w_torch, (2, 3, 1, 0)).reshape(K, Cout).astype(jnp.float32)
    w = jnp.pad(w, ((0, 0), (0, Np - Cout)))
    bp = jnp.pad(b.astype(jnp.float32), (0, Np - Cout)).reshape(1, Np)
    return w, bp, Cin, Cout, K, Np


def _dec_weight(w_torch, b):
    """ConvTranspose2d weight (Cin, Cout, 3, 3) -> phase matrix (4*Cin, Np).

    Row block t = (ty, tx) is the 2x2 input tap; col block p = (py, px) is the
    output phase.  Tap (ty,tx) contributes to phase (py,px) through kernel index
    (kh, kw) = (py - 2*ty + 1, px - 2*tx + 1) when that index is in range.
    """
    Cin, Cout = w_torch.shape[0], w_torch.shape[1]
    Np = _round_up(4 * Cout, 128)
    rows = []
    for ty in range(2):
        for tx in range(2):
            cols = []
            for py in range(2):
                for px in range(2):
                    kh = py - 2 * ty + 1
                    kw = px - 2 * tx + 1
                    if 0 <= kh <= 2 and 0 <= kw <= 2:
                        cols.append(w_torch[:, :, kh, kw])
                    else:
                        cols.append(jnp.zeros((Cin, Cout), w_torch.dtype))
            rows.append(jnp.concatenate(cols, axis=1))
    Wb = jnp.concatenate(rows, axis=0).astype(jnp.float32)          # (4Cin, 4Cout)
    Wb = jnp.pad(Wb, ((0, 0), (0, Np - 4 * Cout)))
    bb = jnp.pad(jnp.tile(b.astype(jnp.float32), 4), (0, Np - 4 * Cout)).reshape(1, Np)
    return Wb, bb, Cin, Cout, Np


# ----------------------------- layer wrappers ------------------------------ #

def conv3x3_relu_pool(x, w_torch, b):
    """Fused Conv2d(3x3,s=1,p=1) + ReLU + MaxPool2d(2,2).

    x: (N, H, W, C_pad) NHWC; only the first Cin = w_torch.shape[1] channels are
    read.  Returns (N, H/2, W/2, Np) with Np = round_up(Cout, 128); only the
    first Cout channels are valid (zero-padded for lane-dense stores).
    """
    Cout_, Cin = w_torch.shape[0], w_torch.shape[1]
    N, H, W, _ = x.shape
    Ho, Wo = H // 2, W // 2
    w, bp, Cin, Cout, K, Np = _enc_weight(w_torch, b)

    # im2col ordered by pooling phase: (4, N*Ho*Wo, 9*Cin)
    xp = jnp.pad(x[..., :Cin], ((0, 0), (1, 1), (1, 1), (0, 0)))
    cols = [xp[:, dy:dy + H, dx:dx + W, :] for dy in range(3) for dx in range(3)]
    pat = jnp.concatenate(cols, axis=-1)                            # (N, H, W, K)
    pat = pat.reshape(N, Ho, 2, Wo, 2, K)
    pat = jnp.transpose(pat, (2, 4, 0, 1, 3, 5)).reshape(4, N * Ho * Wo, K)

    M = N * Ho * Wo
    tm = _pick_tm(M)
    out = pl.pallas_call(
        _enc_conv_pool_kernel,
        out_shape=jax.ShapeDtypeStruct((M, Np), jnp.float32),
        grid_spec=pltpu.PrefetchScalarGridSpec(
            num_scalar_prefetch=0,
            grid=(M // tm,),
            in_specs=[
                pl.BlockSpec((4, tm, K), lambda i: (0, i, 0)),
                pl.BlockSpec((K, Np), lambda i: (0, 0)),
                pl.BlockSpec((1, Np), lambda i: (0, 0)),
            ],
            out_specs=pl.BlockSpec((tm, Np), lambda i: (i, 0)),
        ),
        compiler_params=pltpu.CompilerParams(dimension_semantics=("parallel",)),
    )(pat, w, bp)
    return out.reshape(N, Ho, Wo, Np)


def conv_transpose3x3_s2(x, w_torch, b, act):
    """ConvTranspose2d(k=3, stride=2, padding=1, output_padding=1) + activation.

    x: (N, H, W, C_pad) NHWC (only first Cin channels read).
    Returns (N, 2H, 2W, Cout) NHWC.
    """
    N, H, W, _ = x.shape
    Wb, bb, Cin, Cout, Np = _dec_weight(w_torch, b)

    # 2x2 patches of the (bottom/right zero-padded) input: (N*H*W, 4*Cin)
    xp = jnp.pad(x[..., :Cin], ((0, 0), (0, 1), (0, 1), (0, 0)))
    cols = [xp[:, ty:ty + H, tx:tx + W, :] for ty in range(2) for tx in range(2)]
    pat = jnp.concatenate(cols, axis=-1).reshape(N * H * W, 4 * Cin)

    M = N * H * W
    tm = _pick_tm(M)
    out = pl.pallas_call(
        functools.partial(_dec_convT_kernel, act=act),
        out_shape=jax.ShapeDtypeStruct((M, Np), jnp.float32),
        grid_spec=pltpu.PrefetchScalarGridSpec(
            num_scalar_prefetch=0,
            grid=(M // tm,),
            in_specs=[
                pl.BlockSpec((tm, 4 * Cin), lambda i: (i, 0)),
                pl.BlockSpec((4 * Cin, Np), lambda i: (0, 0)),
                pl.BlockSpec((1, Np), lambda i: (0, 0)),
            ],
            out_specs=pl.BlockSpec((tm, Np), lambda i: (i, 0)),
        ),
        compiler_params=pltpu.CompilerParams(dimension_semantics=("parallel",)),
    )(pat, Wb, bb)

    # pixel-shuffle the 4 phases back onto the spatial grid (crop the lane pad)
    y = out[:, :4 * Cout].reshape(N, H, W, 2, 2, Cout)
    y = jnp.transpose(y, (0, 1, 3, 2, 4, 5)).reshape(N, 2 * H, 2 * W, Cout)
    return y


# ------------------------------ model forward ------------------------------ #

def autoencoder_forward(x_nchw, p):
    # layout: input NCHW (PyTorch), internally NHWC, output NCHW.
    x = jnp.transpose(x_nchw, (0, 2, 3, 1))
    # encoder (each call = conv + relu + maxpool fused in one Pallas kernel)
    x = conv3x3_relu_pool(x, p["enc1_w"], p["enc1_b"])
    x = conv3x3_relu_pool(x, p["enc2_w"], p["enc2_b"])
    x = conv3x3_relu_pool(x, p["enc3_w"], p["enc3_b"])
    # decoder (each call = 4-phase transposed conv + activation in one kernel)
    x = conv_transpose3x3_s2(x, p["dec1_w"], p["dec1_b"], act="relu")
    x = conv_transpose3x3_s2(x, p["dec2_w"], p["dec2_b"], act="relu")
    x = conv_transpose3x3_s2(x, p["dec3_w"], p["dec3_b"], act="sigmoid")
    return jnp.transpose(x, (0, 3, 1, 2))


# -------------------------- pure-JAX reference ----------------------------- #

def reference_forward(x_nchw, p):
    x = jnp.transpose(x_nchw, (0, 2, 3, 1))
    dn = ("NHWC", "HWIO", "NHWC")

    def conv(x, wt, b):
        w = jnp.transpose(wt, (2, 3, 1, 0))
        y = jax.lax.conv_general_dilated(x, w, (1, 1), [(1, 1), (1, 1)],
                                         dimension_numbers=dn)
        return y + b

    def convT(x, wt, b):
        w = jnp.transpose(wt[:, :, ::-1, ::-1], (2, 3, 0, 1))
        y = jax.lax.conv_general_dilated(x, w, (1, 1), [(1, 2), (1, 2)],
                                         lhs_dilation=(2, 2),
                                         dimension_numbers=dn)
        return y + b

    def pool(x):
        return jax.lax.reduce_window(x, -jnp.inf, jax.lax.max,
                                     (1, 2, 2, 1), (1, 2, 2, 1), "VALID")

    x = pool(jax.nn.relu(conv(x, p["enc1_w"], p["enc1_b"])))
    x = pool(jax.nn.relu(conv(x, p["enc2_w"], p["enc2_b"])))
    x = pool(jax.nn.relu(conv(x, p["enc3_w"], p["enc3_b"])))
    x = jax.nn.relu(convT(x, p["dec1_w"], p["dec1_b"]))
    x = jax.nn.relu(convT(x, p["dec2_w"], p["dec2_b"]))
    x = jax.nn.sigmoid(convT(x, p["dec3_w"], p["dec3_b"]))
    return jnp.transpose(x, (0, 3, 1, 2))


# ------------------------------ parameter init ----------------------------- #

def init_params(key):
    ks = jax.random.split(key, 12)

    def u(k, shape, fan_in):
        bound = 1.0 / (float(fan_in) ** 0.5)
        return jax.random.uniform(k, shape, jnp.float32, -bound, bound)

    p = {}
    # Conv2d weights: (Cout, Cin, 3, 3)
    p["enc1_w"] = u(ks[0], (32, 3, 3, 3), 3 * 9)
    p["enc1_b"] = u(ks[1], (32,), 3 * 9)
    p["enc2_w"] = u(ks[2], (64, 32, 3, 3), 32 * 9)
    p["enc2_b"] = u(ks[3], (64,), 32 * 9)
    p["enc3_w"] = u(ks[4], (128, 64, 3, 3), 64 * 9)
    p["enc3_b"] = u(ks[5], (128,), 64 * 9)
    # ConvTranspose2d weights: (Cin, Cout, 3, 3)
    p["dec1_w"] = u(ks[6], (128, 64, 3, 3), 128 * 9)
    p["dec1_b"] = u(ks[7], (64,), 128 * 9)
    p["dec2_w"] = u(ks[8], (64, 32, 3, 3), 64 * 9)
    p["dec2_b"] = u(ks[9], (32,), 64 * 9)
    p["dec3_w"] = u(ks[10], (32, 3, 3, 3), 32 * 9)
    p["dec3_b"] = u(ks[11], (3,), 32 * 9)
    return p


# ----------------------------------- main ----------------------------------- #

if __name__ == "__main__":
    key = jax.random.PRNGKey(0)
    kx, kp = jax.random.split(key)
    x = jax.random.normal(kx, (2, 3, 32, 32), jnp.float32)   # NCHW, like PyTorch
    params = init_params(kp)

    fwd = jax.jit(autoencoder_forward)
    out = jax.block_until_ready(fwd(x, params))

    assert out.shape == (2, 3, 32, 32), out.shape
    assert out.dtype == jnp.float32

    ref = jax.block_until_ready(jax.jit(reference_forward)(x, params))
    max_err = float(jnp.max(jnp.abs(out - ref)))
    assert max_err < 1e-2, f"mismatch vs reference: max abs err {max_err}"

    print("KERNEL_OK")
</pallas_src>

<mosaic_0001>
module attributes {stable_mosaic.version = 11 : i64} {
  func.func @_enc_conv_pool_kernel(%arg0: i32, %arg1: memref<4x128x27xf32, #tpu.memory_space<vmem>>, %arg2: memref<27x128xf32, #tpu.memory_space<vmem>>, %arg3: memref<1x128xf32, #tpu.memory_space<vmem>>, %arg4: memref<128x128xf32, #tpu.memory_space<vmem>>) attributes {dimension_semantics = [#tpu.dimension_semantics<parallel>], iteration_bounds = array<i64: 4>, scalar_prefetch = 0 : i64, scratch_operands = 0 : i64, tpu.core_type = #tpu.core_type<tc>, window_params = [{transform_indices = @transform_0, window_bounds = array<i64: 4, 128, 27>}, {pipeline_mode = #tpu.pipeline_mode<synchronous>, transform_indices = @transform_1, window_bounds = array<i64: 27, 128>}, {pipeline_mode = #tpu.pipeline_mode<synchronous>, transform_indices = @transform_2, window_bounds = array<i64: 1, 128>}, {transform_indices = @transform_3, window_bounds = array<i64: 128, 128>}]} {
    %c0 = arith.constant 0 : index
    %c0_0 = arith.constant 0 : index
    %0 = vector.load %arg2[%c0, %c0_0] : memref<27x128xf32, #tpu.memory_space<vmem>>, vector<27x128xf32>
    %c0_1 = arith.constant 0 : index
    %c0_2 = arith.constant 0 : index
    %c0_3 = arith.constant 0 : index
    %1 = vector.load %arg1[%c0_1, %c0_2, %c0_3] : memref<4x128x27xf32, #tpu.memory_space<vmem>>, vector<1x128x27xf32>
    %2 = vector.shape_cast %1 : vector<1x128x27xf32> to vector<128x27xf32>
    %cst = arith.constant dense<0.000000e+00> : vector<128x128xf32>
    %3 = tpu.matmul %2, %0, %cst {dimension_numbers = #tpu.dot_dimension_numbers<[1], [0], [0], [1], [0, 0, 1, 1], [], []>} : vector<128x27xf32>, vector<27x128xf32>, vector<128x128xf32> -> vector<128x128xf32>
    %c1 = arith.constant 1 : index
    %c0_4 = arith.constant 0 : index
    %c0_5 = arith.constant 0 : index
    %4 = vector.load %arg1[%c1, %c0_4, %c0_5] : memref<4x128x27xf32, #tpu.memory_space<vmem>>, vector<1x128x27xf32>
    %5 = vector.shape_cast %4 : vector<1x128x27xf32> to vector<128x27xf32>
    %cst_6 = arith.constant dense<0.000000e+00> : vector<128x128xf32>
    %6 = tpu.matmul %5, %0, %cst_6 {dimension_numbers = #tpu.dot_dimension_numbers<[1], [0], [0], [1], [0, 0, 1, 1], [], []>} : vector<128x27xf32>, vector<27x128xf32>, vector<128x128xf32> -> vector<128x128xf32>
    %7 = arith.maximumf %3, %6 : vector<128x128xf32>
    %c2 = arith.constant 2 : index
    %c0_7 = arith.constant 0 : index
    %c0_8 = arith.constant 0 : index
    %8 = vector.load %arg1[%c2, %c0_7, %c0_8] : memref<4x128x27xf32, #tpu.memory_space<vmem>>, vector<1x128x27xf32>
    %9 = vector.shape_cast %8 : vector<1x128x27xf32> to vector<128x27xf32>
    %cst_9 = arith.constant dense<0.000000e+00> : vector<128x128xf32>
    %10 = tpu.matmul %9, %0, %cst_9 {dimension_numbers = #tpu.dot_dimension_numbers<[1], [0], [0], [1], [0, 0, 1, 1], [], []>} : vector<128x27xf32>, vector<27x128xf32>, vector<128x128xf32> -> vector<128x128xf32>
    %11 = arith.maximumf %7, %10 : vector<128x128xf32>
    %c3 = arith.constant 3 : index
    %c0_10 = arith.constant 0 : index
    %c0_11 = arith.constant 0 : index
    %12 = vector.load %arg1[%c3, %c0_10, %c0_11] : memref<4x128x27xf32, #tpu.memory_space<vmem>>, vector<1x128x27xf32>
    %13 = vector.shape_cast %12 : vector<1x128x27xf32> to vector<128x27xf32>
    %cst_12 = arith.constant dense<0.000000e+00> : vector<128x128xf32>
    %14 = tpu.matmul %13, %0, %cst_12 {dimension_numbers = #tpu.dot_dimension_numbers<[1], [0], [0], [1], [0, 0, 1, 1], [], []>} : vector<128x27xf32>, vector<27x128xf32>, vector<128x128xf32> -> vector<128x128xf32>
    %15 = arith.maximumf %11, %14 : vector<128x128xf32>
    %c0_13 = arith.constant 0 : index
    %c0_14 = arith.constant 0 : index
    %16 = vector.load %arg3[%c0_13, %c0_14] : memref<1x128xf32, #tpu.memory_space<vmem>>, vector<1x128xf32>
    %17 = vector.broadcast %16 : vector<1x128xf32> to vector<128x128xf32>
    %18 = arith.addf %15, %17 : vector<128x128xf32>
    %cst_15 = arith.constant 0.000000e+00 : f32
    %19 = vector.broadcast %cst_15 : f32 to vector<128x128xf32>
    %20 = arith.maximumf %18, %19 : vector<128x128xf32>
    %c0_16 = arith.constant 0 : index
    %c0_17 = arith.constant 0 : index
    %21 = vector.load %arg4[%c0_16, %c0_17] : memref<128x128xf32, #tpu.memory_space<vmem>>, vector<128x128xf32>
    tpu.vector_store %arg4[%c0_16, %c0_17], %20 {strides = array<i32>} : memref<128x128xf32, #tpu.memory_space<vmem>>, vector<128x128xf32>,
    return
  }
  func.func @transform_0(%arg0: i32) -> (i32, i32, i32) {
    %c0_i32 = arith.constant 0 : i32
    %c0_i32_0 = arith.constant 0 : i32
    %c0_i32_1 = arith.constant 0 : i32
    return %c0_i32, %arg0, %c0_i32_0 : i32, i32, i32
  }
  func.func @transform_1(%arg0: i32) -> (i32, i32) {
    %c0_i32 = arith.constant 0 : i32
    %c0_i32_0 = arith.constant 0 : i32
    %c0_i32_1 = arith.constant 0 : i32
    return %c0_i32, %c0_i32_0 : i32, i32
  }
  func.func @transform_2(%arg0: i32) -> (i32, i32) {
    %c0_i32 = arith.constant 0 : i32
    %c0_i32_0 = arith.constant 0 : i32
    %c0_i32_1 = arith.constant 0 : i32
    return %c0_i32, %c0_i32_0 : i32, i32
  }
  func.func @transform_3(%arg0: i32) -> (i32, i32) {
    %c0_i32 = arith.constant 0 : i32
    %c0_i32_0 = arith.constant 0 : i32
    return %arg0, %c0_i32 : i32, i32
  }
}

module attributes {stable_mosaic.version = 11 : i64} {
  func.func @_enc_conv_pool_kernel(%arg0: i32, %arg1: memref<4x128x288xf32, #tpu.memory_space<vmem>>, %arg2: memref<288x128xf32, #tpu.memory_space<vmem>>, %arg3: memref<1x128xf32, #tpu.memory_space<vmem>>, %arg4: memref<128x128xf32, #tpu.memory_space<vmem>>) attributes {dimension_semantics = [#tpu.dimension_semantics<parallel>], iteration_bounds = array<i64: 1>, scalar_prefetch = 0 : i64, scratch_operands = 0 : i64, tpu.core_type = #tpu.core_type<tc>, window_params = [{transform_indices = @transform_0, window_bounds = array<i64: 4, 128, 288>}, {pipeline_mode = #tpu.pipeline_mode<synchronous>, transform_indices = @transform_1, window_bounds = array<i64: 288, 128>}, {pipeline_mode = #tpu.pipeline_mode<synchronous>, transform_indices = @transform_2, window_bounds = array<i64: 1, 128>}, {transform_indices = @transform_3, window_bounds = array<i64: 128, 128>}]} {
    %c0 = arith.constant 0 : index
    %c0_0 = arith.constant 0 : index
    %0 = vector.load %arg2[%c0, %c0_0] : memref<288x128xf32, #tpu.memory_space<vmem>>, vector<288x128xf32>
    %c0_1 = arith.constant 0 : index
    %c0_2 = arith.constant 0 : index
    %c0_3 = arith.constant 0 : index
    %1 = vector.load %arg1[%c0_1, %c0_2, %c0_3] : memref<4x128x288xf32, #tpu.memory_space<vmem>>, vector<1x128x288xf32>
    %2 = vector.shape_cast %1 : vector<1x128x288xf32> to vector<128x288xf32>
    %cst = arith.constant dense<0.000000e+00> : vector<128x128xf32>
    %3 = tpu.matmul %2, %0, %cst {dimension_numbers = #tpu.dot_dimension_numbers<[1], [0], [0], [1], [0, 0, 1, 1], [], []>} : vector<128x288xf32>, vector<288x128xf32>, vector<128x128xf32> -> vector<128x128xf32>
    %c1 = arith.constant 1 : index
    %c0_4 = arith.constant 0 : index
    %c0_5 = arith.constant 0 : index
    %4 = vector.load %arg1[%c1, %c0_4, %c0_5] : memref<4x128x288xf32, #tpu.memory_space<vmem>>, vector<1x128x288xf32>
    %5 = vector.shape_cast %4 : vector<1x128x288xf32> to vector<128x288xf32>
    %cst_6 = arith.constant dense<0.000000e+00> : vector<128x128xf32>
    %6 = tpu.matmul %5, %0, %cst_6 {dimension_numbers = #tpu.dot_dimension_numbers<[1], [0], [0], [1], [0, 0, 1, 1], [], []>} : vector<128x288xf32>, vector<288x128xf32>, vector<128x128xf32> -> vector<128x128xf32>
    %7 = arith.maximumf %3, %6 : vector<128x128xf32>
    %c2 = arith.constant 2 : index
    %c0_7 = arith.constant 0 : index
    %c0_8 = arith.constant 0 : index
    %8 = vector.load %arg1[%c2, %c0_7, %c0_8] : memref<4x128x288xf32, #tpu.memory_space<vmem>>, vector<1x128x288xf32>
    %9 = vector.shape_cast %8 : vector<1x128x288xf32> to vector<128x288xf32>
    %cst_9 = arith.constant dense<0.000000e+00> : vector<128x128xf32>
    %10 = tpu.matmul %9, %0, %cst_9 {dimension_numbers = #tpu.dot_dimension_numbers<[1], [0], [0], [1], [0, 0, 1, 1], [], []>} : vector<128x288xf32>, vector<288x128xf32>, vector<128x128xf32> -> vector<128x128xf32>
    %11 = arith.maximumf %7, %10 : vector<128x128xf32>
    %c3 = arith.constant 3 : index
    %c0_10 = arith.constant 0 : index
    %c0_11 = arith.constant 0 : index
    %12 = vector.load %arg1[%c3, %c0_10, %c0_11] : memref<4x128x288xf32, #tpu.memory_space<vmem>>, vector<1x128x288xf32>
    %13 = vector.shape_cast %12 : vector<1x128x288xf32> to vector<128x288xf32>
    %cst_12 = arith.constant dense<0.000000e+00> : vector<128x128xf32>
    %14 = tpu.matmul %13, %0, %cst_12 {dimension_numbers = #tpu.dot_dimension_numbers<[1], [0], [0], [1], [0, 0, 1, 1], [], []>} : vector<128x288xf32>, vector<288x128xf32>, vector<128x128xf32> -> vector<128x128xf32>
    %15 = arith.maximumf %11, %14 : vector<128x128xf32>
    %c0_13 = arith.constant 0 : index
    %c0_14 = arith.constant 0 : index
    %16 = vector.load %arg3[%c0_13, %c0_14] : memref<1x128xf32, #tpu.memory_space<vmem>>, vector<1x128xf32>
    %17 = vector.broadcast %16 : vector<1x128xf32> to vector<128x128xf32>
    %18 = arith.addf %15, %17 : vector<128x128xf32>
    %cst_15 = arith.constant 0.000000e+00 : f32
    %19 = vector.broadcast %cst_15 : f32 to vector<128x128xf32>
    %20 = arith.maximumf %18, %19 : vector<128x128xf32>
    %c0_16 = arith.constant 0 : index
    %c0_17 = arith.constant 0 : index
    %21 = vector.load %arg4[%c0_16, %c0_17] : memref<128x128xf32, #tpu.memory_space<vmem>>, vector<128x128xf32>
    tpu.vector_store %arg4[%c0_16, %c0_17], %20 {strides = array<i32>} : memref<128x128xf32, #tpu.memory_space<vmem>>, vector<128x128xf32>,
    return
  }
  func.func @transform_0(%arg0: i32) -> (i32, i32, i32) {
    %c0_i32 = arith.constant 0 : i32
    %c0_i32_0 = arith.constant 0 : i32
    %c0_i32_1 = arith.constant 0 : i32
    return %c0_i32, %arg0, %c0_i32_0 : i32, i32, i32
  }
  func.func @transform_1(%arg0: i32) -> (i32, i32) {
    %c0_i32 = arith.constant 0 : i32
    %c0_i32_0 = arith.constant 0 : i32
    %c0_i32_1 = arith.constant 0 : i32
    return %c0_i32, %c0_i32_0 : i32, i32
  }
  func.func @transform_2(%arg0: i32) -> (i32, i32) {
    %c0_i32 = arith.constant 0 : i32
    %c0_i32_0 = arith.constant 0 : i32
    %c0_i32_1 = arith.constant 0 : i32
    return %c0_i32, %c0_i32_0 : i32, i32
  }
  func.func @transform_3(%arg0: i32) -> (i32, i32) {
    %c0_i32 = arith.constant 0 : i32
    %c0_i32_0 = arith.constant 0 : i32
    return %arg0, %c0_i32 : i32, i32
  }
}

module attributes {stable_mosaic.version = 11 : i64} {
  func.func @_enc_conv_pool_kernel(%arg0: i32, %arg1: memref<4x32x576xf32, #tpu.memory_space<vmem>>, %arg2: memref<576x128xf32, #tpu.memory_space<vmem>>, %arg3: memref<1x128xf32, #tpu.memory_space<vmem>>, %arg4: memref<32x128xf32, #tpu.memory_space<vmem>>) attributes {dimension_semantics = [#tpu.dimension_semantics<parallel>], iteration_bounds = array<i64: 1>, scalar_prefetch = 0 : i64, scratch_operands = 0 : i64, tpu.core_type = #tpu.core_type<tc>, window_params = [{transform_indices = @transform_0, window_bounds = array<i64: 4, 32, 576>}, {pipeline_mode = #tpu.pipeline_mode<synchronous>, transform_indices = @transform_1, window_bounds = array<i64: 576, 128>}, {pipeline_mode = #tpu.pipeline_mode<synchronous>, transform_indices = @transform_2, window_bounds = array<i64: 1, 128>}, {transform_indices = @transform_3, window_bounds = array<i64: 32, 128>}]} {
    %c0 = arith.constant 0 : index
    %c0_0 = arith.constant 0 : index
    %0 = vector.load %arg2[%c0, %c0_0] : memref<576x128xf32, #tpu.memory_space<vmem>>, vector<576x128xf32>
    %c0_1 = arith.constant 0 : index
    %c0_2 = arith.constant 0 : index
    %c0_3 = arith.constant 0 : index
    %1 = vector.load %arg1[%c0_1, %c0_2, %c0_3] : memref<4x32x576xf32, #tpu.memory_space<vmem>>, vector<1x32x576xf32>
    %2 = vector.shape_cast %1 : vector<1x32x576xf32> to vector<32x576xf32>
    %cst = arith.constant dense<0.000000e+00> : vector<32x128xf32>
    %3 = tpu.matmul %2, %0, %cst {dimension_numbers = #tpu.dot_dimension_numbers<[1], [0], [0], [1], [0, 0, 1, 1], [], []>} : vector<32x576xf32>, vector<576x128xf32>, vector<32x128xf32> -> vector<32x128xf32>
    %c1 = arith.constant 1 : index
    %c0_4 = arith.constant 0 : index
    %c0_5 = arith.constant 0 : index
    %4 = vector.load %arg1[%c1, %c0_4, %c0_5] : memref<4x32x576xf32, #tpu.memory_space<vmem>>, vector<1x32x576xf32>
    %5 = vector.shape_cast %4 : vector<1x32x576xf32> to vector<32x576xf32>
    %cst_6 = arith.constant dense<0.000000e+00> : vector<32x128xf32>
    %6 = tpu.matmul %5, %0, %cst_6 {dimension_numbers = #tpu.dot_dimension_numbers<[1], [0], [0], [1], [0, 0, 1, 1], [], []>} : vector<32x576xf32>, vector<576x128xf32>, vector<32x128xf32> -> vector<32x128xf32>
    %7 = arith.maximumf %3, %6 : vector<32x128xf32>
    %c2 = arith.constant 2 : index
    %c0_7 = arith.constant 0 : index
    %c0_8 = arith.constant 0 : index
    %8 = vector.load %arg1[%c2, %c0_7, %c0_8] : memref<4x32x576xf32, #tpu.memory_space<vmem>>, vector<1x32x576xf32>
    %9 = vector.shape_cast %8 : vector<1x32x576xf32> to vector<32x576xf32>
    %cst_9 = arith.constant dense<0.000000e+00> : vector<32x128xf32>
    %10 = tpu.matmul %9, %0, %cst_9 {dimension_numbers = #tpu.dot_dimension_numbers<[1], [0], [0], [1], [0, 0, 1, 1], [], []>} : vector<32x576xf32>, vector<576x128xf32>, vector<32x128xf32> -> vector<32x128xf32>
    %11 = arith.maximumf %7, %10 : vector<32x128xf32>
    %c3 = arith.constant 3 : index
    %c0_10 = arith.constant 0 : index
    %c0_11 = arith.constant 0 : index
    %12 = vector.load %arg1[%c3, %c0_10, %c0_11] : memref<4x32x576xf32, #tpu.memory_space<vmem>>, vector<1x32x576xf32>
    %13 = vector.shape_cast %12 : vector<1x32x576xf32> to vector<32x576xf32>
    %cst_12 = arith.constant dense<0.000000e+00> : vector<32x128xf32>
    %14 = tpu.matmul %13, %0, %cst_12 {dimension_numbers = #tpu.dot_dimension_numbers<[1], [0], [0], [1], [0, 0, 1, 1], [], []>} : vector<32x576xf32>, vector<576x128xf32>, vector<32x128xf32> -> vector<32x128xf32>
    %15 = arith.maximumf %11, %14 : vector<32x128xf32>
    %c0_13 = arith.constant 0 : index
    %c0_14 = arith.constant 0 : index
    %16 = vector.load %arg3[%c0_13, %c0_14] : memref<1x128xf32, #tpu.memory_space<vmem>>, vector<1x128xf32>
    %17 = vector.broadcast %16 : vector<1x128xf32> to vector<32x128xf32>
    %18 = arith.addf %15, %17 : vector<32x128xf32>
    %cst_15 = arith.constant 0.000000e+00 : f32
    %19 = vector.broadcast %cst_15 : f32 to vector<32x128xf32>
    %20 = arith.maximumf %18, %19 : vector<32x128xf32>
    %c0_16 = arith.constant 0 : index
    %c0_17 = arith.constant 0 : index
    %21 = vector.load %arg4[%c0_16, %c0_17] : memref<32x128xf32, #tpu.memory_space<vmem>>, vector<32x128xf32>
    tpu.vector_store %arg4[%c0_16, %c0_17], %20 {strides = array<i32>} : memref<32x128xf32, #tpu.memory_space<vmem>>, vector<32x128xf32>,
    return
  }
  func.func @transform_0(%arg0: i32) -> (i32, i32, i32) {
    %c0_i32 = arith.constant 0 : i32
    %c0_i32_0 = arith.constant 0 : i32
    %c0_i32_1 = arith.constant 0 : i32
    return %c0_i32, %arg0, %c0_i32_0 : i32, i32, i32
  }
  func.func @transform_1(%arg0: i32) -> (i32, i32) {
    %c0_i32 = arith.constant 0 : i32
    %c0_i32_0 = arith.constant 0 : i32
    %c0_i32_1 = arith.constant 0 : i32
    return %c0_i32, %c0_i32_0 : i32, i32
  }
  func.func @transform_2(%arg0: i32) -> (i32, i32) {
    %c0_i32 = arith.constant 0 : i32
    %c0_i32_0 = arith.constant 0 : i32
    %c0_i32_1 = arith.constant 0 : i32
    return %c0_i32, %c0_i32_0 : i32, i32
  }
  func.func @transform_3(%arg0: i32) -> (i32, i32) {
    %c0_i32 = arith.constant 0 : i32
    %c0_i32_0 = arith.constant 0 : i32
    return %arg0, %c0_i32 : i32, i32
  }
}

module attributes {stable_mosaic.version = 11 : i64} {
  func.func @_dec_convT_kernel(%arg0: i32, %arg1: memref<32x512xf32, #tpu.memory_space<vmem>>, %arg2: memref<512x256xf32, #tpu.memory_space<vmem>>, %arg3: memref<1x256xf32, #tpu.memory_space<vmem>>, %arg4: memref<32x256xf32, #tpu.memory_space<vmem>>) attributes {dimension_semantics = [#tpu.dimension_semantics<parallel>], iteration_bounds = array<i64: 1>, scalar_prefetch = 0 : i64, scratch_operands = 0 : i64, tpu.core_type = #tpu.core_type<tc>, window_params = [{transform_indices = @transform_0, window_bounds = array<i64: 32, 512>}, {pipeline_mode = #tpu.pipeline_mode<synchronous>, transform_indices = @transform_1, window_bounds = array<i64: 512, 256>}, {pipeline_mode = #tpu.pipeline_mode<synchronous>, transform_indices = @transform_2, window_bounds = array<i64: 1, 256>}, {transform_indices = @transform_3, window_bounds = array<i64: 32, 256>}]} {
    %c0 = arith.constant 0 : index
    %c0_0 = arith.constant 0 : index
    %0 = vector.load %arg1[%c0, %c0_0] : memref<32x512xf32, #tpu.memory_space<vmem>>, vector<32x512xf32>
    %c0_1 = arith.constant 0 : index
    %c0_2 = arith.constant 0 : index
    %1 = vector.load %arg2[%c0_1, %c0_2] : memref<512x256xf32, #tpu.memory_space<vmem>>, vector<512x256xf32>
    %cst = arith.constant dense<0.000000e+00> : vector<32x256xf32>
    %2 = tpu.matmul %0, %1, %cst {dimension_numbers = #tpu.dot_dimension_numbers<[1], [0], [0], [1], [0, 0, 1, 1], [], []>} : vector<32x512xf32>, vector<512x256xf32>, vector<32x256xf32> -> vector<32x256xf32>
    %c0_3 = arith.constant 0 : index
    %c0_4 = arith.constant 0 : index
    %3 = vector.load %arg3[%c0_3, %c0_4] : memref<1x256xf32, #tpu.memory_space<vmem>>, vector<1x256xf32>
    %4 = vector.broadcast %3 : vector<1x256xf32> to vector<32x256xf32>
    %5 = arith.addf %2, %4 : vector<32x256xf32>
    %cst_5 = arith.constant 0.000000e+00 : f32
    %6 = vector.broadcast %cst_5 : f32 to vector<32x256xf32>
    %7 = arith.maximumf %5, %6 : vector<32x256xf32>
    %c0_6 = arith.constant 0 : index
    %c0_7 = arith.constant 0 : index
    %8 = vector.load %arg4[%c0_6, %c0_7] : memref<32x256xf32, #tpu.memory_space<vmem>>, vector<32x256xf32>
    tpu.vector_store %arg4[%c0_6, %c0_7], %7 {strides = array<i32>} : memref<32x256xf32, #tpu.memory_space<vmem>>, vector<32x256xf32>,
    return
  }
  func.func @transform_0(%arg0: i32) -> (i32, i32) {
    %c0_i32 = arith.constant 0 : i32
    %c0_i32_0 = arith.constant 0 : i32
    return %arg0, %c0_i32 : i32, i32
  }
  func.func @transform_1(%arg0: i32) -> (i32, i32) {
    %c0_i32 = arith.constant 0 : i32
    %c0_i32_0 = arith.constant 0 : i32
    %c0_i32_1 = arith.constant 0 : i32
    return %c0_i32, %c0_i32_0 : i32, i32
  }
  func.func @transform_2(%arg0: i32) -> (i32, i32) {
    %c0_i32 = arith.constant 0 : i32
    %c0_i32_0 = arith.constant 0 : i32
    %c0_i32_1 = arith.constant 0 : i32
    return %c0_i32, %c0_i32_0 : i32, i32
  }
  func.func @transform_3(%arg0: i32) -> (i32, i32) {
    %c0_i32 = arith.constant 0 : i32
    %c0_i32_0 = arith.constant 0 : i32
    return %arg0, %c0_i32 : i32, i32
  }
}

module attributes {stable_mosaic.version = 11 : i64} {
  func.func @_dec_convT_kernel(%arg0: i32, %arg1: memref<128x256xf32, #tpu.memory_space<vmem>>, %arg2: memref<256x128xf32, #tpu.memory_space<vmem>>, %arg3: memref<1x128xf32, #tpu.memory_space<vmem>>, %arg4: memref<128x128xf32, #tpu.memory_space<vmem>>) attributes {dimension_semantics = [#tpu.dimension_semantics<parallel>], iteration_bounds = array<i64: 1>, scalar_prefetch = 0 : i64, scratch_operands = 0 : i64, tpu.core_type = #tpu.core_type<tc>, window_params = [{transform_indices = @transform_0, window_bounds = array<i64: 128, 256>}, {pipeline_mode = #tpu.pipeline_mode<synchronous>, transform_indices = @transform_1, window_bounds = array<i64: 256, 128>}, {pipeline_mode = #tpu.pipeline_mode<synchronous>, transform_indices = @transform_2, window_bounds = array<i64: 1, 128>}, {transform_indices = @transform_3, window_bounds = array<i64: 128, 128>}]} {
    %c0 = arith.constant 0 : index
    %c0_0 = arith.constant 0 : index
    %0 = vector.load %arg1[%c0, %c0_0] : memref<128x256xf32, #tpu.memory_space<vmem>>, vector<128x256xf32>
    %c0_1 = arith.constant 0 : index
    %c0_2 = arith.constant 0 : index
    %1 = vector.load %arg2[%c0_1, %c0_2] : memref<256x128xf32, #tpu.memory_space<vmem>>, vector<256x128xf32>
    %cst = arith.constant dense<0.000000e+00> : vector<128x128xf32>
    %2 = tpu.matmul %0, %1, %cst {dimension_numbers = #tpu.dot_dimension_numbers<[1], [0], [0], [1], [0, 0, 1, 1], [], []>} : vector<128x256xf32>, vector<256x128xf32>, vector<128x128xf32> -> vector<128x128xf32>
    %c0_3 = arith.constant 0 : index
    %c0_4 = arith.constant 0 : index
    %3 = vector.load %arg3[%c0_3, %c0_4] : memref<1x128xf32, #tpu.memory_space<vmem>>, vector<1x128xf32>
    %4 = vector.broadcast %3 : vector<1x128xf32> to vector<128x128xf32>
    %5 = arith.addf %2, %4 : vector<128x128xf32>
    %cst_5 = arith.constant 0.000000e+00 : f32
    %6 = vector.broadcast %cst_5 : f32 to vector<128x128xf32>
    %7 = arith.maximumf %5, %6 : vector<128x128xf32>
    %c0_6 = arith.constant 0 : index
    %c0_7 = arith.constant 0 : index
    %8 = vector.load %arg4[%c0_6, %c0_7] : memref<128x128xf32, #tpu.memory_space<vmem>>, vector<128x128xf32>
    tpu.vector_store %arg4[%c0_6, %c0_7], %7 {strides = array<i32>} : memref<128x128xf32, #tpu.memory_space<vmem>>, vector<128x128xf32>,
    return
  }
  func.func @transform_0(%arg0: i32) -> (i32, i32) {
    %c0_i32 = arith.constant 0 : i32
    %c0_i32_0 = arith.constant 0 : i32
    return %arg0, %c0_i32 : i32, i32
  }
  func.func @transform_1(%arg0: i32) -> (i32, i32) {
    %c0_i32 = arith.constant 0 : i32
    %c0_i32_0 = arith.constant 0 : i32
    %c0_i32_1 = arith.constant 0 : i32
    return %c0_i32, %c0_i32_0 : i32, i32
  }
  func.func @transform_2(%arg0: i32) -> (i32, i32) {
    %c0_i32 = arith.constant 0 : i32
    %c0_i32_0 = arith.constant 0 : i32
    %c0_i32_1 = arith.constant 0 : i32
    return %c0_i32, %c0_i32_0 : i32, i32
  }
  func.func @transform_3(%arg0: i32) -> (i32, i32) {
    %c0_i32 = arith.constant 0 : i32
    %c0_i32_0 = arith.constant 0 : i32
    return %arg0, %c0_i32 : i32, i32
  }
}

module attributes {stable_mosaic.version = 11 : i64} {
  func.func @_dec_convT_kernel(%arg0: i32, %arg1: memref<128x128xf32, #tpu.memory_space<vmem>>, %arg2: memref<128x128xf32, #tpu.memory_space<vmem>>, %arg3: memref<1x128xf32, #tpu.memory_space<vmem>>, %arg4: memref<128x128xf32, #tpu.memory_space<vmem>>) attributes {dimension_semantics = [#tpu.dimension_semantics<parallel>], iteration_bounds = array<i64: 4>, scalar_prefetch = 0 : i64, scratch_operands = 0 : i64, tpu.core_type = #tpu.core_type<tc>, window_params = [{transform_indices = @transform_0, window_bounds = array<i64: 128, 128>}, {pipeline_mode = #tpu.pipeline_mode<synchronous>, transform_indices = @transform_1, window_bounds = array<i64: 128, 128>}, {pipeline_mode = #tpu.pipeline_mode<synchronous>, transform_indices = @transform_2, window_bounds = array<i64: 1, 128>}, {transform_indices = @transform_3, window_bounds = array<i64: 128, 128>}]} {
    %c0 = arith.constant 0 : index
    %c0_0 = arith.constant 0 : index
    %0 = vector.load %arg1[%c0, %c0_0] : memref<128x128xf32, #tpu.memory_space<vmem>>, vector<128x128xf32>
    %c0_1 = arith.constant 0 : index
    %c0_2 = arith.constant 0 : index
    %1 = vector.load %arg2[%c0_1, %c0_2] : memref<128x128xf32, #tpu.memory_space<vmem>>, vector<128x128xf32>
    %cst = arith.constant dense<0.000000e+00> : vector<128x128xf32>
    %2 = tpu.matmul %0, %1, %cst {dimension_numbers = #tpu.dot_dimension_numbers<[1], [0], [0], [1], [0, 0, 1, 1], [], []>} : vector<128x128xf32>, vector<128x128xf32>, vector<128x128xf32> -> vector<128x128xf32>
    %c0_3 = arith.constant 0 : index
    %c0_4 = arith.constant 0 : index
    %3 = vector.load %arg3[%c0_3, %c0_4] : memref<1x128xf32, #tpu.memory_space<vmem>>, vector<1x128xf32>
    %4 = vector.broadcast %3 : vector<1x128xf32> to vector<128x128xf32>
    %5 = arith.addf %2, %4 : vector<128x128xf32>
    %cst_5 = arith.constant 0.000000e+00 : f32
    %6 = vector.broadcast %cst_5 : f32 to vector<128x128xf32>
    %7 = arith.subf %6, %5 : vector<128x128xf32>
    %8 = math.exp %7 : vector<128x128xf32>
    %cst_6 = arith.constant 1.000000e+00 : f32
    %9 = vector.broadcast %cst_6 : f32 to vector<128x128xf32>
    %10 = arith.addf %9, %8 : vector<128x128xf32>
    %11 = tpu.reciprocal %10 {approx = true} : vector<128x128xf32> -> vector<128x128xf32>
    %c0_7 = arith.constant 0 : index
    %c0_8 = arith.constant 0 : index
    %12 = vector.load %arg4[%c0_7, %c0_8] : memref<128x128xf32, #tpu.memory_space<vmem>>, vector<128x128xf32>
    tpu.vector_store %arg4[%c0_7, %c0_8], %11 {strides = array<i32>} : memref<128x128xf32, #tpu.memory_space<vmem>>, vector<128x128xf32>,
    return
  }
  func.func @transform_0(%arg0: i32) -> (i32, i32) {
    %c0_i32 = arith.constant 0 : i32
    %c0_i32_0 = arith.constant 0 : i32
    return %arg0, %c0_i32 : i32, i32
  }
  func.func @transform_1(%arg0: i32) -> (i32, i32) {
    %c0_i32 = arith.constant 0 : i32
    %c0_i32_0 = arith.constant 0 : i32
    %c0_i32_1 = arith.constant 0 : i32
    return %c0_i32, %c0_i32_0 : i32, i32
  }
  func.func @transform_2(%arg0: i32) -> (i32, i32) {
    %c0_i32 = arith.constant 0 : i32
    %c0_i32_0 = arith.constant 0 : i32
    %c0_i32_1 = arith.constant 0 : i32
    return %c0_i32, %c0_i32_0 : i32, i32
  }
  func.func @transform_3(%arg0: i32) -> (i32, i32) {
    %c0_i32 = arith.constant 0 : i32
    %c0_i32_0 = arith.constant 0 : i32
    return %arg0, %c0_i32 : i32, i32
  }
}

</mosaic_0001>

<bundles_post_ra>
// kernel: autoencoder_forward.6
= control target key start
LH: loop header
LB: loop body
LE: loop exit
PB: predicated region body
PF: predicated region fallthrough
CT: control target
= control target key end

     0   :  { %s1350_s12 = smov 0   ;;  %s1352_s13 = smov 0   ;;  %s1715_s0 = inlined_call_operand.vmem [shape: f32[4,512,27], index: 0, kind: input, shape index: {}]   ;;  %s1716_s1 = inlined_call_operand.vmem [shape: f32[27,128], index: 1, kind: input, shape index: {}]   ;;  %s1717_s2 = inlined_call_operand.vmem [shape: f32[1,128], index: 2, kind: input, shape index: {}]   ;;  %s1718_s3 = inlined_call_operand.vmem [shape: f32[512,128], index: 3, kind: output, shape index: {}]  }
   0x1   :  { %s1354_s14 = smov 0  }
   0x2 LB: > { %s1151_s15 = sadd.s32 4294967295, %s1328_s14   ;;  %s1367_s16 = sadd.s32 1, %s1328_s14   ;;  %s1328_s14 = sphi %s1354_s14, %s1721_s14   ;;  %s1324_s13 = sphi %s1352_s13, %s1720_s13   ;;  %s1320_s12 = sphi %s1350_s12, %s1719_s12  }
   0x3   : > { %s17_s17 = ssub.s32 %s1328_s14, %s1367_s16  ;;  %s20_s18 = sadd.s32 1, %s1324_s13 }
   0x4   : > { %p18_p0 = scmp.eq.s32.totalorder %s17_s17, 0  ;;  %p27_p1 = scmp.ne.s32.totalorder %s1324_s13, %s1320_s12 }
   0x5   : > { %p28_p2 = scmp.eq.s32.totalorder %s1328_s14, 0  ;;  %p1154_p4 = scmp.ge.s32.totalorder %s1328_s14, 4 }
   0x6   : > { %s1376_s19 = scalar_select %p18_p0, %s1324_s13, %s20_s18  }
   0x7   : > { %p29_p3 = por %p28_p2, %p27_p1  ;;  %127 = sbr.rel (%p1154_p4) target bundleno = 80 (0x50), region = 24 }
   0xc   : > { %130 = sbr.rel (!%p29_p3) target bundleno = 80 (0x50), region = 28  ;;  %s132_s20 = sand.u32 (%p29_p3), 1, %s1324_s13  }
   0xd   : > { %s1280_s21 = sshll.u32 (%p29_p3), %s1328_s14, 7  ;;  %s1155_s22 = sshll.u32 (%p29_p3), %s132_s20, 9 }
   0xe   : > { %s1384_s25 = scalar_lea.vmem (%p29_p3), %s1715_s0, %s1280_s21  ;;  %s1389_s26 = scalar_lea.vmem (%p29_p3), [#allocation2], %s1155_s22 }
   0xf   : > { %v292_v0 = vld [vmem:[%s1384_s25] sm:$0xff] (%p29_p3)  ;;  %v294_v1 = vld [vmem:[%s1384_s25 + $0x8] sm:$0xff] (%p29_p3)  ;;  %v296_v2 = vld [vmem:[%s1384_s25 + $0x10] sm:$0xff] (%p29_p3) }
  0x10   : > { %293 = vst [vmem:[%s1389_s26] sm:$0xff] (%p29_p3), %v292_v0  ;;  %v298_v3 = vld [vmem:[%s1384_s25 + $0x18] sm:$0xff] (%p29_p3)  ;;  %v300_v4 = vld [vmem:[%s1384_s25 + $0x20] sm:$0xff] (%p29_p3)  ;;  %v302_v5 = vld [vmem:[%s1384_s25 + $0x28] sm:$0xff] (%p29_p3) }
  0x11   : > { %295 = vst [vmem:[%s1389_s26 + $0x8] sm:$0xff] %v294_v1  ;;  %v304_v6 = vld [vmem:[%s1384_s25 + $0x30] sm:$0xff]  ;;  %v306_v7 = vld [vmem:[%s1384_s25 + $0x38] sm:$0xff]  ;;  %v308_v8 = vld [vmem:[%s1384_s25 + $0x40] sm:$0xff] }
  0x12   : > { %297 = vst [vmem:[%s1389_s26 + $0x10] sm:$0xff] %v296_v2  ;;  %v310_v9 = vld [vmem:[%s1384_s25 + $0x48] sm:$0xff]  ;;  %v312_v10 = vld [vmem:[%s1384_s25 + $0x50] sm:$0xff]  ;;  %v314_v11 = vld [vmem:[%s1384_s25 + $0x58] sm:$0xff] }
  0x13   : > { %299 = vst [vmem:[%s1389_s26 + $0x18] sm:$0xff] %v298_v3  ;;  %v316_v12 = vld [vmem:[%s1384_s25 + $0x60] sm:$0xff]  ;;  %v318_v13 = vld [vmem:[%s1384_s25 + $0x68] sm:$0xff]  ;;  %v320_v14 = vld [vmem:[%s1384_s25 + $0x70] sm:$0xff] }
  0x14   : > { %301 = vst [vmem:[%s1389_s26 + $0x20] sm:$0xff] %v300_v4  ;;  %v322_v15 = vld [vmem:[%s1384_s25 + $0x78] sm:$0xff]  ;;  %v324_v16 = vld [vmem:[%s1384_s25 + $0x200] sm:$0xff]  ;;  %v326_v17 = vld [vmem:[%s1384_s25 + $0x208] sm:$0xff] }
  0x15   : > { %303 = vst [vmem:[%s1389_s26 + $0x28] sm:$0xff] %v302_v5  ;;  %v328_v18 = vld [vmem:[%s1384_s25 + $0x210] sm:$0xff]  ;;  %v330_v19 = vld [vmem:[%s1384_s25 + $0x218] sm:$0xff]  ;;  %v332_v20 = vld [vmem:[%s1384_s25 + $0x220] sm:$0xff] }
  0x16   : > { %305 = vst [vmem:[%s1389_s26 + $0x30] sm:$0xff] %v304_v6  ;;  %v334_v21 = vld [vmem:[%s1384_s25 + $0x228] sm:$0xff]  ;;  %v336_v22 = vld [vmem:[%s1384_s25 + $0x230] sm:$0xff]  ;;  %v338_v23 = vld [vmem:[%s1384_s25 + $0x238] sm:$0xff] }
  0x17   : > { %307 = vst [vmem:[%s1389_s26 + $0x38] sm:$0xff] %v306_v7  ;;  %v340_v24 = vld [vmem:[%s1384_s25 + $0x240] sm:$0xff]  ;;  %v342_v25 = vld [vmem:[%s1384_s25 + $0x248] sm:$0xff]  ;;  %v344_v26 = vld [vmem:[%s1384_s25 + $0x250] sm:$0xff] }
  0x18   : > { %309 = vst [vmem:[%s1389_s26 + $0x40] sm:$0xff] %v308_v8  ;;  %v346_v27 = vld [vmem:[%s1384_s25 + $0x258] sm:$0xff]  ;;  %v348_v28 = vld [vmem:[%s1384_s25 + $0x260] sm:$0xff]  ;;  %v350_v29 = vld [vmem:[%s1384_s25 + $0x268] sm:$0xff] }
  0x19   : > { %311 = vst [vmem:[%s1389_s26 + $0x48] sm:$0xff] %v310_v9  ;;  %v352_v30 = vld [vmem:[%s1384_s25 + $0x270] sm:$0xff]  ;;  %v354_v31 = vld [vmem:[%s1384_s25 + $0x278] sm:$0xff]  ;;  %v356_v32 = vld [vmem:[%s1384_s25 + $0x400] sm:$0xff] }
  0x1a   : > { %313 = vst [vmem:[%s1389_s26 + $0x50] sm:$0xff] %v312_v10  ;;  %v358_v33 = vld [vmem:[%s1384_s25 + $0x408] sm:$0xff]  ;;  %v360_v34 = vld [vmem:[%s1384_s25 + $0x410] sm:$0xff]  ;;  %v362_v35 = vld [vmem:[%s1384_s25 + $0x418] sm:$0xff] }
  0x1b   : > { %315 = vst [vmem:[%s1389_s26 + $0x58] sm:$0xff] %v314_v11  ;;  %v364_v36 = vld [vmem:[%s1384_s25 + $0x420] sm:$0xff]  ;;  %v366_v37 = vld [vmem:[%s1384_s25 + $0x428] sm:$0xff]  ;;  %v368_v38 = vld [vmem:[%s1384_s25 + $0x430] sm:$0xff] }
  0x1c   : > { %317 = vst [vmem:[%s1389_s26 + $0x60] sm:$0xff] %v316_v12  ;;  %v370_v39 = vld [vmem:[%s1384_s25 + $0x438] sm:$0xff]  ;;  %v372_v40 = vld [vmem:[%s1384_s25 + $0x440] sm:$0xff]  ;;  %v374_v41 = vld [vmem:[%s1384_s25 + $0x448] sm:$0xff] }
  0x1d   : > { %319 = vst [vmem:[%s1389_s26 + $0x68] sm:$0xff] %v318_v13  ;;  %v376_v42 = vld [vmem:[%s1384_s25 + $0x450] sm:$0xff]  ;;  %v378_v43 = vld [vmem:[%s1384_s25 + $0x458] sm:$0xff]  ;;  %v380_v44 = vld [vmem:[%s1384_s25 + $0x460] sm:$0xff] }
  0x1e   : > { %321 = vst [vmem:[%s1389_s26 + $0x70] sm:$0xff] %v320_v14  ;;  %v382_v45 = vld [vmem:[%s1384_s25 + $0x468] sm:$0xff]  ;;  %v384_v46 = vld [vmem:[%s1384_s25 + $0x470] sm:$0xff]  ;;  %v386_v47 = vld [vmem:[%s1384_s25 + $0x478] sm:$0xff] }
  0x1f   : > { %323 = vst [vmem:[%s1389_s26 + $0x78] sm:$0xff] %v322_v15  ;;  %v388_v48 = vld [vmem:[%s1384_s25 + $0x600] sm:$0xff]  ;;  %v390_v49 = vld [vmem:[%s1384_s25 + $0x608] sm:$0xff]  ;;  %v392_v50 = vld [vmem:[%s1384_s25 + $0x610] sm:$0xff] }
  0x20   : > { %325 = vst [vmem:[%s1389_s26 + $0x80] sm:$0xff] %v324_v16  ;;  %v394_v51 = vld [vmem:[%s1384_s25 + $0x618] sm:$0xff]  ;;  %v396_v52 = vld [vmem:[%s1384_s25 + $0x620] sm:$0xff]  ;;  %v398_v53 = vld [vmem:[%s1384_s25 + $0x628] sm:$0xff] }
  0x21   : > { %327 = vst [vmem:[%s1389_s26 + $0x88] sm:$0xff] %v326_v17  ;;  %v400_v54 = vld [vmem:[%s1384_s25 + $0x630] sm:$0xff]  ;;  %v402_v55 = vld [vmem:[%s1384_s25 + $0x638] sm:$0xff]  ;;  %v404_v56 = vld [vmem:[%s1384_s25 + $0x640] sm:$0xff] }
  0x22   : > { %329 = vst [vmem:[%s1389_s26 + $0x90] sm:$0xff] %v328_v18  ;;  %v406_v57 = vld [vmem:[%s1384_s25 + $0x648] sm:$0xff]  ;;  %v408_v58 = vld [vmem:[%s1384_s25 + $0x650] sm:$0xff]  ;;  %v410_v59 = vld [vmem:[%s1384_s25 + $0x658] sm:$0xff] }
  0x23   : > { %331 = vst [vmem:[%s1389_s26 + $0x98] sm:$0xff] %v330_v19  ;;  %v412_v60 = vld [vmem:[%s1384_s25 + $0x660] sm:$0xff]  ;;  %v414_v61 = vld [vmem:[%s1384_s25 + $0x668] sm:$0xff]  ;;  %v416_v62 = vld [vmem:[%s1384_s25 + $0x670] sm:$0xff] }
  0x24   : > { %333 = vst [vmem:[%s1389_s26 + $0xa0] sm:$0xff] %v332_v20  ;;  %v418_v63 = vld [vmem:[%s1384_s25 + $0x678] sm:$0xff] }
  0x25   : > { %335 = vst [vmem:[%s1389_s26 + $0xa8] sm:$0xff] %v334_v21 }
  0x26   : > { %337 = vst [vmem:[%s1389_s26 + $0xb0] sm:$0xff] %v336_v22 }
  0x27   : > { %339 = vst [vmem:[%s1389_s26 + $0xb8] sm:$0xff] %v338_v23 }
  0x28   : > { %341 = vst [vmem:[%s1389_s26 + $0xc0] sm:$0xff] %v340_v24 }
  0x29   : > { %343 = vst [vmem:[%s1389_s26 + $0xc8] sm:$0xff] %v342_v25 }
  0x2a   : > { %345 = vst [vmem:[%s1389_s26 + $0xd0] sm:$0xff] %v344_v26 }
  0x2b   : > { %347 = vst [vmem:[%s1389_s26 + $0xd8] sm:$0xff] %v346_v27 }
  0x2c   : > { %349 = vst [vmem:[%s1389_s26 + $0xe0] sm:$0xff] %v348_v28 }
  0x2d   : > { %351 = vst [vmem:[%s1389_s26 + $0xe8] sm:$0xff] %v350_v29 }
  0x2e   : > { %353 = vst [vmem:[%s1389_s26 + $0xf0] sm:$0xff] %v352_v30 }
  0x2f   : > { %355 = vst [vmem:[%s1389_s26 + $0xf8] sm:$0xff] %v354_v31 }
  0x30   : > { %357 = vst [vmem:[%s1389_s26 + $0x100] sm:$0xff] %v356_v32 }
  0x31   : > { %359 = vst [vmem:[%s1389_s26 + $0x108] sm:$0xff] %v358_v33 }
  0x32   : > { %361 = vst [vmem:[%s1389_s26 + $0x110] sm:$0xff] %v360_v34 }
  0x33   : > { %363 = vst [vmem:[%s1389_s26 + $0x118] sm:$0xff] %v362_v35 }
  0x34   : > { %365 = vst [vmem:[%s1389_s26 + $0x120] sm:$0xff] %v364_v36 }
  0x35   : > { %367 = vst [vmem:[%s1389_s26 + $0x128] sm:$0xff] %v366_v37 }
  0x36   : > { %369 = vst [vmem:[%s1389_s26 + $0x130] sm:$0xff] %v368_v38 }
  0x37   : > { %371 = vst [vmem:[%s1389_s26 + $0x138] sm:$0xff] %v370_v39 }
  0x38   : > { %373 = vst [vmem:[%s1389_s26 + $0x140] sm:$0xff] %v372_v40 }
  0x39   : > { %375 = vst [vmem:[%s1389_s26 + $0x148] sm:$0xff] %v374_v41 }
  0x3a   : > { %377 = vst [vmem:[%s1389_s26 + $0x150] sm:$0xff] %v376_v42 }
  0x3b   : > { %379 = vst [vmem:[%s1389_s26 + $0x158] sm:$0xff] %v378_v43 }
  0x3c   : > { %381 = vst [vmem:[%s1389_s26 + $0x160] sm:$0xff] %v380_v44 }
  0x3d   : > { %383 = vst [vmem:[%s1389_s26 + $0x168] sm:$0xff] %v382_v45 }
  0x3e   : > { %385 = vst [vmem:[%s1389_s26 + $0x170] sm:$0xff] %v384_v46 }
  0x3f   : > { %387 = vst [vmem:[%s1389_s26 + $0x178] sm:$0xff] %v386_v47 }
  0x40   : > { %389 = vst [vmem:[%s1389_s26 + $0x180] sm:$0xff] %v388_v48 }
  0x41   : > { %391 = vst [vmem:[%s1389_s26 + $0x188] sm:$0xff] %v390_v49 }
  0x42   : > { %393 = vst [vmem:[%s1389_s26 + $0x190] sm:$0xff] %v392_v50 }
  0x43   : > { %395 = vst [vmem:[%s1389_s26 + $0x198] sm:$0xff] %v394_v51 }
  0x44   : > { %397 = vst [vmem:[%s1389_s26 + $0x1a0] sm:$0xff] %v396_v52 }
  0x45   : > { %399 = vst [vmem:[%s1389_s26 + $0x1a8] sm:$0xff] %v398_v53 }
  0x46   : > { %401 = vst [vmem:[%s1389_s26 + $0x1b0] sm:$0xff] %v400_v54 }
  0x47   : > { %403 = vst [vmem:[%s1389_s26 + $0x1b8] sm:$0xff] %v402_v55 }
  0x48   : > { %405 = vst [vmem:[%s1389_s26 + $0x1c0] sm:$0xff] %v404_v56 }
  0x49   : > { %407 = vst [vmem:[%s1389_s26 + $0x1c8] sm:$0xff] %v406_v57 }
  0x4a   : > { %409 = vst [vmem:[%s1389_s26 + $0x1d0] sm:$0xff] %v408_v58 }
  0x4b   : > { %411 = vst [vmem:[%s1389_s26 + $0x1d8] sm:$0xff] %v410_v59 }
  0x4c   : > { %413 = vst [vmem:[%s1389_s26 + $0x1e0] sm:$0xff] %v412_v60 }
  0x4d   : > { %415 = vst [vmem:[%s1389_s26 + $0x1e8] sm:$0xff] %v414_v61 }
  0x4e   : > { %417 = vst [vmem:[%s1389_s26 + $0x1f0] sm:$0xff] %v416_v62 }
  0x4f   : > { %419 = vst [vmem:[%s1389_s26 + $0x1f8] sm:$0xff] %v418_v63 }
  0x50 PF: > { %p1158_p5 = scmp.ge.s32.totalorder %s1328_s14, 1  ;;  %p424_p6 = scmp.lt.s32.totalorder %s1328_s14, 5 }
  0x52   : > { %p425_p7 = pnand %p1158_p5, %p424_p6 }
  0x53   : > { %s431_s4 = sand.u32 (!%p425_p7), 1, %s1320_s12   ;;  %s1160_s11 = sshll.u32 (!%p425_p7), %s1151_s15, 4 }
  0x54   : > { %428 = sbr.rel (%p425_p7) target bundleno = 358 (0x166), region = 66  ;;  %s1159_s5 = sshll.u32 (!%p425_p7), %s431_s4, 9 }
  0x55   : > { %s1531_s10 = scalar_lea.vmem (!%p425_p7), [#allocation2], %s1159_s5  ;;  %p456_p8 = scmp.lt.s32.totalorder (!%p425_p7), %s1160_s11, 63 }
  0x59   : > { %v464_v0 = vld [vmem:[%s1716_s1 + $0x18] sm:$0x7]  ;;  %vm530_vm0 = vcmask 1042432   ;;  %v463_v1 = vld [vmem:[%s1716_s1 + $0x10] sm:$0xff]  ;;  %v462_v2 = vld [vmem:[%s1716_s1 + $0x8] sm:$0xff]  ;;  %vm481_vm1 = vcmask 220160  }
  0x5a   : > { %1228 = vmatpush.msk.msra.mxu2 %vm530_vm0, %v464_v0  ;;  %1261 = vmatpush.msk.msra.mxu3 %vm530_vm0, %v464_v0  ;;  %v461_v3 = vld [vmem:[%s1716_s1] sm:$0xff]  ;;  %v1213_v8 = vld [vmem:[%s1531_s10 + $0x108] sm:$0xff]  ;;  %v1214_v12 = vld [vmem:[%s1531_s10 + $0x110] sm:$0xff]  ;;  %s1723_s11 = smov (!%p456_p8, %s1160_s11), 63 }
  0x5b   : > { %1162 = vmatpush.msk.msra.mxu0 %vm530_vm0, %v464_v0  ;;  %1195 = vmatpush.msk.msra.mxu1 %vm530_vm0, %v464_v0  ;;  %v1212_v4 = vld [vmem:[%s1531_s10 + $0x100] sm:$0xff]  ;;  %v1246_v9 = vld [vmem:[%s1531_s10 + $0x188] sm:$0xff]  ;;  %v1247_v13 = vld [vmem:[%s1531_s10 + $0x190] sm:$0xff]  ;;  %s1161_s18 = sshll.u32 %s1723_s11, 3 }
  0x5c   : > { %823 = vmatpush.msra.mxu2 %v463_v1  ;;  %969 = vmatpush.msra.mxu3 %v463_v1  ;;  %v1245_v5 = vld [vmem:[%s1531_s10 + $0x180] sm:$0xff]  ;;  %v466_v10 = vld [vmem:[%s1531_s10 + $0x8] sm:$0xff]  ;;  %v467_v14 = vld [vmem:[%s1531_s10 + $0x10] sm:$0xff]  ;;  %s1672_s20 = scalar_lea.vmem %s1718_s3, %s1161_s18 }
  0x5d   : > { %547 = vmatpush.msra.mxu0 %v463_v1  ;;  %677 = vmatpush.msra.mxu1 %v463_v1  ;;  %v465_v6 = vld [vmem:[%s1531_s10] sm:$0xff]  ;;  %v1180_v11 = vld [vmem:[%s1531_s10 + $0x88] sm:$0xff]  ;;  %v1181_v15 = vld [vmem:[%s1531_s10 + $0x90] sm:$0xff] }
  0x5e   : > { %824 = vmatpush.msra.mxu2 %v462_v2  ;;  %970 = vmatpush.msra.mxu3 %v462_v2  ;;  %v1179_v7 = vld [vmem:[%s1531_s10 + $0x80] sm:$0xff]  ;;  %v1215_v16 = vld [vmem:[%s1531_s10 + $0x118] sm:$0xff]  ;;  %v1217_v24 = vld [vmem:[%s1531_s10 + $0x128] sm:$0xff] }
  0x5f   : > { %548 = vmatpush.msra.mxu0 %v462_v2  ;;  %678 = vmatpush.msra.mxu1 %v462_v2  ;;  %v1248_v17 = vld [vmem:[%s1531_s10 + $0x198] sm:$0xff]  ;;  %v1216_v20 = vld [vmem:[%s1531_s10 + $0x120] sm:$0xff]  ;;  %v1250_v25 = vld [vmem:[%s1531_s10 + $0x1a8] sm:$0xff] }
  0x60   : > { %825 = vmatpush.msra.mxu2 %v461_v3  ;;  %971 = vmatpush.msra.mxu3 %v461_v3  ;;  %v468_v18 = vld [vmem:[%s1531_s10 + $0x18] sm:$0xff]  ;;  %v1249_v21 = vld [vmem:[%s1531_s10 + $0x1a0] sm:$0xff]  ;;  %v470_v26 = vld [vmem:[%s1531_s10 + $0x28] sm:$0xff] }
  0x61   : > { %1229 = vmatmul.msk.f32.vlgmr.msra.gmra.mxu2 %vm481_vm1, %v1212_v4  ;;  %1262 = vmatmul.msk.f32.vlgmr.msra.gmra.mxu3 %vm481_vm1, %v1245_v5  ;;  %v1182_v19 = vld [vmem:[%s1531_s10 + $0x98] sm:$0xff]  ;;  %v469_v22 = vld [vmem:[%s1531_s10 + $0x20] sm:$0xff]  ;;  %v1184_v27 = vld [vmem:[%s1531_s10 + $0xa8] sm:$0xff] }
  0x62   : > { %549 = vmatpush.msra.mxu0 %v461_v3  ;;  %679 = vmatpush.msra.mxu1 %v461_v3  ;;  %v1183_v23 = vld [vmem:[%s1531_s10 + $0xa0] sm:$0xff]  ;;  %v1218_v28 = vld [vmem:[%s1531_s10 + $0x130] sm:$0xff]  ;;  %v1219_v32 = vld [vmem:[%s1531_s10 + $0x138] sm:$0xff] }
  0x63   : > { %1163 = vmatmul.msk.f32.vlgmr.msra.gmra.mxu0 %vm481_vm1, %v465_v6  ;;  %1196 = vmatmul.msk.f32.vlgmr.msra.gmra.mxu1 %vm481_vm1, %v1179_v7  ;;  %v1251_v29 = vld [vmem:[%s1531_s10 + $0x1b0] sm:$0xff]  ;;  %v1252_v33 = vld [vmem:[%s1531_s10 + $0x1b8] sm:$0xff]  ;;  %v1220_v36 = vld [vmem:[%s1531_s10 + $0x140] sm:$0xff] }
  0x64   : > { %v471_v30 = vld [vmem:[%s1531_s10 + $0x30] sm:$0xff]  ;;  %v472_v34 = vld [vmem:[%s1531_s10 + $0x38] sm:$0xff]  ;;  %v1253_v37 = vld [vmem:[%s1531_s10 + $0x1c0] sm:$0xff] }
  0x65   : > { %v1185_v31 = vld [vmem:[%s1531_s10 + $0xb0] sm:$0xff]  ;;  %v1186_v35 = vld [vmem:[%s1531_s10 + $0xb8] sm:$0xff]  ;;  %v473_v38 = vld [vmem:[%s1531_s10 + $0x40] sm:$0xff] }
  0x66   : > { %v1187_v39 = vld [vmem:[%s1531_s10 + $0xc0] sm:$0xff]  ;;  %v1221_v40 = vld [vmem:[%s1531_s10 + $0x148] sm:$0xff]  ;;  %v1222_v44 = vld [vmem:[%s1531_s10 + $0x150] sm:$0xff] }
  0x67   : > { %v1254_v41 = vld [vmem:[%s1531_s10 + $0x1c8] sm:$0xff]  ;;  %v1255_v45 = vld [vmem:[%s1531_s10 + $0x1d0] sm:$0xff]  ;;  %v1223_v48 = vld [vmem:[%s1531_s10 + $0x158] sm:$0xff] }
  0x68   : > { %v474_v42 = vld [vmem:[%s1531_s10 + $0x48] sm:$0xff]  ;;  %v475_v46 = vld [vmem:[%s1531_s10 + $0x50] sm:$0xff]  ;;  %v1256_v49 = vld [vmem:[%s1531_s10 + $0x1d8] sm:$0xff] }
  0x69   : > { %1230 = vmatmul.msk.f32.gmra.mxu2 %vm481_vm1, %v1213_v8  ;;  %1263 = vmatmul.msk.f32.gmra.mxu3 %vm481_vm1, %v1246_v9  ;;  %v1188_v43 = vld [vmem:[%s1531_s10 + $0xc8] sm:$0xff]  ;;  %v1189_v47 = vld [vmem:[%s1531_s10 + $0xd0] sm:$0xff]  ;;  %v476_v50 = vld [vmem:[%s1531_s10 + $0x58] sm:$0xff] }
  0x6a   : > { %v1190_v51 = vld [vmem:[%s1531_s10 + $0xd8] sm:$0xff]  ;;  %v1224_v52 = vld [vmem:[%s1531_s10 + $0x160] sm:$0xff]  ;;  %v1225_v56 = vld [vmem:[%s1531_s10 + $0x168] sm:$0xff] }
  0x6b   : > { %1164 = vmatmul.msk.f32.gmra.mxu0 %vm481_vm1, %v466_v10  ;;  %1197 = vmatmul.msk.f32.gmra.mxu1 %vm481_vm1, %v1180_v11  ;;  %v1257_v53 = vld [vmem:[%s1531_s10 + $0x1e0] sm:$0xff]  ;;  %v1258_v57 = vld [vmem:[%s1531_s10 + $0x1e8] sm:$0xff]  ;;  %v1226_v60 = vld [vmem:[%s1531_s10 + $0x170] sm:$0xff] }
  0x6c   : > { %v477_v54 = vld [vmem:[%s1531_s10 + $0x60] sm:$0xff]  ;;  %v478_v58 = vld [vmem:[%s1531_s10 + $0x68] sm:$0xff]  ;;  %v1259_v61 = vld [vmem:[%s1531_s10 + $0x1f0] sm:$0xff] }
  0x6d   : > { %v1191_v55 = vld [vmem:[%s1531_s10 + $0xe0] sm:$0xff]  ;;  %v1192_v59 = vld [vmem:[%s1531_s10 + $0xe8] sm:$0xff]  ;;  %v479_v62 = vld [vmem:[%s1531_s10 + $0x70] sm:$0xff] }
  0x6e   : > { %v1193_v63 = vld [vmem:[%s1531_s10 + $0xf0] sm:$0xff]  ;;  %v1227_v0 = vld [vmem:[%s1531_s10 + $0x178] sm:$0xff]  ;;  %v1666_v10 = vld [vmem:[%s1717_s2] ss:$0 sm:$0xff] }
  0x6f   : > { %v1260_v1 = vld [vmem:[%s1531_s10 + $0x1f8] sm:$0xff] }
  0x70   : > { %v480_v2 = vld [vmem:[%s1531_s10 + $0x78] sm:$0xff] }
  0x71   : > { %1231 = vmatmul.msk.f32.gmra.mxu2 %vm481_vm1, %v1214_v12  ;;  %1264 = vmatmul.msk.f32.gmra.mxu3 %vm481_vm1, %v1247_v13  ;;  %v1194_v3 = vld [vmem:[%s1531_s10 + $0xf8] sm:$0xff] }
  0x73   : > { %1165 = vmatmul.msk.f32.gmra.mxu0 %vm481_vm1, %v467_v14  ;;  %1198 = vmatmul.msk.f32.gmra.mxu1 %vm481_vm1, %v1181_v15 }
  0x79   : > { %1232 = vmatmul.msk.f32.gmra.mxu2 %vm481_vm1, %v1215_v16  ;;  %1265 = vmatmul.msk.f32.gmra.mxu3 %vm481_vm1, %v1248_v17 }
  0x7b   : > { %1166 = vmatmul.msk.f32.gmra.mxu0 %vm481_vm1, %v468_v18  ;;  %1199 = vmatmul.msk.f32.gmra.mxu1 %vm481_vm1, %v1182_v19 }
  0x81   : > { %1233 = vmatmul.msk.f32.gmra.mxu2 %vm481_vm1, %v1216_v20  ;;  %1266 = vmatmul.msk.f32.gmra.mxu3 %vm481_vm1, %v1249_v21 }
  0x83   : > { %1167 = vmatmul.msk.f32.gmra.mxu0 %vm481_vm1, %v469_v22  ;;  %1200 = vmatmul.msk.f32.gmra.mxu1 %vm481_vm1, %v1183_v23 }
  0x89   : > { %1234 = vmatmul.msk.f32.gmra.mxu2 %vm481_vm1, %v1217_v24  ;;  %1267 = vmatmul.msk.f32.gmra.mxu3 %vm481_vm1, %v1250_v25 }
  0x8b   : > { %1168 = vmatmul.msk.f32.gmra.mxu0 %vm481_vm1, %v470_v26  ;;  %1201 = vmatmul.msk.f32.gmra.mxu1 %vm481_vm1, %v1184_v27 }
  0x91   : > { %1235 = vmatmul.msk.f32.gmra.mxu2 %vm481_vm1, %v1218_v28  ;;  %1268 = vmatmul.msk.f32.gmra.mxu3 %vm481_vm1, %v1251_v29 }
  0x93   : > { %1169 = vmatmul.msk.f32.gmra.mxu0 %vm481_vm1, %v471_v30  ;;  %1202 = vmatmul.msk.f32.gmra.mxu1 %vm481_vm1, %v1185_v31 }
  0x99   : > { %1236 = vmatmul.msk.f32.gmra.mxu2 %vm481_vm1, %v1219_v32  ;;  %1269 = vmatmul.msk.f32.gmra.mxu3 %vm481_vm1, %v1252_v33 }
  0x9b   : > { %1170 = vmatmul.msk.f32.gmra.mxu0 %vm481_vm1, %v472_v34  ;;  %1203 = vmatmul.msk.f32.gmra.mxu1 %vm481_vm1, %v1186_v35 }
  0xa1   : > { %1237 = vmatmul.msk.f32.gmra.mxu2 %vm481_vm1, %v1220_v36  ;;  %1270 = vmatmul.msk.f32.gmra.mxu3 %vm481_vm1, %v1253_v37 }
  0xa3   : > { %1171 = vmatmul.msk.f32.gmra.mxu0 %vm481_vm1, %v473_v38  ;;  %1204 = vmatmul.msk.f32.gmra.mxu1 %vm481_vm1, %v1187_v39 }
  0xa9   : > { %1238 = vmatmul.msk.f32.gmra.mxu2 %vm481_vm1, %v1221_v40  ;;  %1271 = vmatmul.msk.f32.gmra.mxu3 %vm481_vm1, %v1254_v41 }
  0xab   : > { %1172 = vmatmul.msk.f32.gmra.mxu0 %vm481_vm1, %v474_v42  ;;  %1205 = vmatmul.msk.f32.gmra.mxu1 %vm481_vm1, %v1188_v43 }
  0xb1   : > { %1239 = vmatmul.msk.f32.gmra.mxu2 %vm481_vm1, %v1222_v44  ;;  %1272 = vmatmul.msk.f32.gmra.mxu3 %vm481_vm1, %v1255_v45 }
  0xb3   : > { %1173 = vmatmul.msk.f32.gmra.mxu0 %vm481_vm1, %v475_v46  ;;  %1206 = vmatmul.msk.f32.gmra.mxu1 %vm481_vm1, %v1189_v47 }
  0xb9   : > { %1240 = vmatmul.msk.f32.gmra.mxu2 %vm481_vm1, %v1223_v48  ;;  %1273 = vmatmul.msk.f32.gmra.mxu3 %vm481_vm1, %v1256_v49 }
  0xbb   : > { %1174 = vmatmul.msk.f32.gmra.mxu0 %vm481_vm1, %v476_v50  ;;  %1207 = vmatmul.msk.f32.gmra.mxu1 %vm481_vm1, %v1190_v51 }
  0xc1   : > { %1241 = vmatmul.msk.f32.gmra.mxu2 %vm481_vm1, %v1224_v52  ;;  %1274 = vmatmul.msk.f32.gmra.mxu3 %vm481_vm1, %v1257_v53 }
  0xc3   : > { %1175 = vmatmul.msk.f32.gmra.mxu0 %vm481_vm1, %v477_v54  ;;  %1208 = vmatmul.msk.f32.gmra.mxu1 %vm481_vm1, %v1191_v55 }
  0xc9   : > { %1242 = vmatmul.msk.f32.gmra.mxu2 %vm481_vm1, %v1225_v56  ;;  %1275 = vmatmul.msk.f32.gmra.mxu3 %vm481_vm1, %v1258_v57 }
  0xcb   : > { %1176 = vmatmul.msk.f32.gmra.mxu0 %vm481_vm1, %v478_v58  ;;  %1209 = vmatmul.msk.f32.gmra.mxu1 %vm481_vm1, %v1192_v59 }
  0xd1   : > { %1243 = vmatmul.msk.f32.gmra.mxu2 %vm481_vm1, %v1226_v60  ;;  %1276 = vmatmul.msk.f32.gmra.mxu3 %vm481_vm1, %v1259_v61 }
  0xd3   : > { %1177 = vmatmul.msk.f32.gmra.mxu0 %vm481_vm1, %v479_v62  ;;  %1210 = vmatmul.msk.f32.gmra.mxu1 %vm481_vm1, %v1193_v63 }
  0xd9   : > { %1244 = vmatmul.msk.f32.gmra.mxu2 %vm481_vm1, %v1227_v0  ;;  %1277 = vmatmul.msk.f32.gmra.mxu3 %vm481_vm1, %v1260_v1 }
  0xdb   : > { %1178 = vmatmul.msk.f32.gmra.mxu0 %vm481_vm1, %v480_v2  ;;  %1211 = vmatmul.msk.f32.gmra.mxu1 %vm481_vm1, %v1194_v3 }
  0xe0   : > { %v551_v4 = vpop.f32.mrf.mxu0  ;;  %v681_v5 = vpop.f32.mrf.mxu1 }
  0xe1   : > { %v729_v6 = vmax.f32 %v551_v4, %v681_v5 }
  0xe4   : > { %v827_v7 = vpop.f32.mrf.mxu2  ;;  %v973_v8 = vpop.f32.mrf.mxu3 }
  0xe5   : > { %v875_v9 = vmax.f32 %v729_v6, %v827_v7 }
  0xe7   : > { %v1021_v11 = vmax.f32 %v875_v9, %v973_v8 }
  0xe8   : > { %v554_v12 = vpop.f32.mrf.mxu0  ;;  %v684_v13 = vpop.f32.mrf.mxu1 }
  0xe9   : > { %v1041_v14 = vadd.f32 %v1666_v10, %v1021_v11  ;;  %v730_v15 = vmax.f32 %v554_v12, %v684_v13 }
  0xeb   : > { %v1057_v16 = vmax.f32 %v1041_v14, 0.0 }
  0xec   : > { %v830_v17 = vpop.f32.mrf.mxu2  ;;  %v976_v18 = vpop.f32.mrf.mxu3 }
  0xed   : > { %1073 = vst [vmem:[%s1672_s20] sm:$0xff] %v1057_v16  ;;  %v876_v19 = vmax.f32 %v730_v15, %v830_v17 }
  0xef   : > { %v1022_v20 = vmax.f32 %v876_v19, %v976_v18 }
  0xf0   : > { %v557_v21 = vpop.f32.mrf.mxu0  ;;  %v687_v22 = vpop.f32.mrf.mxu1 }
  0xf1   : > { %v1042_v23 = vadd.f32 %v1666_v10, %v1022_v20  ;;  %v731_v24 = vmax.f32 %v557_v21, %v687_v22 }
  0xf3   : > { %v1058_v25 = vmax.f32 %v1042_v23, 0.0 }
  0xf4   : > { %v833_v26 = vpop.f32.mrf.mxu2  ;;  %v979_v27 = vpop.f32.mrf.mxu3 }
  0xf5   : > { %1074 = vst [vmem:[%s1672_s20 + $0x8] sm:$0xff] %v1058_v25  ;;  %v877_v28 = vmax.f32 %v731_v24, %v833_v26 }
  0xf7   : > { %v1023_v29 = vmax.f32 %v877_v28, %v979_v27 }
  0xf8   : > { %v560_v30 = vpop.f32.mrf.mxu0  ;;  %v690_v31 = vpop.f32.mrf.mxu1 }
  0xf9   : > { %v1043_v32 = vadd.f32 %v1666_v10, %v1023_v29  ;;  %v732_v33 = vmax.f32 %v560_v30, %v690_v31 }
  0xfb   : > { %v1059_v34 = vmax.f32 %v1043_v32, 0.0 }
  0xfc   : > { %v836_v35 = vpop.f32.mrf.mxu2  ;;  %v982_v36 = vpop.f32.mrf.mxu3 }
  0xfd   : > { %1075 = vst [vmem:[%s1672_s20 + $0x10] sm:$0xff] %v1059_v34  ;;  %v878_v37 = vmax.f32 %v732_v33, %v836_v35 }
  0xff   : > { %v1024_v38 = vmax.f32 %v878_v37, %v982_v36 }
 0x100   : > { %v563_v39 = vpop.f32.mrf.mxu0  ;;  %v693_v40 = vpop.f32.mrf.mxu1 }
 0x101   : > { %v1044_v41 = vadd.f32 %v1666_v10, %v1024_v38  ;;  %v733_v42 = vmax.f32 %v563_v39, %v693_v40 }
 0x103   : > { %v1060_v43 = vmax.f32 %v1044_v41, 0.0 }
 0x104   : > { %v839_v44 = vpop.f32.mrf.mxu2  ;;  %v985_v45 = vpop.f32.mrf.mxu3 }
 0x105   : > { %1076 = vst [vmem:[%s1672_s20 + $0x18] sm:$0xff] %v1060_v43  ;;  %v879_v46 = vmax.f32 %v733_v42, %v839_v44 }
 0x107   : > { %v1025_v47 = vmax.f32 %v879_v46, %v985_v45 }
 0x108   : > { %v566_v48 = vpop.f32.mrf.mxu0  ;;  %v696_v49 = vpop.f32.mrf.mxu1 }
 0x109   : > { %v1045_v50 = vadd.f32 %v1666_v10, %v1025_v47  ;;  %v734_v51 = vmax.f32 %v566_v48, %v696_v49 }
 0x10b   : > { %v1061_v52 = vmax.f32 %v1045_v50, 0.0 }
 0x10c   : > { %v842_v53 = vpop.f32.mrf.mxu2  ;;  %v988_v54 = vpop.f32.mrf.mxu3 }
 0x10d   : > { %1077 = vst [vmem:[%s1672_s20 + $0x20] sm:$0xff] %v1061_v52  ;;  %v880_v55 = vmax.f32 %v734_v51, %v842_v53 }
 0x10f   : > { %v1026_v56 = vmax.f32 %v880_v55, %v988_v54 }
 0x110   : > { %v569_v57 = vpop.f32.mrf.mxu0  ;;  %v699_v58 = vpop.f32.mrf.mxu1 }
 0x111   : > { %v1046_v59 = vadd.f32 %v1666_v10, %v1026_v56  ;;  %v735_v60 = vmax.f32 %v569_v57, %v699_v58 }
 0x113   : > { %v1062_v61 = vmax.f32 %v1046_v59, 0.0 }
 0x114   : > { %v845_v62 = vpop.f32.mrf.mxu2  ;;  %v991_v63 = vpop.f32.mrf.mxu3 }
 0x115   : > { %1078 = vst [vmem:[%s1672_s20 + $0x28] sm:$0xff] %v1062_v61  ;;  %v881_v0 = vmax.f32 %v735_v60, %v845_v62 }
 0x117   : > { %v1027_v1 = vmax.f32 %v881_v0, %v991_v63 }
 0x118   : > { %v572_v2 = vpop.f32.mrf.mxu0  ;;  %v702_v3 = vpop.f32.mrf.mxu1 }
 0x119   : > { %v1047_v4 = vadd.f32 %v1666_v10, %v1027_v1  ;;  %v736_v5 = vmax.f32 %v572_v2, %v702_v3 }
 0x11b   : > { %v1063_v6 = vmax.f32 %v1047_v4, 0.0 }
 0x11c   : > { %v848_v7 = vpop.f32.mrf.mxu2  ;;  %v994_v8 = vpop.f32.mrf.mxu3 }
 0x11d   : > { %1079 = vst [vmem:[%s1672_s20 + $0x30] sm:$0xff] %v1063_v6  ;;  %v882_v9 = vmax.f32 %v736_v5, %v848_v7 }
 0x11f   : > { %v1028_v11 = vmax.f32 %v882_v9, %v994_v8 }
 0x120   : > { %v575_v12 = vpop.f32.mrf.mxu0  ;;  %v705_v13 = vpop.f32.mrf.mxu1 }
 0x121   : > { %v1048_v14 = vadd.f32 %v1666_v10, %v1028_v11  ;;  %v737_v15 = vmax.f32 %v575_v12, %v705_v13 }
 0x123   : > { %v1064_v16 = vmax.f32 %v1048_v14, 0.0 }
 0x124   : > { %v851_v17 = vpop.f32.mrf.mxu2  ;;  %v997_v18 = vpop.f32.mrf.mxu3 }
 0x125   : > { %1080 = vst [vmem:[%s1672_s20 + $0x38] sm:$0xff] %v1064_v16  ;;  %v883_v19 = vmax.f32 %v737_v15, %v851_v17 }
 0x127   : > { %v1029_v20 = vmax.f32 %v883_v19, %v997_v18 }
 0x128   : > { %v578_v21 = vpop.f32.mrf.mxu0  ;;  %v708_v22 = vpop.f32.mrf.mxu1 }
 0x129   : > { %v1049_v23 = vadd.f32 %v1666_v10, %v1029_v20  ;;  %v738_v24 = vmax.f32 %v578_v21, %v708_v22 }
 0x12b   : > { %v1065_v25 = vmax.f32 %v1049_v23, 0.0 }
 0x12c   : > { %v854_v26 = vpop.f32.mrf.mxu2  ;;  %v1000_v27 = vpop.f32.mrf.mxu3 }
 0x12d   : > { %1081 = vst [vmem:[%s1672_s20 + $0x40] sm:$0xff] %v1065_v25  ;;  %v884_v28 = vmax.f32 %v738_v24, %v854_v26 }
 0x12f   : > { %v1030_v29 = vmax.f32 %v884_v28, %v1000_v27 }
 0x130   : > { %v581_v30 = vpop.f32.mrf.mxu0  ;;  %v711_v31 = vpop.f32.mrf.mxu1 }
 0x131   : > { %v1050_v32 = vadd.f32 %v1666_v10, %v1030_v29  ;;  %v739_v33 = vmax.f32 %v581_v30, %v711_v31 }
 0x133   : > { %v1066_v34 = vmax.f32 %v1050_v32, 0.0 }
 0x134   : > { %v857_v35 = vpop.f32.mrf.mxu2  ;;  %v1003_v36 = vpop.f32.mrf.mxu3 }
 0x135   : > { %1082 = vst [vmem:[%s1672_s20 + $0x48] sm:$0xff] %v1066_v34  ;;  %v885_v37 = vmax.f32 %v739_v33, %v857_v35 }
 0x137   : > { %v1031_v38 = vmax.f32 %v885_v37, %v1003_v36 }
 0x138   : > { %v584_v39 = vpop.f32.mrf.mxu0  ;;  %v714_v40 = vpop.f32.mrf.mxu1 }
 0x139   : > { %v1051_v41 = vadd.f32 %v1666_v10, %v1031_v38  ;;  %v740_v42 = vmax.f32 %v584_v39, %v714_v40 }
 0x13b   : > { %v1067_v43 = vmax.f32 %v1051_v41, 0.0 }
 0x13c   : > { %v860_v44 = vpop.f32.mrf.mxu2  ;;  %v1006_v45 = vpop.f32.mrf.mxu3 }
 0x13d   : > { %1083 = vst [vmem:[%s1672_s20 + $0x50] sm:$0xff] %v1067_v43  ;;  %v886_v46 = vmax.f32 %v740_v42, %v860_v44 }
 0x13f   : > { %v1032_v47 = vmax.f32 %v886_v46, %v1006_v45 }
 0x140   : > { %v587_v48 = vpop.f32.mrf.mxu0  ;;  %v717_v49 = vpop.f32.mrf.mxu1 }
 0x141   : > { %v1052_v50 = vadd.f32 %v1666_v10, %v1032_v47  ;;  %v741_v51 = vmax.f32 %v587_v48, %v717_v49 }
 0x143   : > { %v1068_v52 = vmax.f32 %v1052_v50, 0.0 }
 0x144   : > { %v863_v53 = vpop.f32.mrf.mxu2  ;;  %v1009_v54 = vpop.f32.mrf.mxu3 }
 0x145   : > { %1084 = vst [vmem:[%s1672_s20 + $0x58] sm:$0xff] %v1068_v52  ;;  %v887_v55 = vmax.f32 %v741_v51, %v863_v53 }
 0x147   : > { %v1033_v56 = vmax.f32 %v887_v55, %v1009_v54 }
 0x148   : > { %v590_v57 = vpop.f32.mrf.mxu0  ;;  %v720_v58 = vpop.f32.mrf.mxu1 }
 0x149   : > { %v1053_v59 = vadd.f32 %v1666_v10, %v1033_v56  ;;  %v742_v60 = vmax.f32 %v590_v57, %v720_v58 }
 0x14b   : > { %v1069_v61 = vmax.f32 %v1053_v59, 0.0 }
 0x14c   : > { %v866_v62 = vpop.f32.mrf.mxu2  ;;  %v1012_v63 = vpop.f32.mrf.mxu3 }
 0x14d   : > { %1085 = vst [vmem:[%s1672_s20 + $0x60] sm:$0xff] %v1069_v61  ;;  %v888_v0 = vmax.f32 %v742_v60, %v866_v62 }
 0x14f   : > { %v1034_v1 = vmax.f32 %v888_v0, %v1012_v63 }
 0x150   : > { %v593_v2 = vpop.f32.mrf.mxu0  ;;  %v723_v3 = vpop.f32.mrf.mxu1 }
 0x151   : > { %v1054_v4 = vadd.f32 %v1666_v10, %v1034_v1  ;;  %v743_v5 = vmax.f32 %v593_v2, %v723_v3 }
 0x153   : > { %v1070_v6 = vmax.f32 %v1054_v4, 0.0 }
 0x154   : > { %v869_v7 = vpop.f32.mrf.mxu2  ;;  %v1015_v8 = vpop.f32.mrf.mxu3 }
 0x155   : > { %1086 = vst [vmem:[%s1672_s20 + $0x68] sm:$0xff] %v1070_v6  ;;  %v889_v9 = vmax.f32 %v743_v5, %v869_v7 }
 0x157   : > { %v1035_v11 = vmax.f32 %v889_v9, %v1015_v8 }
 0x158   : > { %v596_v12 = vpop.f32.mrf.mxu0  ;;  %v726_v13 = vpop.f32.mrf.mxu1 }
 0x159   : > { %v1055_v14 = vadd.f32 %v1666_v10, %v1035_v11  ;;  %v744_v15 = vmax.f32 %v596_v12, %v726_v13 }
 0x15b   : > { %v1071_v16 = vmax.f32 %v1055_v14, 0.0 }
 0x15c   : > { %v872_v17 = vpop.f32.mrf.mxu2  ;;  %v1018_v18 = vpop.f32.mrf.mxu3 }
 0x15d   : > { %1087 = vst [vmem:[%s1672_s20 + $0x70] sm:$0xff] %v1071_v16  ;;  %v890_v19 = vmax.f32 %v744_v15, %v872_v17 }
 0x15f   : > { %v1036_v20 = vmax.f32 %v890_v19, %v1018_v18 }
 0x161   : > { %v1056_v21 = vadd.f32 %v1666_v10, %v1036_v20 }
 0x163   : > { %v1072_v22 = vmax.f32 %v1056_v21, 0.0 }
 0x165   : > { %1088 = vst [vmem:[%s1672_s20 + $0x78] sm:$0xff] %v1072_v22 }
 0x166 PF: > { %p10_p9 = scmp.ge.s32.totalorder %s1367_s16, 6   ;;  %s1719_s12 = smov %s1324_s13 }
 0x167   : > { %s1720_s13 = smov %s1376_s19  ;;  %s1721_s14 = smov %s1367_s16 }
 0x168   :  { %12 = sbr.rel (!%p10_p9) target bundleno = 2 (0x2), region = 108 }

// kernel: autoencoder_forward.7
= control target key start
LH: loop header
LB: loop body
LE: loop exit
PB: predicated region body
PF: predicated region fallthrough
CT: control target
= control target key end

     0   :  { %vm98_vm0 = vcmask 261120   ;;  %s2824_s1 = inlined_call_operand.vmem [shape: f32[288,128], index: 1, kind: input, shape index: {}]   ;;  %s2825_s0 = inlined_call_operand.vmem [shape: f32[4,128,288], index: 0, kind: input, shape index: {}]   ;;  %s2826_s2 = inlined_call_operand.vmem [shape: f32[1,128], index: 2, kind: input, shape index: {}]   ;;  %s2827_s3 = inlined_call_operand.vmem [shape: f32[128,128], index: 3, kind: output, shape index: {}]  }
   0x1   :  { %v1554_v0 = vld [vmem:[%s2824_s1 + $0x78] sm:$0xff]  ;;  %v1564_v2 = vld [vmem:[%s2824_s1 + $0x70] sm:$0xff]  ;;  %v1583_v5 = vld [vmem:[%s2824_s1 + $0x68] sm:$0xff] }
   0x2   :  { %v1559_v1 = vld [vmem:[%s2824_s1 + $0x118] sm:$0xff]  ;;  %147 = vmatpush.msra.mxu0 %v1554_v0  ;;  %v1576_v4 = vld [vmem:[%s2824_s1 + $0x110] sm:$0xff]  ;;  %439 = vmatpush.msra.mxu3 %v1554_v0  ;;  %v1593_v7 = vld [vmem:[%s2824_s1 + $0x108] sm:$0xff] }
   0x3   :  { %289 = vmatpush.msra.mxu2 %v1559_v1  ;;  %v1571_v3 = vld [vmem:[%s2824_s1 + $0xf8] sm:$0xff]  ;;  %v1588_v6 = vld [vmem:[%s2824_s1 + $0xf0] sm:$0xff]  ;;  %v1600_v8 = vld [vmem:[%s2824_s1 + $0xe8] sm:$0xff] }
   0x4   :  { %212 = vmatpush.msra.mxu1 %v1571_v3  ;;  %148 = vmatpush.msra.mxu0 %v1564_v2  ;;  %v1607_v9 = vld [vmem:[%s2824_s1 + $0x60] sm:$0xff]  ;;  %v52_v11 = vld [vmem:[%s2825_s0 + $0x10] sm:$0xff]  ;;  %v1624_v12 = vld [vmem:[%s2824_s1 + $0x58] sm:$0xff] }
   0x5   :  { %290 = vmatpush.msra.mxu2 %v1576_v4  ;;  %440 = vmatpush.msra.mxu3 %v1564_v2  ;;  %v1612_v10 = vld [vmem:[%s2824_s1 + $0x100] sm:$0xff]  ;;  %v1638_v14 = vld [vmem:[%s2824_s1 + $0x50] sm:$0xff]  ;;  %v1643_v15 = vld [vmem:[%s2824_s1 + $0xd8] sm:$0xff] }
   0x6   :  { %213 = vmatpush.msra.mxu1 %v1588_v6  ;;  %149 = vmatpush.msra.mxu0 %v1583_v5  ;;  %v1629_v13 = vld [vmem:[%s2824_s1 + $0xe0] sm:$0xff]  ;;  %v1651_v16 = vld [vmem:[%s2824_s1 + $0x48] sm:$0xff]  ;;  %v1656_v17 = vld [vmem:[%s2824_s1 + $0xd0] sm:$0xff] }
   0x7   :  { %291 = vmatpush.msra.mxu2 %v1593_v7  ;;  %441 = vmatpush.msra.mxu3 %v1583_v5  ;;  %v1665_v18 = vld [vmem:[%s2824_s1 + $0x40] sm:$0xff]  ;;  %v1670_v19 = vld [vmem:[%s2824_s1 + $0xc8] sm:$0xff]  ;;  %v1682_v21 = vld [vmem:[%s2824_s1 + $0x38] sm:$0xff] }
   0x8   :  { %214 = vmatpush.msra.mxu1 %v1600_v8  ;;  %150 = vmatpush.msra.mxu0 %v1607_v9  ;;  %v55_v20 = vld [vmem:[%s2825_s0 + $0x28] sm:$0xff]  ;;  %v1687_v22 = vld [vmem:[%s2824_s1 + $0xc0] sm:$0xff]  ;;  %v1697_v23 = vld [vmem:[%s2824_s1 + $0x30] sm:$0xff] }
   0x9   :  { %292 = vmatpush.msra.mxu2 %v1612_v10  ;;  %442 = vmatpush.msra.mxu3 %v1607_v9  ;;  %v1702_v24 = vld [vmem:[%s2824_s1 + $0xb8] sm:$0xff]  ;;  %v1710_v25 = vld [vmem:[%s2824_s1 + $0x28] sm:$0xff]  ;;  %v1715_v26 = vld [vmem:[%s2824_s1 + $0xb0] sm:$0xff] }
   0xa   :  { %1322 = vmatmul.msk.f32.vlgmr.msra.gmra.mxu2 %vm98_vm0, %v52_v11  ;;  %151 = vmatpush.msra.mxu0 %v1624_v12  ;;  %v1724_v27 = vld [vmem:[%s2824_s1 + $0x20] sm:$0xff]  ;;  %v1729_v28 = vld [vmem:[%s2824_s1 + $0xa8] sm:$0xff]  ;;  %v1741_v30 = vld [vmem:[%s2824_s1 + $0x18] sm:$0xff] }
   0xb   :  { %215 = vmatpush.msra.mxu1 %v1629_v13  ;;  %443 = vmatpush.msra.mxu3 %v1624_v12  ;;  %v58_v29 = vld [vmem:[%s2825_s0 + $0x40] sm:$0xff]  ;;  %v1756_v32 = vld [vmem:[%s2824_s1 + $0x10] sm:$0xff]  ;;  %v1761_v33 = vld [vmem:[%s2824_s1 + $0x98] sm:$0xff] }
   0xc   :  { %504 = vmatpush.msrb.mxu2 %v1571_v3  ;;  %152 = vmatpush.msra.mxu0 %v1638_v14  ;;  %v1746_v31 = vld [vmem:[%s2824_s1 + $0xa0] sm:$0xff]  ;;  %v1769_v34 = vld [vmem:[%s2824_s1 + $0x8] sm:$0xff]  ;;  %v1774_v35 = vld [vmem:[%s2824_s1 + $0x90] sm:$0xff] }
   0xd   :  { %216 = vmatpush.msra.mxu1 %v1643_v15  ;;  %444 = vmatpush.msra.mxu3 %v1638_v14  ;;  %v1783_v36 = vld [vmem:[%s2824_s1] sm:$0xff]  ;;  %v1788_v37 = vld [vmem:[%s2824_s1 + $0x88] sm:$0xff]  ;;  %v61_v39 = vld [vmem:[%s2825_s0 + $0x58] sm:$0xff] }
   0xe   :  { %505 = vmatpush.msrb.mxu2 %v1588_v6  ;;  %153 = vmatpush.msra.mxu0 %v1651_v16  ;;  %v50_v38 = vld [vmem:[%s2825_s0] sm:$0xff]  ;;  %v51_v42 = vld [vmem:[%s2825_s0 + $0x8] sm:$0xff]  ;;  %v53_v43 = vld [vmem:[%s2825_s0 + $0x18] sm:$0xff] }
   0xf   :  { %217 = vmatpush.msra.mxu1 %v1656_v17  ;;  %445 = vmatpush.msra.mxu3 %v1651_v16  ;;  %v1338_v40 = vld [vmem:[%s2825_s0 + $0x180] sm:$0xff]  ;;  %v64_v44 = vld [vmem:[%s2825_s0 + $0x70] sm:$0xff]  ;;  %v1341_v45 = vld [vmem:[%s2825_s0 + $0x198] sm:$0xff] }
  0x10   :  { %506 = vmatpush.msrb.mxu2 %v1600_v8  ;;  %154 = vmatpush.msra.mxu0 %v1665_v18  ;;  %v1809_v41 = vld [vmem:[%s2824_s1 + $0x80] sm:$0xff]  ;;  %v56_v47 = vld [vmem:[%s2825_s0 + $0x30] sm:$0xff]  ;;  %v67_v48 = vld [vmem:[%s2825_s0 + $0x88] sm:$0xff] }
  0x11   :  { %218 = vmatpush.msra.mxu1 %v1670_v19  ;;  %446 = vmatpush.msra.mxu3 %v1665_v18  ;;  %v54_v46 = vld [vmem:[%s2825_s0 + $0x20] sm:$0xff]  ;;  %v1344_v49 = vld [vmem:[%s2825_s0 + $0x1b0] sm:$0xff]  ;;  %v57_v50 = vld [vmem:[%s2825_s0 + $0x38] sm:$0xff] }
  0x12   :  { %1323 = vmatmul.msk.f32.gmra.mxu2 %vm98_vm0, %v55_v20  ;;  %155 = vmatpush.msra.mxu0 %v1682_v21  ;;  %v59_v51 = vld [vmem:[%s2825_s0 + $0x48] sm:$0xff]  ;;  %v70_v52 = vld [vmem:[%s2825_s0 + $0xa0] sm:$0xff]  ;;  %v60_v54 = vld [vmem:[%s2825_s0 + $0x50] sm:$0xff] }
  0x13   :  { %219 = vmatpush.msra.mxu1 %v1687_v22  ;;  %447 = vmatpush.msra.mxu3 %v1682_v21  ;;  %v1347_v53 = vld [vmem:[%s2825_s0 + $0x1c8] sm:$0xff]  ;;  %v62_v55 = vld [vmem:[%s2825_s0 + $0x60] sm:$0xff]  ;;  %v73_v56 = vld [vmem:[%s2825_s0 + $0xb8] sm:$0xff] }
  0x14   :  { %507 = vmatpush.msrb.mxu2 %v1629_v13  ;;  %156 = vmatpush.msra.mxu0 %v1697_v23  ;;  %v1350_v57 = vld [vmem:[%s2825_s0 + $0x1e0] sm:$0xff]  ;;  %v63_v58 = vld [vmem:[%s2825_s0 + $0x68] sm:$0xff]  ;;  %v65_v59 = vld [vmem:[%s2825_s0 + $0x78] sm:$0xff] }
  0x15   :  { %220 = vmatpush.msra.mxu1 %v1702_v24  ;;  %448 = vmatpush.msra.mxu3 %v1697_v23  ;;  %v76_v60 = vld [vmem:[%s2825_s0 + $0xd0] sm:$0xff]  ;;  %v1353_v61 = vld [vmem:[%s2825_s0 + $0x1f8] sm:$0xff]  ;;  %v66_v62 = vld [vmem:[%s2825_s0 + $0x80] sm:$0xff] }
  0x16   :  { %508 = vmatpush.msrb.mxu2 %v1643_v15  ;;  %157 = vmatpush.msra.mxu0 %v1710_v25  ;;  %v68_v63 = vld [vmem:[%s2825_s0 + $0x90] sm:$0xff]  ;;  %v77_v11 = vld [vmem:[%s2825_s0 + $0xd8] sm:$0xff]  ;;  %v94_v20 = vld [vmem:[%s2825_s0 + $0x160] sm:$0xff] }
  0x17   :  { %221 = vmatpush.msra.mxu1 %v1715_v26  ;;  %449 = vmatpush.msra.mxu3 %v1710_v25 }
  0x18   :  { %509 = vmatpush.msrb.mxu2 %v1656_v17  ;;  %158 = vmatpush.msra.mxu0 %v1724_v27 }
  0x19   :  { %222 = vmatpush.msra.mxu1 %v1729_v28  ;;  %450 = vmatpush.msra.mxu3 %v1724_v27 }
  0x1a   :  { %1324 = vmatmul.msk.f32.gmra.mxu2 %vm98_vm0, %v58_v29  ;;  %159 = vmatpush.msra.mxu0 %v1741_v30  ;;  %v1339_v29 = vld [vmem:[%s2825_s0 + $0x188] sm:$0xff] }
  0x1b   :  { %223 = vmatpush.msra.mxu1 %v1746_v31  ;;  %451 = vmatpush.msra.mxu3 %v1741_v30 }
  0x1c   :  { %510 = vmatpush.msrb.mxu2 %v1670_v19  ;;  %160 = vmatpush.msra.mxu0 %v1756_v32 }
  0x1d   :  { %224 = vmatpush.msra.mxu1 %v1761_v33  ;;  %452 = vmatpush.msra.mxu3 %v1756_v32 }
  0x1e   :  { %511 = vmatpush.msrb.mxu2 %v1687_v22  ;;  %161 = vmatpush.msra.mxu0 %v1769_v34 }
  0x1f   :  { %225 = vmatpush.msra.mxu1 %v1774_v35  ;;  %453 = vmatpush.msra.mxu3 %v1769_v34 }
  0x20   :  { %512 = vmatpush.msrb.mxu2 %v1702_v24  ;;  %162 = vmatpush.msra.mxu0 %v1783_v36 }
  0x21   :  { %226 = vmatpush.msra.mxu1 %v1788_v37  ;;  %454 = vmatpush.msra.mxu3 %v1783_v36 }
  0x22   :  { %163 = vmatmul.f32.vlgmr.msra.gmra.mxu0 %v50_v38  ;;  %1325 = vmatmul.msk.f32.gmra.mxu2 %vm98_vm0, %v61_v39  ;;  %v1383_v38 = vld [vmem:[%s2825_s0 + $0x2e8] sm:$0xff]  ;;  %v1345_v39 = vld [vmem:[%s2825_s0 + $0x1b8] sm:$0xff] }
  0x23   :  { %455 = vmatmul.f32.vlgmr.msra.gmra.mxu3 %v1338_v40  ;;  %227 = vmatpush.msra.mxu1 %v1809_v41  ;;  %v96_v40 = vld [vmem:[%s2825_s0 + $0x170] sm:$0xff] }
  0x24   :  { %812 = vmatpush.msrb.mxu3 %v1571_v3  ;;  %228 = vmatmul.f32.vlgmr.msra.gmra.mxu1 %v51_v42 }
  0x25   :  { %581 = vmatpush.msrb.mxu0 %v1559_v1  ;;  %747 = vmatpush.msrb.mxu1 %v1554_v0 }
  0x26   :  { %813 = vmatpush.msrb.mxu3 %v1588_v6  ;;  %513 = vmatpush.msrb.mxu2 %v1715_v26 }
  0x27   :  { %582 = vmatpush.msrb.mxu0 %v1576_v4  ;;  %748 = vmatpush.msrb.mxu1 %v1564_v2 }
  0x28   :  { %814 = vmatpush.msrb.mxu3 %v1600_v8  ;;  %514 = vmatpush.msrb.mxu2 %v1729_v28 }
  0x29   :  { %583 = vmatpush.msrb.mxu0 %v1593_v7  ;;  %749 = vmatpush.msrb.mxu1 %v1583_v5 }
  0x2a   :  { %166 = vmatmul.f32.gmra.mxu0 %v53_v43  ;;  %1326 = vmatmul.msk.f32.gmra.mxu2 %vm98_vm0, %v64_v44  ;;  %v1340_v43 = vld [vmem:[%s2825_s0 + $0x190] sm:$0xff] }
  0x2b   :  { %458 = vmatmul.f32.gmra.mxu3 %v1341_v45  ;;  %750 = vmatpush.msrb.mxu1 %v1607_v9  ;;  %v1348_v44 = vld [vmem:[%s2825_s0 + $0x1d0] sm:$0xff]  ;;  %v1403_v45 = vld [vmem:[%s2825_s0 + $0x308] sm:$0xff] }
  0x2c   :  { %815 = vmatpush.msrb.mxu3 %v1629_v13  ;;  %231 = vmatmul.f32.gmra.mxu1 %v54_v46 }
  0x2d   :  { %515 = vmatpush.msrb.mxu2 %v1746_v31  ;;  %751 = vmatpush.msrb.mxu1 %v1624_v12 }
  0x2e   :  { %816 = vmatpush.msrb.mxu3 %v1643_v15  ;;  %584 = vmatpush.msrb.mxu0 %v1612_v10 }
  0x2f   :  { %516 = vmatpush.msrb.mxu2 %v1761_v33  ;;  %752 = vmatpush.msrb.mxu1 %v1638_v14 }
  0x30   :  { %817 = vmatpush.msrb.mxu3 %v1656_v17  ;;  %1055 = vmatpush.msra.mxu0 %v1554_v0  ;;  %v79_v0 = vld [vmem:[%s2825_s0 + $0xe8] sm:$0xff] }
  0x31   :  { %517 = vmatpush.msrb.mxu2 %v1774_v35  ;;  %753 = vmatpush.msrb.mxu1 %v1651_v16 }
  0x32   :  { %169 = vmatmul.f32.gmra.mxu0 %v56_v47  ;;  %818 = vmatpush.msrb.mxu3 %v1670_v19  ;;  %v1402_v47 = vld [vmem:[%s2825_s0 + $0x300] sm:$0xff] }
  0x33   :  { %1327 = vmatmul.msk.f32.gmra.mxu2 %vm98_vm0, %v67_v48  ;;  %461 = vmatmul.f32.gmra.mxu3 %v1344_v49 }
  0x34   :  { %819 = vmatpush.msrb.mxu3 %v1687_v22  ;;  %234 = vmatmul.f32.gmra.mxu1 %v57_v50 }
  0x35   :  { %518 = vmatpush.msrb.mxu2 %v1788_v37  ;;  %754 = vmatpush.msrb.mxu1 %v1665_v18 }
  0x36   :  { %820 = vmatpush.msrb.mxu3 %v1702_v24  ;;  %1056 = vmatpush.msra.mxu0 %v1564_v2  ;;  %v69_v2 = vld [vmem:[%s2825_s0 + $0x98] sm:$0xff] }
  0x37   :  { %519 = vmatpush.msrb.mxu2 %v1809_v41  ;;  %755 = vmatpush.msrb.mxu1 %v1682_v21 }
  0x38   :  { %821 = vmatpush.msrb.mxu3 %v1715_v26  ;;  %1057 = vmatpush.msra.mxu0 %v1583_v5  ;;  %v1359_v5 = vld [vmem:[%s2825_s0 + $0x228] sm:$0xff] }
  0x39   :  { %889 = vmatpush.msra.mxu2 %v1559_v1  ;;  %756 = vmatpush.msrb.mxu1 %v1697_v23 }
  0x3a   :  { %172 = vmatmul.f32.gmra.mxu0 %v59_v51  ;;  %822 = vmatpush.msrb.mxu3 %v1729_v28 }
  0x3b   :  { %1328 = vmatmul.msk.f32.gmra.mxu2 %vm98_vm0, %v70_v52  ;;  %464 = vmatmul.f32.gmra.mxu3 %v1347_v53  ;;  %v1343_v53 = vld [vmem:[%s2825_s0 + $0x1a8] sm:$0xff] }
  0x3c   :  { %757 = vmatpush.msrb.mxu1 %v1710_v25  ;;  %1058 = vmatpush.msra.mxu0 %v1607_v9  ;;  %v1362_v9 = vld [vmem:[%s2825_s0 + $0x240] sm:$0xff] }
  0x3d   :  { %237 = vmatmul.f32.gmra.mxu1 %v60_v54  ;;  %823 = vmatpush.msrb.mxu3 %v1746_v31  ;;  %v1351_v54 = vld [vmem:[%s2825_s0 + $0x1e8] sm:$0xff] }
  0x3e   :  { %758 = vmatpush.msrb.mxu1 %v1724_v27  ;;  %890 = vmatpush.msra.mxu2 %v1576_v4 }
  0x3f   :  { %1059 = vmatpush.msra.mxu0 %v1624_v12  ;;  %824 = vmatpush.msrb.mxu3 %v1761_v33  ;;  %v88_v12 = vld [vmem:[%s2825_s0 + $0x130] sm:$0xff] }
  0x40   :  { %759 = vmatpush.msrb.mxu1 %v1741_v30  ;;  %891 = vmatpush.msra.mxu2 %v1593_v7 }
  0x41   :  { %1060 = vmatpush.msra.mxu0 %v1638_v14  ;;  %825 = vmatpush.msrb.mxu3 %v1774_v35  ;;  %v78_v14 = vld [vmem:[%s2825_s0 + $0xe0] sm:$0xff] }
  0x42   :  { %175 = vmatmul.f32.gmra.mxu0 %v62_v55  ;;  %760 = vmatpush.msrb.mxu1 %v1756_v32  ;;  %v1406_v55 = vld [vmem:[%s2825_s0 + $0x320] sm:$0xff] }
  0x43   :  { %1329 = vmatmul.msk.f32.gmra.mxu2 %vm98_vm0, %v73_v56  ;;  %467 = vmatmul.f32.gmra.mxu3 %v1350_v57  ;;  %v1405_v57 = vld [vmem:[%s2825_s0 + $0x318] sm:$0xff] }
  0x44   :  { %826 = vmatpush.msrb.mxu3 %v1788_v37  ;;  %1061 = vmatpush.msra.mxu0 %v1651_v16  ;;  %v91_v16 = vld [vmem:[%s2825_s0 + $0x148] sm:$0xff] }
  0x45   :  { %240 = vmatmul.f32.gmra.mxu1 %v63_v58  ;;  %892 = vmatpush.msra.mxu2 %v1612_v10 }
  0x46   :  { %761 = vmatpush.msrb.mxu1 %v1769_v34  ;;  %827 = vmatpush.msrb.mxu3 %v1809_v41 }
  0x47   :  { %1062 = vmatpush.msra.mxu0 %v1665_v18  ;;  %v81_v18 = vld [vmem:[%s2825_s0 + $0xf8] sm:$0xff] }
  0x48   :  { %1197 = vmatpush.msra.mxu3 %v1559_v1  ;;  %762 = vmatpush.msrb.mxu1 %v1783_v36  ;;  %v1356_v1 = vld [vmem:[%s2825_s0 + $0x210] sm:$0xff] }
  0x49   :  { %1063 = vmatpush.msra.mxu0 %v1682_v21  ;;  %v1371_v21 = vld [vmem:[%s2825_s0 + $0x288] sm:$0xff] }
  0x4a   :  { %1120 = vmatpush.msra.mxu1 %v1571_v3  ;;  %1198 = vmatpush.msra.mxu3 %v1576_v4  ;;  %v71_v3 = vld [vmem:[%s2825_s0 + $0xa8] sm:$0xff]  ;;  %v82_v4 = vld [vmem:[%s2825_s0 + $0x100] sm:$0xff] }
  0x4b   :  { %178 = vmatmul.f32.gmra.mxu0 %v65_v59  ;;  %1330 = vmatmul.msk.f32.gmra.mxu2 %vm98_vm0, %v76_v60 }
  0x4c   :  { %470 = vmatmul.f32.gmra.mxu3 %v1353_v61  ;;  %1121 = vmatpush.msra.mxu1 %v1588_v6  ;;  %v72_v6 = vld [vmem:[%s2825_s0 + $0xb0] sm:$0xff] }
  0x4d   :  { %1199 = vmatpush.msra.mxu3 %v1593_v7  ;;  %243 = vmatmul.f32.gmra.mxu1 %v66_v62  ;;  %v74_v7 = vld [vmem:[%s2825_s0 + $0xc0] sm:$0xff] }
  0x4e   :  { %1122 = vmatpush.msra.mxu1 %v1600_v8  ;;  %1064 = vmatpush.msra.mxu0 %v1697_v23  ;;  %v85_v8 = vld [vmem:[%s2825_s0 + $0x118] sm:$0xff]  ;;  %v86_v23 = vld [vmem:[%s2825_s0 + $0x120] sm:$0xff] }
  0x4f   :  { %1200 = vmatpush.msra.mxu3 %v1612_v10  ;;  %v75_v10 = vld [vmem:[%s2825_s0 + $0xc8] sm:$0xff] }
  0x50   :  { %1123 = vmatpush.msra.mxu1 %v1629_v13  ;;  %1065 = vmatpush.msra.mxu0 %v1710_v25  ;;  %v1365_v13 = vld [vmem:[%s2825_s0 + $0x258] sm:$0xff]  ;;  %v1374_v25 = vld [vmem:[%s2825_s0 + $0x2a0] sm:$0xff] }
  0x52   :  { %1124 = vmatpush.msra.mxu1 %v1643_v15  ;;  %1066 = vmatpush.msra.mxu0 %v1724_v27  ;;  %v80_v15 = vld [vmem:[%s2825_s0 + $0xf0] sm:$0xff]  ;;  %v89_v27 = vld [vmem:[%s2825_s0 + $0x138] sm:$0xff] }
  0x53   :  { %181 = vmatmul.f32.gmra.mxu0 %v68_v63  ;;  %1331 = vmatmul.msk.f32.gmra.mxu2 %vm98_vm0, %v79_v0  ;;  %v1346_v63 = vld [vmem:[%s2825_s0 + $0x1c0] sm:$0xff] }
  0x54   :  { %473 = vmatmul.f32.gmra.mxu3 %v1356_v1  ;;  %1125 = vmatpush.msra.mxu1 %v1656_v17  ;;  %v1368_v17 = vld [vmem:[%s2825_s0 + $0x270] sm:$0xff]  ;;  %v1354_v0 = vld [vmem:[%s2825_s0 + $0x200] sm:$0xff]  ;;  %v1409_v1 = vld [vmem:[%s2825_s0 + $0x338] sm:$0xff] }
  0x55   :  { %246 = vmatmul.f32.gmra.mxu1 %v69_v2  ;;  %1067 = vmatpush.msra.mxu0 %v1741_v30  ;;  %v90_v30 = vld [vmem:[%s2825_s0 + $0x140] sm:$0xff] }
  0x56   :  { %1126 = vmatpush.msra.mxu1 %v1670_v19  ;;  %v83_v19 = vld [vmem:[%s2825_s0 + $0x108] sm:$0xff] }
  0x57   :  { %1068 = vmatpush.msra.mxu0 %v1756_v32  ;;  %v92_v32 = vld [vmem:[%s2825_s0 + $0x150] sm:$0xff] }
  0x58   :  { %1127 = vmatpush.msra.mxu1 %v1687_v22  ;;  %v84_v22 = vld [vmem:[%s2825_s0 + $0x110] sm:$0xff] }
  0x59   :  { %1069 = vmatpush.msra.mxu0 %v1769_v34  ;;  %v1342_v34 = vld [vmem:[%s2825_s0 + $0x1a0] sm:$0xff] }
  0x5a   :  { %1128 = vmatpush.msra.mxu1 %v1702_v24  ;;  %v97_v24 = vld [vmem:[%s2825_s0 + $0x178] sm:$0xff] }
  0x5b   :  { %184 = vmatmul.f32.gmra.mxu0 %v71_v3  ;;  %1332 = vmatmul.msk.f32.gmra.mxu2 %vm98_vm0, %v82_v4  ;;  %v1408_v3 = vld [vmem:[%s2825_s0 + $0x330] sm:$0xff] }
  0x5c   :  { %476 = vmatmul.f32.gmra.mxu3 %v1359_v5  ;;  %1129 = vmatpush.msra.mxu1 %v1715_v26  ;;  %v87_v26 = vld [vmem:[%s2825_s0 + $0x128] sm:$0xff] }
  0x5d   :  { %249 = vmatmul.f32.gmra.mxu1 %v72_v6  ;;  %1070 = vmatpush.msra.mxu0 %v1783_v36 }
  0x5e   :  { %1130 = vmatpush.msra.mxu1 %v1729_v28  ;;  %v1377_v28 = vld [vmem:[%s2825_s0 + $0x2b8] sm:$0xff] }
  0x60   :  { %1131 = vmatpush.msra.mxu1 %v1746_v31 }
  0x62   :  { %1132 = vmatpush.msra.mxu1 %v1761_v33  ;;  %v1380_v33 = vld [vmem:[%s2825_s0 + $0x2d0] sm:$0xff] }
  0x63   :  { %187 = vmatmul.f32.gmra.mxu0 %v74_v7  ;;  %1333 = vmatmul.msk.f32.gmra.mxu2 %vm98_vm0, %v85_v8 }
  0x64   :  { %479 = vmatmul.f32.gmra.mxu3 %v1362_v9  ;;  %1133 = vmatpush.msra.mxu1 %v1774_v35  ;;  %v93_v35 = vld [vmem:[%s2825_s0 + $0x158] sm:$0xff] }
  0x65   :  { %252 = vmatmul.f32.gmra.mxu1 %v75_v10  ;;  %v1349_v9 = vld [vmem:[%s2825_s0 + $0x1d8] sm:$0xff] }
  0x66   :  { %1134 = vmatpush.msra.mxu1 %v1788_v37  ;;  %v95_v37 = vld [vmem:[%s2825_s0 + $0x168] sm:$0xff]  ;;  %v1357_v10 = vld [vmem:[%s2825_s0 + $0x218] sm:$0xff] }
  0x68   :  { %1135 = vmatpush.msra.mxu1 %v1809_v41 }
  0x6b   :  { %190 = vmatmul.f32.gmra.mxu0 %v77_v11  ;;  %1334 = vmatmul.msk.f32.gmra.mxu2 %vm98_vm0, %v88_v12  ;;  %v1412_v11 = vld [vmem:[%s2825_s0 + $0x350] sm:$0xff] }
  0x6c   :  { %482 = vmatmul.f32.gmra.mxu3 %v1365_v13  ;;  %v1411_v13 = vld [vmem:[%s2825_s0 + $0x348] sm:$0xff] }
  0x6d   :  { %255 = vmatmul.f32.gmra.mxu1 %v78_v14 }
  0x73   :  { %193 = vmatmul.f32.gmra.mxu0 %v80_v15  ;;  %1335 = vmatmul.msk.f32.gmra.mxu2 %vm98_vm0, %v91_v16 }
  0x74   :  { %485 = vmatmul.f32.gmra.mxu3 %v1368_v17 }
  0x75   :  { %258 = vmatmul.f32.gmra.mxu1 %v81_v18 }
  0x7b   :  { %196 = vmatmul.f32.gmra.mxu0 %v83_v19  ;;  %1336 = vmatmul.msk.f32.gmra.mxu2 %vm98_vm0, %v94_v20  ;;  %v1352_v19 = vld [vmem:[%s2825_s0 + $0x1f0] sm:$0xff] }
  0x7c   :  { %488 = vmatmul.f32.gmra.mxu3 %v1371_v21  ;;  %v1360_v20 = vld [vmem:[%s2825_s0 + $0x230] sm:$0xff]  ;;  %v1415_v21 = vld [vmem:[%s2825_s0 + $0x368] sm:$0xff] }
  0x7d   :  { %261 = vmatmul.f32.gmra.mxu1 %v84_v22 }
  0x83   :  { %199 = vmatmul.f32.gmra.mxu0 %v86_v23  ;;  %1337 = vmatmul.msk.f32.gmra.mxu2 %vm98_vm0, %v97_v24  ;;  %v1414_v23 = vld [vmem:[%s2825_s0 + $0x360] sm:$0xff] }
  0x84   :  { %491 = vmatmul.f32.gmra.mxu3 %v1374_v25 }
  0x85   :  { %264 = vmatmul.f32.gmra.mxu1 %v87_v26 }
  0x8b   :  { %202 = vmatmul.f32.gmra.mxu0 %v89_v27  ;;  %520 = vmatmul.f32.vlgmr.msrb.gmra.mxu2 %v1339_v29  ;;  %v1355_v29 = vld [vmem:[%s2825_s0 + $0x208] sm:$0xff] }
  0x8c   :  { %494 = vmatmul.f32.gmra.mxu3 %v1377_v28 }
  0x8d   :  { %267 = vmatmul.f32.gmra.mxu1 %v90_v30  ;;  %v294_v31 = vpop.f32.mrf.mxu2  ;;  %v1363_v30 = vld [vmem:[%s2825_s0 + $0x248] sm:$0xff] }
  0x93   :  { %205 = vmatmul.f32.gmra.mxu0 %v92_v32  ;;  %523 = vmatmul.f32.gmra.mxu2 %v1342_v34 }
  0x94   :  { %497 = vmatmul.f32.gmra.mxu3 %v1380_v33  ;;  %v1417_v33 = vld [vmem:[%s2825_s0 + $0x378] sm:$0xff] }
  0x95   :  { %270 = vmatmul.f32.gmra.mxu1 %v93_v35  ;;  %v297_v36 = vpop.f32.mrf.mxu2 }
  0x9b   :  { %208 = vmatmul.f32.gmra.mxu0 %v95_v37  ;;  %526 = vmatmul.f32.gmra.mxu2 %v1345_v39  ;;  %v1358_v39 = vld [vmem:[%s2825_s0 + $0x220] sm:$0xff] }
  0x9c   :  { %500 = vmatmul.f32.gmra.mxu3 %v1383_v38 }
  0x9d   :  { %273 = vmatmul.f32.gmra.mxu1 %v96_v40  ;;  %v300_v41 = vpop.f32.mrf.mxu2  ;;  %v1366_v40 = vld [vmem:[%s2825_s0 + $0x260] sm:$0xff] }
  0x9f   :  { %v164_v42 = vpop.f32.mrf.mxu0 }
  0xa1   :  { %v229_v46 = vpop.f32.mrf.mxu1 }
  0xa2   :  { %v230_v48 = vadd.f32 %v229_v46, %v164_v42 }
  0xa3   :  { %1386 = vmatmul.msk.f32.vlgmr.msrb.gmra.mxu0 %vm98_vm0, %v1340_v43  ;;  %529 = vmatmul.f32.gmra.mxu2 %v1348_v44  ;;  %v1420_v43 = vld [vmem:[%s2825_s0 + $0x390] sm:$0xff] }
  0xa4   :  { %828 = vmatmul.f32.vlgmr.msrb.gmra.mxu3 %v1403_v45  ;;  %v2105_v49 = vadd.f32 %v294_v31, %v230_v48  ;;  %v1418_v31 = vld [vmem:[%s2825_s0 + $0x380] sm:$0xff] }
  0xa5   :  { %763 = vmatmul.f32.vlgmr.msrb.gmra.mxu1 %v1402_v47  ;;  %v303_v50 = vpop.f32.mrf.mxu2 }
  0xa6   :  { %v2107_v51 = vpop.f32.mrf.mxu3 }
  0xa7   :  { %v167_v52 = vpop.f32.mrf.mxu0 }
  0xa9   :  { %v232_v56 = vpop.f32.mrf.mxu1 }
  0xaa   :  { %v233_v58 = vadd.f32 %v232_v56, %v167_v52  ;;  %v1369_v52 = vld [vmem:[%s2825_s0 + $0x278] sm:$0xff] }
  0xab   :  { %1387 = vmatmul.msk.f32.gmra.mxu0 %vm98_vm0, %v1343_v53  ;;  %532 = vmatmul.f32.gmra.mxu2 %v1351_v54  ;;  %v1424_v53 = vld [vmem:[%s2825_s0 + $0x3b0] sm:$0xff] }
  0xac   :  { %831 = vmatmul.f32.gmra.mxu3 %v1406_v55  ;;  %v2122_v59 = vadd.f32 %v297_v36, %v233_v58  ;;  %v1423_v55 = vld [vmem:[%s2825_s0 + $0x3a8] sm:$0xff] }
  0xad   :  { %766 = vmatmul.f32.gmra.mxu1 %v1405_v57  ;;  %v306_v60 = vpop.f32.mrf.mxu2 }
  0xae   :  { %v2124_v61 = vpop.f32.mrf.mxu3 }
  0xaf   :  { %v170_v62 = vpop.f32.mrf.mxu0 }
  0xb1   :  { %v235_v2 = vpop.f32.mrf.mxu1 }
  0xb2   :  { %v236_v4 = vadd.f32 %v235_v2, %v170_v62 }
  0xb3   :  { %1388 = vmatmul.msk.f32.gmra.mxu0 %vm98_vm0, %v1346_v63  ;;  %535 = vmatmul.f32.gmra.mxu2 %v1354_v0  ;;  %v1364_v63 = vld [vmem:[%s2825_s0 + $0x250] sm:$0xff] }
  0xb4   :  { %834 = vmatmul.f32.gmra.mxu3 %v1409_v1  ;;  %v2139_v5 = vadd.f32 %v300_v41, %v236_v4  ;;  %v1421_v41 = vld [vmem:[%s2825_s0 + $0x398] sm:$0xff]  ;;  %v1372_v0 = vld [vmem:[%s2825_s0 + $0x290] sm:$0xff]  ;;  %v1427_v1 = vld [vmem:[%s2825_s0 + $0x3c8] sm:$0xff] }
  0xb5   :  { %769 = vmatmul.f32.gmra.mxu1 %v1408_v3  ;;  %v1426_v3 = vld [vmem:[%s2825_s0 + $0x3c0] sm:$0xff] }
  0xb6   :  { %v309_v6 = vpop.f32.mrf.mxu2  ;;  %v2141_v7 = vpop.f32.mrf.mxu3 }
  0xb7   :  { %v173_v8 = vpop.f32.mrf.mxu0 }
  0xba   :  { %v238_v12 = vpop.f32.mrf.mxu1 }
  0xbb   :  { %1389 = vmatmul.msk.f32.gmra.mxu0 %vm98_vm0, %v1349_v9  ;;  %v239_v14 = vadd.f32 %v238_v12, %v173_v8  ;;  %538 = vmatmul.f32.gmra.mxu2 %v1357_v10  ;;  %v1375_v12 = vld [vmem:[%s2825_s0 + $0x2a8] sm:$0xff] }
  0xbc   :  { %837 = vmatmul.f32.gmra.mxu3 %v1412_v11  ;;  %v1367_v11 = vld [vmem:[%s2825_s0 + $0x268] sm:$0xff] }
  0xbd   :  { %v2156_v15 = vadd.f32 %v303_v50, %v239_v14  ;;  %772 = vmatmul.f32.gmra.mxu1 %v1411_v13  ;;  %v1361_v50 = vld [vmem:[%s2825_s0 + $0x238] sm:$0xff]  ;;  %v1430_v13 = vld [vmem:[%s2825_s0 + $0x3e0] sm:$0xff] }
  0xbe   :  { %v312_v16 = vpop.f32.mrf.mxu2  ;;  %v2158_v17 = vpop.f32.mrf.mxu3 }
  0xbf   :  { %v176_v18 = vpop.f32.mrf.mxu0 }
  0xc2   :  { %v241_v22 = vpop.f32.mrf.mxu1 }
  0xc3   :  { %1390 = vmatmul.msk.f32.gmra.mxu0 %vm98_vm0, %v1352_v19  ;;  %v242_v24 = vadd.f32 %v241_v22, %v176_v18  ;;  %541 = vmatmul.f32.gmra.mxu2 %v1360_v20 }
  0xc4   :  { %840 = vmatmul.f32.gmra.mxu3 %v1415_v21 }
  0xc5   :  { %v2173_v25 = vadd.f32 %v306_v60, %v242_v24  ;;  %775 = vmatmul.f32.gmra.mxu1 %v1414_v23  ;;  %v1370_v23 = vld [vmem:[%s2825_s0 + $0x280] sm:$0xff] }
  0xc6   :  { %v315_v26 = vpop.f32.mrf.mxu2  ;;  %v2175_v27 = vpop.f32.mrf.mxu3  ;;  %v1378_v24 = vld [vmem:[%s2825_s0 + $0x2c0] sm:$0xff] }
  0xc8   :  { %v179_v28 = vpop.f32.mrf.mxu0 }
  0xca   :  { %v244_v32 = vpop.f32.mrf.mxu1 }
  0xcb   :  { %1391 = vmatmul.msk.f32.gmra.mxu0 %vm98_vm0, %v1355_v29  ;;  %v245_v34 = vadd.f32 %v244_v32, %v179_v28  ;;  %544 = vmatmul.f32.gmra.mxu2 %v1363_v30  ;;  %v1432_v29 = vld [vmem:[%s2825_s0 + $0x3f0] sm:$0xff] }
  0xcc   :  { %843 = vmatmul.f32.gmra.mxu3 %v1418_v31 }
  0xcd   :  { %v2190_v35 = vadd.f32 %v309_v6, %v245_v34  ;;  %778 = vmatmul.f32.gmra.mxu1 %v1417_v33 }
  0xce   :  { %v318_v36 = vpop.f32.mrf.mxu2 }
  0xcf   :  { %v2192_v37 = vpop.f32.mrf.mxu3 }
  0xd0   :  { %v182_v38 = vpop.f32.mrf.mxu0 }
  0xd2   :  { %v247_v42 = vpop.f32.mrf.mxu1 }
  0xd3   :  { %1392 = vmatmul.msk.f32.gmra.mxu0 %vm98_vm0, %v1358_v39  ;;  %v248_v44 = vadd.f32 %v247_v42, %v182_v38  ;;  %547 = vmatmul.f32.gmra.mxu2 %v1366_v40  ;;  %v1381_v38 = vld [vmem:[%s2825_s0 + $0x2d8] sm:$0xff]  ;;  %v1436_v39 = vld [vmem:[%s2825_s0 + $0x410] sm:$0xff] }
  0xd4   :  { %846 = vmatmul.f32.gmra.mxu3 %v1421_v41  ;;  %v1435_v41 = vld [vmem:[%s2825_s0 + $0x408] sm:$0xff] }
  0xd5   :  { %v2207_v45 = vadd.f32 %v312_v16, %v248_v44  ;;  %781 = vmatmul.f32.gmra.mxu1 %v1420_v43  ;;  %v1429_v16 = vld [vmem:[%s2825_s0 + $0x3d8] sm:$0xff] }
  0xd6   :  { %v321_v46 = vpop.f32.mrf.mxu2 }
  0xd7   :  { %v2209_v47 = vpop.f32.mrf.mxu3 }
  0xd8   :  { %v185_v48 = vpop.f32.mrf.mxu0 }
  0xda   :  { %v250_v54 = vpop.f32.mrf.mxu1 }
  0xdb   :  { %1393 = vmatmul.msk.f32.gmra.mxu0 %vm98_vm0, %v1361_v50  ;;  %v251_v56 = vadd.f32 %v250_v54, %v185_v48  ;;  %550 = vmatmul.f32.gmra.mxu2 %v1369_v52  ;;  %v1376_v50 = vld [vmem:[%s2825_s0 + $0x2b0] sm:$0xff] }
  0xdc   :  { %849 = vmatmul.f32.gmra.mxu3 %v1424_v53  ;;  %v1384_v52 = vld [vmem:[%s2825_s0 + $0x2f0] sm:$0xff]  ;;  %v1439_v53 = vld [vmem:[%s2825_s0 + $0x428] sm:$0xff] }
  0xdd   :  { %v2224_v57 = vadd.f32 %v315_v26, %v251_v56  ;;  %784 = vmatmul.f32.gmra.mxu1 %v1423_v55  ;;  %v1433_v26 = vld [vmem:[%s2825_s0 + $0x3f8] sm:$0xff]  ;;  %v1438_v55 = vld [vmem:[%s2825_s0 + $0x420] sm:$0xff] }
  0xde   :  { %v324_v58 = vpop.f32.mrf.mxu2 }
  0xdf   :  { %v2226_v60 = vpop.f32.mrf.mxu3 }
  0xe0   :  { %v188_v62 = vpop.f32.mrf.mxu0 }
  0xe2   :  { %v253_v2 = vpop.f32.mrf.mxu1 }
  0xe3   :  { %1394 = vmatmul.msk.f32.gmra.mxu0 %vm98_vm0, %v1364_v63  ;;  %v254_v4 = vadd.f32 %v253_v2, %v188_v62  ;;  %553 = vmatmul.f32.gmra.mxu2 %v1372_v0  ;;  %v1442_v2 = vld [vmem:[%s2825_s0 + $0x440] sm:$0xff] }
  0xe4   :  { %852 = vmatmul.f32.gmra.mxu3 %v1427_v1  ;;  %v1379_v1 = vld [vmem:[%s2825_s0 + $0x2c8] sm:$0xff] }
  0xe5   :  { %v2241_v6 = vadd.f32 %v318_v36, %v254_v4  ;;  %787 = vmatmul.f32.gmra.mxu1 %v1426_v3  ;;  %v1373_v36 = vld [vmem:[%s2825_s0 + $0x298] sm:$0xff]  ;;  %v1404_v3 = vld [vmem:[%s2825_s0 + $0x310] sm:$0xff] }
  0xe6   :  { %v327_v8 = vpop.f32.mrf.mxu2 }
  0xe7   :  { %v2243_v9 = vpop.f32.mrf.mxu3 }
  0xe8   :  { %v191_v10 = vpop.f32.mrf.mxu0 }
  0xea   :  { %v256_v14 = vpop.f32.mrf.mxu1 }
  0xeb   :  { %1395 = vmatmul.msk.f32.gmra.mxu0 %vm98_vm0, %v1367_v11  ;;  %v257_v18 = vadd.f32 %v256_v14, %v191_v10  ;;  %556 = vmatmul.f32.gmra.mxu2 %v1375_v12 }
  0xec   :  { %855 = vmatmul.f32.gmra.mxu3 %v1430_v13 }
  0xed   :  { %v2258_v19 = vadd.f32 %v321_v46, %v257_v18  ;;  %790 = vmatmul.f32.gmra.mxu1 %v1429_v16  ;;  %v1382_v16 = vld [vmem:[%s2825_s0 + $0x2e0] sm:$0xff]  ;;  %v1445_v18 = vld [vmem:[%s2825_s0 + $0x458] sm:$0xff] }
  0xee   :  { %v330_v20 = vpop.f32.mrf.mxu2 }
  0xef   :  { %v2260_v21 = vpop.f32.mrf.mxu3 }
  0xf0   :  { %v194_v22 = vpop.f32.mrf.mxu0 }
  0xf2   :  { %v259_v28 = vpop.f32.mrf.mxu1 }
  0xf3   :  { %1396 = vmatmul.msk.f32.gmra.mxu0 %vm98_vm0, %v1370_v23  ;;  %v260_v30 = vadd.f32 %v259_v28, %v194_v22  ;;  %559 = vmatmul.f32.gmra.mxu2 %v1378_v24  ;;  %v1444_v23 = vld [vmem:[%s2825_s0 + $0x450] sm:$0xff] }
  0xf4   :  { %858 = vmatmul.f32.gmra.mxu3 %v1433_v26 }
  0xf5   :  { %v2275_v31 = vadd.f32 %v324_v58, %v260_v30  ;;  %793 = vmatmul.f32.gmra.mxu1 %v1432_v29 }
  0xf6   :  { %v333_v32 = vpop.f32.mrf.mxu2 }
  0xf7   :  { %v2277_v33 = vpop.f32.mrf.mxu3 }
  0xf8   :  { %v197_v34 = vpop.f32.mrf.mxu0 }
  0xfa   :  { %v262_v40 = vpop.f32.mrf.mxu1 }
  0xfb   :  { %1397 = vmatmul.msk.f32.gmra.mxu0 %vm98_vm0, %v1373_v36  ;;  %v263_v42 = vadd.f32 %v262_v40, %v197_v34  ;;  %562 = vmatmul.f32.gmra.mxu2 %v1381_v38  ;;  %v1448_v34 = vld [vmem:[%s2825_s0 + $0x470] sm:$0xff]  ;;  %v1410_v36 = vld [vmem:[%s2825_s0 + $0x340] sm:$0xff] }
  0xfc   :  { %861 = vmatmul.f32.gmra.mxu3 %v1436_v39  ;;  %v1447_v39 = vld [vmem:[%s2825_s0 + $0x468] sm:$0xff] }
  0xfd   :  { %v2292_v43 = vadd.f32 %v327_v8, %v263_v42  ;;  %796 = vmatmul.f32.gmra.mxu1 %v1435_v41  ;;  %v1441_v8 = vld [vmem:[%s2825_s0 + $0x438] sm:$0xff] }
  0xfe   :  { %v336_v44 = vpop.f32.mrf.mxu2 }
  0xff   :  { %v2294_v46 = vpop.f32.mrf.mxu3 }
 0x100   :  { %v200_v48 = vpop.f32.mrf.mxu0 }
 0x102   :  { %v265_v54 = vpop.f32.mrf.mxu1 }
 0x103   :  { %1398 = vmatmul.msk.f32.gmra.mxu0 %vm98_vm0, %v1376_v50  ;;  %v266_v56 = vadd.f32 %v265_v54, %v200_v48  ;;  %565 = vmatmul.f32.gmra.mxu2 %v1384_v52  ;;  %v1466_v52 = vld [vmem:[%s2825_s0 + $0x480] sm:$0xff]  ;;  %v1413_v54 = vld [vmem:[%s2825_s0 + $0x358] sm:$0xff] }
 0x104   :  { %864 = vmatmul.f32.gmra.mxu3 %v1439_v53 }
 0x105   :  { %v2309_v58 = vadd.f32 %v330_v20, %v266_v56  ;;  %799 = vmatmul.f32.gmra.mxu1 %v1438_v55  ;;  %v1407_v20 = vld [vmem:[%s2825_s0 + $0x328] sm:$0xff]  ;;  %v1468_v55 = vld [vmem:[%s2825_s0 + $0x490] sm:$0xff] }
 0x106   :  { %v339_v62 = vpop.f32.mrf.mxu2 }
 0x107   :  { %v2311_v63 = vpop.f32.mrf.mxu3 }
 0x108   :  { %v203_v0 = vpop.f32.mrf.mxu0 }
 0x10a   :  { %v268_v4 = vpop.f32.mrf.mxu1 }
 0x10b   :  { %1399 = vmatmul.msk.f32.gmra.mxu0 %vm98_vm0, %v1379_v1  ;;  %v269_v10 = vadd.f32 %v268_v4, %v203_v0  ;;  %1450 = vmatmul.msk.f32.vlgmr.msra.gmra.mxu2 %vm98_vm0, %v1404_v3 }
 0x10c   :  { %867 = vmatmul.f32.gmra.mxu3 %v1442_v2 }
 0x10d   :  { %v2327_v11 = vadd.f32 %v333_v32, %v269_v10  ;;  %802 = vmatmul.f32.gmra.mxu1 %v1441_v8  ;;  %v1385_v32 = vld [vmem:[%s2825_s0 + $0x2f8] sm:$0xff] }
 0x10e   :  { %v521_v13 = vpop.f32.mrf.mxu2  ;;  %v1469_v8 = vld [vmem:[%s2825_s0 + $0x498] sm:$0xff] }
 0x10f   :  { %v2329_v12 = vpop.f32.mrf.mxu3  ;;  %v522_v42 = vadd.f32 %v521_v13, %v2107_v51  ;;  %v1416_v13 = vld [vmem:[%s2825_s0 + $0x370] sm:$0xff] }
 0x110   :  { %v206_v14 = vpop.f32.mrf.mxu0 }
 0x112   :  { %v271_v22 = vpop.f32.mrf.mxu1 }
 0x113   :  { %1400 = vmatmul.msk.f32.gmra.mxu0 %vm98_vm0, %v1382_v16  ;;  %v272_v24 = vadd.f32 %v271_v22, %v206_v14  ;;  %1451 = vmatmul.msk.f32.gmra.mxu2 %vm98_vm0, %v1407_v20  ;;  %v1471_v14 = vld [vmem:[%s2825_s0 + $0x4a8] sm:$0xff] }
 0x114   :  { %870 = vmatmul.f32.gmra.mxu3 %v1445_v18  ;;  %v1470_v18 = vld [vmem:[%s2825_s0 + $0x4a0] sm:$0xff] }
 0x115   :  { %v2345_v26 = vadd.f32 %v336_v44, %v272_v24  ;;  %805 = vmatmul.f32.gmra.mxu1 %v1444_v23 }
 0x116   :  { %v524_v29 = vpop.f32.mrf.mxu2 }
 0x117   :  { %v2347_v28 = vpop.f32.mrf.mxu3  ;;  %v525_v0 = vadd.f32 %v524_v29, %v2124_v61 }
 0x118   :  { %v209_v30 = vpop.f32.mrf.mxu0 }
 0x11a   :  { %v274_v38 = vpop.f32.mrf.mxu1 }
 0x11b   :  { %1401 = vmatmul.msk.f32.gmra.mxu0 %vm98_vm0, %v1385_v32  ;;  %v275_v40 = vadd.f32 %v274_v38, %v209_v30  ;;  %1452 = vmatmul.msk.f32.gmra.mxu2 %vm98_vm0, %v1410_v36  ;;  %v1472_v30 = vld [vmem:[%s2825_s0 + $0x4b0] sm:$0xff]  ;;  %v1474_v36 = vld [vmem:[%s2825_s0 + $0x4c0] sm:$0xff] }
 0x11c   :  { %873 = vmatmul.f32.gmra.mxu3 %v1448_v34  ;;  %v1419_v34 = vld [vmem:[%s2825_s0 + $0x388] sm:$0xff] }
 0x11d   :  { %v2363_v41 = vadd.f32 %v339_v62, %v275_v40  ;;  %808 = vmatmul.f32.gmra.mxu1 %v1447_v39  ;;  %v1467_v62 = vld [vmem:[%s2825_s0 + $0x488] sm:$0xff]  ;;  %v1473_v39 = vld [vmem:[%s2825_s0 + $0x4b8] sm:$0xff] }
 0x11e   :  { %v527_v48 = vpop.f32.mrf.mxu2 }
 0x11f   :  { %v2366_v44 = vpop.f32.mrf.mxu3  ;;  %v528_v20 = vadd.f32 %v527_v48, %v2141_v7 }
 0x120   :  { %v586_v50 = vpop.f32.mrf.mxu0 }
 0x121   :  { %v2371_v53 = vadd.f32 %v586_v50, %v522_v42 }
 0x122   :  { %v764_v56 = vpop.f32.mrf.mxu1 }
 0x123   :  { %v634_v51 = vmax.f32 %v2105_v49, %v2371_v53  ;;  %1071 = vmatmul.f32.vlgmr.msra.gmra.mxu0 %v1466_v52  ;;  %1453 = vmatmul.msk.f32.gmra.mxu2 %vm98_vm0, %v1413_v54  ;;  %v1475_v54 = vld [vmem:[%s2825_s0 + $0x4c8] sm:$0xff] }
 0x124   :  { %1514 = vmatmul.msk.f32.vlgmr.msra.gmra.mxu3 %vm98_vm0, %v1468_v55 }
 0x125   :  { %1136 = vmatmul.f32.vlgmr.msra.gmra.mxu1 %v1467_v62  ;;  %v1477_v62 = vld [vmem:[%s2825_s0 + $0x4d8] sm:$0xff] }
 0x126   :  { %v530_v1 = vpop.f32.mrf.mxu2 }
 0x127   :  { %v829_v2 = vpop.f32.mrf.mxu3  ;;  %v531_v40 = vadd.f32 %v530_v1, %v2158_v17  ;;  %v1476_v1 = vld [vmem:[%s2825_s0 + $0x4d0] sm:$0xff] }
 0x128   :  { %v2387_v3 = vadd.f32 %v829_v2, %v764_v56  ;;  %v589_v4 = vpop.f32.mrf.mxu0  ;;  %v1422_v56 = vld [vmem:[%s2825_s0 + $0x3a0] sm:$0xff] }
 0x129   :  { %v2392_v10 = vadd.f32 %v589_v4, %v525_v0 }
 0x12a   :  { %v767_v16 = vpop.f32.mrf.mxu1 }
 0x12b   :  { %v635_v61 = vmax.f32 %v2122_v59, %v2392_v10  ;;  %1074 = vmatmul.f32.gmra.mxu0 %v1469_v8  ;;  %1454 = vmatmul.msk.f32.gmra.mxu2 %vm98_vm0, %v1416_v13 }
 0x12c   :  { %1515 = vmatmul.msk.f32.gmra.mxu3 %vm98_vm0, %v1471_v14 }
 0x12d   :  { %1139 = vmatmul.f32.gmra.mxu1 %v1470_v18 }
 0x12e   :  { %v533_v22 = vpop.f32.mrf.mxu2 }
 0x12f   :  { %v832_v23 = vpop.f32.mrf.mxu3  ;;  %v534_v2 = vadd.f32 %v533_v22, %v2175_v27 }
 0x130   :  { %v2408_v24 = vadd.f32 %v832_v23, %v767_v16  ;;  %v592_v29 = vpop.f32.mrf.mxu0  ;;  %v1478_v16 = vld [vmem:[%s2825_s0 + $0x4e0] sm:$0xff]  ;;  %v1480_v23 = vld [vmem:[%s2825_s0 + $0x4f0] sm:$0xff] }
 0x131   :  { %v2413_v32 = vadd.f32 %v592_v29, %v528_v20  ;;  %v1425_v20 = vld [vmem:[%s2825_s0 + $0x3b8] sm:$0xff]  ;;  %v1479_v29 = vld [vmem:[%s2825_s0 + $0x4e8] sm:$0xff] }
 0x132   :  { %v770_v38 = vpop.f32.mrf.mxu1 }
 0x133   :  { %v636_v7 = vmax.f32 %v2139_v5, %v2413_v32  ;;  %1077 = vmatmul.f32.gmra.mxu0 %v1472_v30  ;;  %1455 = vmatmul.msk.f32.gmra.mxu2 %vm98_vm0, %v1419_v34 }
 0x134   :  { %1516 = vmatmul.msk.f32.gmra.mxu3 %vm98_vm0, %v1474_v36 }
 0x135   :  { %1142 = vmatmul.f32.gmra.mxu1 %v1473_v39 }
 0x136   :  { %v536_v42 = vpop.f32.mrf.mxu2 }
 0x137   :  { %v835_v48 = vpop.f32.mrf.mxu3  ;;  %v537_v30 = vadd.f32 %v536_v42, %v2192_v37 }
 0x138   :  { %v2429_v50 = vadd.f32 %v835_v48, %v770_v38  ;;  %v595_v52 = vpop.f32.mrf.mxu0 }
 0x139   :  { %v2434_v55 = vadd.f32 %v595_v52, %v531_v40  ;;  %v1481_v40 = vld [vmem:[%s2825_s0 + $0x4f8] sm:$0xff]  ;;  %v1428_v52 = vld [vmem:[%s2825_s0 + $0x3d0] sm:$0xff] }
 0x13a   :  { %v773_v0 = vpop.f32.mrf.mxu1 }
 0x13b   :  { %v637_v17 = vmax.f32 %v2156_v15, %v2434_v55  ;;  %1080 = vmatmul.f32.gmra.mxu0 %v1475_v54  ;;  %1456 = vmatmul.msk.f32.gmra.mxu2 %vm98_vm0, %v1422_v56  ;;  %v1483_v54 = vld [vmem:[%s2825_s0 + $0x508] sm:$0xff]  ;;  %v1482_v56 = vld [vmem:[%s2825_s0 + $0x500] sm:$0xff] }
 0x13c   :  { %1517 = vmatmul.msk.f32.gmra.mxu3 %vm98_vm0, %v1477_v62 }
 0x13d   :  { %1145 = vmatmul.f32.gmra.mxu1 %v1476_v1 }
 0x13e   :  { %v539_v4 = vpop.f32.mrf.mxu2 }
 0x13f   :  { %v838_v8 = vpop.f32.mrf.mxu3  ;;  %v540_v62 = vadd.f32 %v539_v4, %v2209_v47 }
 0x140   :  { %v2450_v13 = vadd.f32 %v838_v8, %v773_v0  ;;  %v598_v14 = vpop.f32.mrf.mxu0 }
 0x141   :  { %v2455_v18 = vadd.f32 %v598_v14, %v534_v2  ;;  %v1484_v14 = vld [vmem:[%s2825_s0 + $0x510] sm:$0xff] }
 0x142   :  { %v776_v22 = vpop.f32.mrf.mxu1 }
 0x143   :  { %v638_v27 = vmax.f32 %v2173_v25, %v2455_v18  ;;  %1083 = vmatmul.f32.gmra.mxu0 %v1478_v16  ;;  %1457 = vmatmul.msk.f32.gmra.mxu2 %vm98_vm0, %v1425_v20  ;;  %v1431_v20 = vld [vmem:[%s2825_s0 + $0x3e8] sm:$0xff] }
 0x144   :  { %1518 = vmatmul.msk.f32.gmra.mxu3 %vm98_vm0, %v1480_v23  ;;  %v1486_v23 = vld [vmem:[%s2825_s0 + $0x520] sm:$0xff] }
 0x145   :  { %1148 = vmatmul.f32.gmra.mxu1 %v1479_v29 }
 0x146   :  { %v542_v34 = vpop.f32.mrf.mxu2 }
 0x147   :  { %v841_v36 = vpop.f32.mrf.mxu3  ;;  %v543_v29 = vadd.f32 %v542_v34, %v2226_v60 }
 0x148   :  { %v2471_v38 = vadd.f32 %v841_v36, %v776_v22  ;;  %v601_v39 = vpop.f32.mrf.mxu0  ;;  %v1485_v22 = vld [vmem:[%s2825_s0 + $0x518] sm:$0xff] }
 0x149   :  { %v2476_v48 = vadd.f32 %v601_v39, %v537_v30 }
 0x14a   :  { %v779_v42 = vpop.f32.mrf.mxu1 }
 0x14b   :  { %v639_v37 = vmax.f32 %v2190_v35, %v2476_v48  ;;  %1086 = vmatmul.f32.gmra.mxu0 %v1481_v40  ;;  %1458 = vmatmul.msk.f32.gmra.mxu2 %vm98_vm0, %v1428_v52  ;;  %v1487_v52 = vld [vmem:[%s2825_s0 + $0x528] sm:$0xff] }
 0x14c   :  { %1519 = vmatmul.msk.f32.gmra.mxu3 %vm98_vm0, %v1483_v54 }
 0x14d   :  { %1151 = vmatmul.f32.gmra.mxu1 %v1482_v56  ;;  %v1489_v56 = vld [vmem:[%s2825_s0 + $0x538] sm:$0xff] }
 0x14e   :  { %v545_v0 = vpop.f32.mrf.mxu2 }
 0x14f   :  { %v844_v1 = vpop.f32.mrf.mxu3 }
 0x150   :  { %v2492_v2 = vadd.f32 %v844_v1, %v779_v42  ;;  %v604_v8 = vpop.f32.mrf.mxu0  ;;  %v1434_v42 = vld [vmem:[%s2825_s0 + $0x400] sm:$0xff]  ;;  %v546_v1 = vadd.f32 %v545_v0, %v2243_v9 }
 0x151   :  { %v2497_v16 = vadd.f32 %v604_v8, %v540_v62  ;;  %v1488_v62 = vld [vmem:[%s2825_s0 + $0x530] sm:$0xff] }
 0x152   :  { %v782_v4 = vpop.f32.mrf.mxu1 }
 0x153   :  { %1089 = vmatmul.f32.gmra.mxu0 %v1484_v14  ;;  %1459 = vmatmul.msk.f32.gmra.mxu2 %vm98_vm0, %v1431_v20  ;;  %v2828_v35 = vmax.f32 %v2207_v45, %v2497_v16 }
 0x154   :  { %1520 = vmatmul.msk.f32.gmra.mxu3 %vm98_vm0, %v1486_v23 }
 0x155   :  { %1154 = vmatmul.f32.gmra.mxu1 %v1485_v22 }
 0x156   :  { %v548_v30 = vpop.f32.mrf.mxu2 }
 0x157   :  { %v847_v36 = vpop.f32.mrf.mxu3 }
 0x158   :  { %v2513_v39 = vadd.f32 %v847_v36, %v782_v4  ;;  %v607_v40 = vpop.f32.mrf.mxu0  ;;  %v1490_v4 = vld [vmem:[%s2825_s0 + $0x540] sm:$0xff]  ;;  %v1492_v36 = vld [vmem:[%s2825_s0 + $0x550] sm:$0xff] }
 0x159   :  { %v2518_v54 = vadd.f32 %v607_v40, %v543_v29  ;;  %v1437_v29 = vld [vmem:[%s2825_s0 + $0x418] sm:$0xff]  ;;  %v1491_v40 = vld [vmem:[%s2825_s0 + $0x548] sm:$0xff] }
 0x15a   :  { %v785_v34 = vpop.f32.mrf.mxu1 }
 0x15b   :  { %1092 = vmatmul.f32.gmra.mxu0 %v1487_v52  ;;  %1460 = vmatmul.msk.f32.gmra.mxu2 %vm98_vm0, %v1434_v42  ;;  %v549_v52 = vadd.f32 %v548_v30, %v2260_v21  ;;  %v2829_v45 = vmax.f32 %v2224_v57, %v2518_v54 }
 0x15c   :  { %1521 = vmatmul.msk.f32.gmra.mxu3 %vm98_vm0, %v1489_v56 }
 0x15d   :  { %1157 = vmatmul.f32.gmra.mxu1 %v1488_v62 }
 0x15e   :  { %v551_v8 = vpop.f32.mrf.mxu2 }
 0x15f   :  { %v850_v14 = vpop.f32.mrf.mxu3 }
 0x160   :  { %v2534_v20 = vadd.f32 %v850_v14, %v785_v34  ;;  %v610_v23 = vpop.f32.mrf.mxu0 }
 0x161   :  { %v2539_v22 = vadd.f32 %v610_v23, %v546_v1  ;;  %v1493_v1 = vld [vmem:[%s2825_s0 + $0x558] sm:$0xff]  ;;  %v1440_v23 = vld [vmem:[%s2825_s0 + $0x430] sm:$0xff] }
 0x162   :  { %v788_v0 = vpop.f32.mrf.mxu1 }
 0x163   :  { %1095 = vmatmul.f32.gmra.mxu0 %v1490_v4  ;;  %1461 = vmatmul.msk.f32.gmra.mxu2 %vm98_vm0, %v1437_v29  ;;  %v1495_v4 = vld [vmem:[%s2825_s0 + $0x568] sm:$0xff]  ;;  %v1494_v29 = vld [vmem:[%s2825_s0 + $0x560] sm:$0xff]  ;;  %v2830_v57 = vmax.f32 %v2241_v6, %v2539_v22 }
 0x164   :  { %1522 = vmatmul.msk.f32.gmra.mxu3 %vm98_vm0, %v1492_v36  ;;  %v552_v36 = vadd.f32 %v551_v8, %v2277_v33 }
 0x165   :  { %1160 = vmatmul.f32.gmra.mxu1 %v1491_v40 }
 0x166   :  { %v554_v42 = vpop.f32.mrf.mxu2 }
 0x167   :  { %v853_v56 = vpop.f32.mrf.mxu3 }
 0x168   :  { %v2555_v34 = vadd.f32 %v853_v56, %v788_v0  ;;  %v613_v62 = vpop.f32.mrf.mxu0 }
 0x169   :  { %v2560_v14 = vadd.f32 %v613_v62, %v549_v52  ;;  %v1496_v62 = vld [vmem:[%s2825_s0 + $0x570] sm:$0xff] }
 0x16a   :  { %v791_v30 = vpop.f32.mrf.mxu1 }
 0x16b   :  { %1098 = vmatmul.f32.gmra.mxu0 %v1493_v1  ;;  %1462 = vmatmul.msk.f32.gmra.mxu2 %vm98_vm0, %v1440_v23  ;;  %v1443_v23 = vld [vmem:[%s2825_s0 + $0x448] sm:$0xff]  ;;  %v2831_v6 = vmax.f32 %v2258_v19, %v2560_v14 }
 0x16c   :  { %1523 = vmatmul.msk.f32.gmra.mxu3 %vm98_vm0, %v1495_v4  ;;  %v1498_v4 = vld [vmem:[%s2825_s0 + $0x580] sm:$0xff] }
 0x16d   :  { %1163 = vmatmul.f32.gmra.mxu1 %v1494_v29  ;;  %v555_v29 = vadd.f32 %v554_v42, %v2294_v46 }
 0x16e   :  { %v557_v0 = vpop.f32.mrf.mxu2 }
 0x16f   :  { %v856_v40 = vpop.f32.mrf.mxu3 }
 0x170   :  { %v2576_v52 = vadd.f32 %v856_v40, %v791_v30  ;;  %v616_v56 = vpop.f32.mrf.mxu0  ;;  %v1497_v30 = vld [vmem:[%s2825_s0 + $0x578] sm:$0xff] }
 0x171   :  { %v2581_v1 = vadd.f32 %v616_v56, %v552_v36 }
 0x172   :  { %v794_v8 = vpop.f32.mrf.mxu1 }
 0x173   :  { %1101 = vmatmul.f32.gmra.mxu0 %v1496_v62  ;;  %1463 = vmatmul.msk.f32.gmra.mxu2 %vm98_vm0, %v1443_v23  ;;  %v1499_v62 = vld [vmem:[%s2825_s0 + $0x588] sm:$0xff]  ;;  %v1446_v23 = vld [vmem:[%s2825_s0 + $0x460] sm:$0xff]  ;;  %v2832_v19 = vmax.f32 %v2275_v31, %v2581_v1 }
 0x174   :  { %1524 = vmatmul.msk.f32.gmra.mxu3 %vm98_vm0, %v1498_v4  ;;  %v1501_v4 = vld [vmem:[%s2825_s0 + $0x598] sm:$0xff] }
 0x175   :  { %1166 = vmatmul.f32.gmra.mxu1 %v1497_v30 }
 0x176   :  { %v560_v36 = vpop.f32.mrf.mxu2 }
 0x177   :  { %v859_v40 = vpop.f32.mrf.mxu3 }
 0x178   :  { %v2597_v56 = vadd.f32 %v859_v40, %v794_v8  ;;  %v619_v21 = vpop.f32.mrf.mxu0  ;;  %v1500_v8 = vld [vmem:[%s2825_s0 + $0x590] sm:$0xff] }
 0x179   :  { %v2602_v33 = vadd.f32 %v619_v21, %v555_v29  ;;  %v558_v21 = vadd.f32 %v557_v0, %v2311_v63 }
 0x17a   :  { %v797_v42 = vpop.f32.mrf.mxu1 }
 0x17b   :  { %1104 = vmatmul.f32.gmra.mxu0 %v1499_v62  ;;  %1464 = vmatmul.msk.f32.gmra.mxu2 %vm98_vm0, %v1446_v23  ;;  %v1502_v62 = vld [vmem:[%s2825_s0 + $0x5a0] sm:$0xff]  ;;  %v1449_v23 = vld [vmem:[%s2825_s0 + $0x478] sm:$0xff]  ;;  %v2833_v31 = vmax.f32 %v2292_v43, %v2602_v33 }
 0x17c   :  { %1525 = vmatmul.msk.f32.gmra.mxu3 %vm98_vm0, %v1501_v4  ;;  %v1504_v4 = vld [vmem:[%s2825_s0 + $0x5b0] sm:$0xff] }
 0x17d   :  { %1169 = vmatmul.f32.gmra.mxu1 %v1500_v8 }
 0x17e   :  { %v563_v30 = vpop.f32.mrf.mxu2 }
 0x17f   :  { %v862_v29 = vpop.f32.mrf.mxu3 }
 0x180   :  { %v2618_v40 = vadd.f32 %v862_v29, %v797_v42  ;;  %v622_v9 = vpop.f32.mrf.mxu0  ;;  %v1503_v42 = vld [vmem:[%s2825_s0 + $0x5a8] sm:$0xff] }
 0x181   :  { %v2623_v46 = vadd.f32 %v622_v9, %v558_v21  ;;  %v561_v9 = vadd.f32 %v560_v36, %v2329_v12  ;;  %v1506_v12 = vld [vmem:[%s2825_s0 + $0x5c0] sm:$0xff]  ;;  %v564_v36 = vadd.f32 %v563_v30, %v2347_v28 }
 0x182   :  { %v800_v0 = vpop.f32.mrf.mxu1 }
 0x183   :  { %1107 = vmatmul.f32.gmra.mxu0 %v1502_v62  ;;  %1465 = vmatmul.msk.f32.gmra.mxu2 %vm98_vm0, %v1449_v23  ;;  %v1505_v62 = vld [vmem:[%s2825_s0 + $0x5b8] sm:$0xff]  ;;  %v1507_v23 = vld [vmem:[%s2825_s0 + $0x5c8] sm:$0xff]  ;;  %v2834_v43 = vmax.f32 %v2309_v58, %v2623_v46 }
 0x184   :  { %1526 = vmatmul.msk.f32.gmra.mxu3 %vm98_vm0, %v1504_v4 }
 0x185   :  { %1172 = vmatmul.f32.gmra.mxu1 %v1503_v42 }
 0x186   :  { %v566_v8 = vpop.f32.mrf.mxu2 }
 0x187   :  { %v865_v21 = vpop.f32.mrf.mxu3 }
 0x188   :  { %v2639_v29 = vadd.f32 %v865_v21, %v800_v0  ;;  %v625_v60 = vpop.f32.mrf.mxu0 }
 0x189   :  { %v2644_v63 = vadd.f32 %v625_v60, %v561_v9 }
 0x18a   :  { %v803_v42 = vpop.f32.mrf.mxu1 }
 0x18b   :  { %1110 = vmatmul.f32.gmra.mxu0 %v1505_v62  ;;  %v1508_v62 = vld [vmem:[%s2825_s0 + $0x5d0] sm:$0xff]  ;;  %v2835_v58 = vmax.f32 %v2327_v11, %v2644_v63 }
 0x18c   :  { %1527 = vmatmul.msk.f32.gmra.mxu3 %vm98_vm0, %v1507_v23  ;;  %v1510_v23 = vld [vmem:[%s2825_s0 + $0x5e0] sm:$0xff] }
 0x18d   :  { %1175 = vmatmul.f32.gmra.mxu1 %v1506_v12 }
 0x18e   :  { %v894_v0 = vpop.f32.mrf.mxu2 }
 0x18f   :  { %v868_v60 = vpop.f32.mrf.mxu3  ;;  %v895_v21 = vadd.f32 %v894_v0, %v2387_v3  ;;  %v1509_v3 = vld [vmem:[%s2825_s0 + $0x5d8] sm:$0xff] }
 0x190   :  { %v2656_v9 = vadd.f32 %v868_v60, %v803_v42  ;;  %v628_v47 = vpop.f32.mrf.mxu0 }
 0x191   :  { %v2662_v4 = vadd.f32 %v628_v47, %v564_v36  ;;  %v942_v28 = vmax.f32 %v634_v51, %v895_v21  ;;  %v567_v47 = vadd.f32 %v566_v8, %v2366_v44  ;;  %v1511_v51 = vld [vmem:[%s2825_s0 + $0x5e8] sm:$0xff]  ;;  %v1513_v21 = vld [vmem:[%s2825_s0 + $0x5f8] sm:$0xff] }
 0x192   :  { %v806_v42 = vpop.f32.mrf.mxu1 }
 0x193   :  { %v648_v30 = vmax.f32 %v2345_v26, %v2662_v4  ;;  %1113 = vmatmul.f32.gmra.mxu0 %v1508_v62 }
 0x194   :  { %1528 = vmatmul.msk.f32.gmra.mxu3 %vm98_vm0, %v1510_v23 }
 0x195   :  { %1178 = vmatmul.f32.gmra.mxu1 %v1509_v3 }
 0x196   :  { %v897_v36 = vpop.f32.mrf.mxu2 }
 0x197   :  { %v871_v12 = vpop.f32.mrf.mxu3  ;;  %v898_v49 = vadd.f32 %v897_v36, %v2408_v24  ;;  %v1512_v24 = vld [vmem:[%s2825_s0 + $0x5f0] sm:$0xff] }
 0x198   :  { %v2677_v60 = vadd.f32 %v871_v12, %v806_v42  ;;  %v631_v53 = vpop.f32.mrf.mxu0 }
 0x199   :  { %v2683_v0 = vadd.f32 %v631_v53, %v567_v47  ;;  %v943_v44 = vmax.f32 %v635_v61, %v898_v49 }
 0x19a   :  { %v809_v62 = vpop.f32.mrf.mxu1 }
 0x19b   :  { %v649_v8 = vmax.f32 %v2363_v41, %v2683_v0  ;;  %1116 = vmatmul.f32.gmra.mxu0 %v1511_v51 }
 0x19c   :  { %1529 = vmatmul.msk.f32.gmra.mxu3 %vm98_vm0, %v1513_v21  ;;  %v2707_v21 = vld [vmem:[%s2826_s2] ss:$0 sm:$0xff] }
 0x19d   :  { %1181 = vmatmul.f32.gmra.mxu1 %v1512_v24 }
 0x19e   :  { %v900_v42 = vpop.f32.mrf.mxu2 }
 0x19f   :  { %v874_v23 = vpop.f32.mrf.mxu3  ;;  %v901_v47 = vadd.f32 %v900_v42, %v2429_v50 }
 0x1a0   :  { %v2697_v3 = vadd.f32 %v874_v23, %v809_v62  ;;  %v1072_v59 = vpop.f32.mrf.mxu0 }
 0x1a1   :  { %v944_v10 = vmax.f32 %v636_v7, %v901_v47 }
 0x1a2   :  { %v1137_v61 = vpop.f32.mrf.mxu1 }
 0x1a3   :  { %v1138_v12 = vadd.f32 %v1137_v61, %v1072_v59 }
 0x1a6   :  { %v903_v36 = vpop.f32.mrf.mxu2 }
 0x1a7   :  { %v1202_v49 = vpop.f32.mrf.mxu3  ;;  %v904_v53 = vadd.f32 %v903_v36, %v2450_v13 }
 0x1a8   :  { %v1203_v51 = vadd.f32 %v1202_v49, %v1138_v12  ;;  %v1075_v62 = vpop.f32.mrf.mxu0 }
 0x1a9   :  { %v945_v50 = vmax.f32 %v637_v17, %v904_v53 }
 0x1aa   :  { %v1250_v24 = vmax.f32 %v942_v28, %v1203_v51  ;;  %v1140_v5 = vpop.f32.mrf.mxu1 }
 0x1ab   :  { %v1141_v7 = vadd.f32 %v1140_v5, %v1075_v62 }
 0x1ac   :  { %v1270_v32 = vadd.f32 %v2707_v21, %v1250_v24 }
 0x1ae   :  { %v1286_v23 = vmax.f32 %v1270_v32, 0.0  ;;  %v906_v42 = vpop.f32.mrf.mxu2 }
 0x1af   :  { %v1205_v47 = vpop.f32.mrf.mxu3  ;;  %v907_v13 = vadd.f32 %v906_v42, %v2471_v38 }
 0x1b0   :  { %1302 = vst [vmem:[%s2827_s3] sm:$0xff] %v1286_v23  ;;  %v1206_v59 = vadd.f32 %v1205_v47, %v1141_v7  ;;  %v1078_v61 = vpop.f32.mrf.mxu0 }
 0x1b1   :  { %v946_v15 = vmax.f32 %v638_v27, %v907_v13 }
 0x1b2   :  { %v1251_v55 = vmax.f32 %v943_v44, %v1206_v59  ;;  %v1143_v17 = vpop.f32.mrf.mxu1 }
 0x1b3   :  { %v1144_v12 = vadd.f32 %v1143_v17, %v1078_v61 }
 0x1b4   :  { %v1271_v28 = vadd.f32 %v2707_v21, %v1251_v55 }
 0x1b6   :  { %v1287_v36 = vmax.f32 %v1271_v28, 0.0  ;;  %v909_v49 = vpop.f32.mrf.mxu2 }
 0x1b7   :  { %v1208_v53 = vpop.f32.mrf.mxu3  ;;  %v910_v38 = vadd.f32 %v909_v49, %v2492_v2 }
 0x1b8   :  { %1303 = vst [vmem:[%s2827_s3 + $0x8] sm:$0xff] %v1287_v36  ;;  %v1209_v51 = vadd.f32 %v1208_v53, %v1144_v12  ;;  %v1081_v62 = vpop.f32.mrf.mxu0 }
 0x1b9   :  { %v947_v25 = vmax.f32 %v639_v37, %v910_v38 }
 0x1ba   :  { %v1252_v18 = vmax.f32 %v944_v10, %v1209_v51  ;;  %v1146_v27 = vpop.f32.mrf.mxu1 }
 0x1bb   :  { %v1147_v24 = vadd.f32 %v1146_v27, %v1081_v62 }
 0x1bc   :  { %v1272_v44 = vadd.f32 %v2707_v21, %v1252_v18 }
 0x1be   :  { %v1288_v5 = vmax.f32 %v1272_v44, 0.0  ;;  %v912_v32 = vpop.f32.mrf.mxu2 }
 0x1bf   :  { %v1211_v7 = vpop.f32.mrf.mxu3  ;;  %v913_v2 = vadd.f32 %v912_v32, %v2513_v39 }
 0x1c0   :  { %1304 = vst [vmem:[%s2827_s3 + $0x10] sm:$0xff] %v1288_v5  ;;  %v1212_v23 = vadd.f32 %v1211_v7, %v1147_v24  ;;  %v1084_v42 = vpop.f32.mrf.mxu0 }
 0x1c1   :  { %v948_v48 = vmax.f32 %v2828_v35, %v913_v2 }
 0x1c2   :  { %v1253_v37 = vmax.f32 %v945_v50, %v1212_v23  ;;  %v1149_v10 = vpop.f32.mrf.mxu1 }
 0x1c3   :  { %v1150_v13 = vadd.f32 %v1149_v10, %v1084_v42 }
 0x1c4   :  { %v1273_v47 = vadd.f32 %v2707_v21, %v1253_v37 }
 0x1c6   :  { %v1289_v59 = vmax.f32 %v1273_v47, 0.0  ;;  %v915_v61 = vpop.f32.mrf.mxu2 }
 0x1c7   :  { %v1214_v55 = vpop.f32.mrf.mxu3  ;;  %v916_v39 = vadd.f32 %v915_v61, %v2534_v20 }
 0x1c8   :  { %1305 = vst [vmem:[%s2827_s3 + $0x18] sm:$0xff] %v1289_v59  ;;  %v1215_v17 = vadd.f32 %v1214_v55, %v1150_v13  ;;  %v1087_v28 = vpop.f32.mrf.mxu0 }
 0x1c9   :  { %v949_v16 = vmax.f32 %v2829_v45, %v916_v39 }
 0x1ca   :  { %v1254_v50 = vmax.f32 %v946_v15, %v1215_v17  ;;  %v1152_v12 = vpop.f32.mrf.mxu1 }
 0x1cb   :  { %v1153_v49 = vadd.f32 %v1152_v12, %v1087_v28 }
 0x1cc   :  { %v1274_v36 = vadd.f32 %v2707_v21, %v1254_v50 }
 0x1ce   :  { %v1290_v53 = vmax.f32 %v1274_v36, 0.0  ;;  %v918_v38 = vpop.f32.mrf.mxu2 }
 0x1cf   :  { %v1217_v51 = vpop.f32.mrf.mxu3  ;;  %v919_v20 = vadd.f32 %v918_v38, %v2555_v34 }
 0x1d0   :  { %1306 = vst [vmem:[%s2827_s3 + $0x20] sm:$0xff] %v1290_v53  ;;  %v1218_v62 = vadd.f32 %v1217_v51, %v1153_v49  ;;  %v1090_v18 = vpop.f32.mrf.mxu0 }
 0x1d1   :  { %v950_v54 = vmax.f32 %v2830_v57, %v919_v20 }
 0x1d2   :  { %v1255_v15 = vmax.f32 %v947_v25, %v1218_v62  ;;  %v1155_v27 = vpop.f32.mrf.mxu1 }
 0x1d3   :  { %v1156_v24 = vadd.f32 %v1155_v27, %v1090_v18 }
 0x1d4   :  { %v1275_v44 = vadd.f32 %v2707_v21, %v1255_v15 }
 0x1d6   :  { %v1291_v5 = vmax.f32 %v1275_v44, 0.0  ;;  %v921_v32 = vpop.f32.mrf.mxu2 }
 0x1d7   :  { %v1220_v7 = vpop.f32.mrf.mxu3  ;;  %v922_v34 = vadd.f32 %v921_v32, %v2576_v52 }
 0x1d8   :  { %1307 = vst [vmem:[%s2827_s3 + $0x28] sm:$0xff] %v1291_v5  ;;  %v1221_v2 = vadd.f32 %v1220_v7, %v1156_v24  ;;  %v1093_v23 = vpop.f32.mrf.mxu0 }
 0x1d9   :  { %v951_v22 = vmax.f32 %v2831_v6, %v922_v34 }
 0x1da   :  { %v1256_v25 = vmax.f32 %v948_v48, %v1221_v2  ;;  %v1158_v42 = vpop.f32.mrf.mxu1 }
 0x1db   :  { %v1159_v37 = vadd.f32 %v1158_v42, %v1093_v23 }
 0x1dc   :  { %v1276_v35 = vadd.f32 %v2707_v21, %v1256_v25 }
 0x1de   :  { %v1292_v10 = vmax.f32 %v1276_v35, 0.0  ;;  %v924_v47 = vpop.f32.mrf.mxu2 }
 0x1df   :  { %v1223_v13 = vpop.f32.mrf.mxu3  ;;  %v925_v52 = vadd.f32 %v924_v47, %v2597_v56 }
 0x1e0   :  { %1308 = vst [vmem:[%s2827_s3 + $0x30] sm:$0xff] %v1292_v10  ;;  %v1224_v59 = vadd.f32 %v1223_v13, %v1159_v37  ;;  %v1096_v61 = vpop.f32.mrf.mxu0 }
 0x1e1   :  { %v952_v14 = vmax.f32 %v2832_v19, %v925_v52 }
 0x1e2   :  { %v1257_v48 = vmax.f32 %v949_v16, %v1224_v59  ;;  %v1161_v55 = vpop.f32.mrf.mxu1 }
 0x1e3   :  { %v1162_v17 = vadd.f32 %v1161_v55, %v1096_v61 }
 0x1e4   :  { %v1277_v39 = vadd.f32 %v2707_v21, %v1257_v48 }
 0x1e6   :  { %v1293_v28 = vmax.f32 %v1277_v39, 0.0  ;;  %v927_v45 = vpop.f32.mrf.mxu2 }
 0x1e7   :  { %v1226_v50 = vpop.f32.mrf.mxu3  ;;  %v928_v56 = vadd.f32 %v927_v45, %v2618_v40 }
 0x1e8   :  { %1309 = vst [vmem:[%s2827_s3 + $0x38] sm:$0xff] %v1293_v28  ;;  %v1227_v12 = vadd.f32 %v1226_v50, %v1162_v17  ;;  %v1099_v36 = vpop.f32.mrf.mxu0 }
 0x1e9   :  { %v953_v1 = vmax.f32 %v2833_v31, %v928_v56 }
 0x1ea   :  { %v1258_v16 = vmax.f32 %v950_v54, %v1227_v12  ;;  %v1164_v49 = vpop.f32.mrf.mxu1 }
 0x1eb   :  { %v1165_v38 = vadd.f32 %v1164_v49, %v1099_v36 }
 0x1ec   :  { %v1278_v53 = vadd.f32 %v2707_v21, %v1258_v16 }
 0x1ee   :  { %v1294_v51 = vmax.f32 %v1278_v53, 0.0  ;;  %v930_v20 = vpop.f32.mrf.mxu2 }
 0x1ef   :  { %v1229_v62 = vpop.f32.mrf.mxu3  ;;  %v931_v40 = vadd.f32 %v930_v20, %v2639_v29 }
 0x1f0   :  { %1310 = vst [vmem:[%s2827_s3 + $0x40] sm:$0xff] %v1294_v51  ;;  %v1230_v18 = vadd.f32 %v1229_v62, %v1165_v38  ;;  %v1102_v57 = vpop.f32.mrf.mxu0 }
 0x1f1   :  { %v954_v33 = vmax.f32 %v2834_v43, %v931_v40 }
 0x1f2   :  { %v1259_v54 = vmax.f32 %v951_v22, %v1230_v18  ;;  %v1167_v15 = vpop.f32.mrf.mxu1 }
 0x1f3   :  { %v1168_v44 = vadd.f32 %v1167_v15, %v1102_v57 }
 0x1f4   :  { %v1279_v27 = vadd.f32 %v2707_v21, %v1259_v54 }
 0x1f6   :  { %v1295_v24 = vmax.f32 %v1279_v27, 0.0  ;;  %v933_v5 = vpop.f32.mrf.mxu2 }
 0x1f7   :  { %v1232_v32 = vpop.f32.mrf.mxu3  ;;  %v934_v29 = vadd.f32 %v933_v5, %v2656_v9 }
 0x1f8   :  { %1311 = vst [vmem:[%s2827_s3 + $0x48] sm:$0xff] %v1295_v24  ;;  %v1233_v7 = vadd.f32 %v1232_v32, %v1168_v44  ;;  %v1105_v34 = vpop.f32.mrf.mxu0 }
 0x1f9   :  { %v955_v46 = vmax.f32 %v2835_v58, %v934_v29 }
 0x1fa   :  { %v1260_v2 = vmax.f32 %v952_v14, %v1233_v7  ;;  %v1170_v23 = vpop.f32.mrf.mxu1 }
 0x1fb   :  { %v1171_v22 = vadd.f32 %v1170_v23, %v1105_v34 }
 0x1fc   :  { %v1280_v6 = vadd.f32 %v2707_v21, %v1260_v2 }
 0x1fe   :  { %v1296_v25 = vmax.f32 %v1280_v6, 0.0  ;;  %v936_v42 = vpop.f32.mrf.mxu2 }
 0x1ff   :  { %v1235_v35 = vpop.f32.mrf.mxu3  ;;  %v937_v9 = vadd.f32 %v936_v42, %v2677_v60 }
 0x200   :  { %1312 = vst [vmem:[%s2827_s3 + $0x50] sm:$0xff] %v1296_v25  ;;  %v1236_v37 = vadd.f32 %v1235_v35, %v1171_v22  ;;  %v1108_v10 = vpop.f32.mrf.mxu0 }
 0x201   :  { %v956_v11 = vmax.f32 %v648_v30, %v937_v9 }
 0x202   :  { %v1261_v63 = vmax.f32 %v953_v1, %v1236_v37  ;;  %v1173_v47 = vpop.f32.mrf.mxu1 }
 0x203   :  { %v1174_v52 = vadd.f32 %v1173_v47, %v1108_v10 }
 0x204   :  { %v1281_v13 = vadd.f32 %v2707_v21, %v1261_v63 }
 0x206   :  { %v1297_v59 = vmax.f32 %v1281_v13, 0.0  ;;  %v939_v61 = vpop.f32.mrf.mxu2 }
 0x207   :  { %v1238_v19 = vpop.f32.mrf.mxu3  ;;  %v940_v60 = vadd.f32 %v939_v61, %v2697_v3 }
 0x208   :  { %1313 = vst [vmem:[%s2827_s3 + $0x58] sm:$0xff] %v1297_v59  ;;  %v1239_v14 = vadd.f32 %v1238_v19, %v1174_v52  ;;  %v1111_v48 = vpop.f32.mrf.mxu0 }
 0x209   :  { %v957_v26 = vmax.f32 %v649_v8, %v940_v60 }
 0x20a   :  { %v1262_v4 = vmax.f32 %v954_v33, %v1239_v14  ;;  %v1176_v30 = vpop.f32.mrf.mxu1 }
 0x20b   :  { %v1177_v39 = vadd.f32 %v1176_v30, %v1111_v48 }
 0x20c   :  { %v1282_v55 = vadd.f32 %v2707_v21, %v1262_v4 }
 0x20e   :  { %v1298_v17 = vmax.f32 %v1282_v55, 0.0 }
 0x20f   :  { %v1241_v28 = vpop.f32.mrf.mxu3 }
 0x210   :  { %1314 = vst [vmem:[%s2827_s3 + $0x60] sm:$0xff] %v1298_v17  ;;  %v1242_v45 = vadd.f32 %v1241_v28, %v1177_v39  ;;  %v1114_v50 = vpop.f32.mrf.mxu0 }
 0x212   :  { %v1263_v3 = vmax.f32 %v955_v46, %v1242_v45  ;;  %v1179_v56 = vpop.f32.mrf.mxu1 }
 0x213   :  { %v1180_v36 = vadd.f32 %v1179_v56, %v1114_v50 }
 0x214   :  { %v1283_v12 = vadd.f32 %v2707_v21, %v1263_v3 }
 0x216   :  { %v1299_v41 = vmax.f32 %v1283_v12, 0.0 }
 0x217   :  { %v1244_v0 = vpop.f32.mrf.mxu3 }
 0x218   :  { %1315 = vst [vmem:[%s2827_s3 + $0x68] sm:$0xff] %v1299_v41  ;;  %v1245_v8 = vadd.f32 %v1244_v0, %v1180_v36  ;;  %v1117_v31 = vpop.f32.mrf.mxu0 }
 0x21a   :  { %v1264_v1 = vmax.f32 %v956_v11, %v1245_v8  ;;  %v1182_v16 = vpop.f32.mrf.mxu1 }
 0x21b   :  { %v1183_v53 = vadd.f32 %v1182_v16, %v1117_v31 }
 0x21c   :  { %v1284_v49 = vadd.f32 %v2707_v21, %v1264_v1 }
 0x21e   :  { %v1300_v38 = vmax.f32 %v1284_v49, 0.0 }
 0x21f   :  { %v1247_v51 = vpop.f32.mrf.mxu3 }
 0x220   :  { %1316 = vst [vmem:[%s2827_s3 + $0x70] sm:$0xff] %v1300_v38  ;;  %v1248_v20 = vadd.f32 %v1247_v51, %v1183_v53 }
 0x222   :  { %v1265_v62 = vmax.f32 %v957_v26, %v1248_v20 }
 0x224   :  { %v1285_v40 = vadd.f32 %v2707_v21, %v1265_v62 }
 0x226   :  { %v1301_v18 = vmax.f32 %v1285_v40, 0.0 }
 0x228   :  { %1317 = vst [vmem:[%s2827_s3 + $0x78] sm:$0xff] %v1301_v18 }

// kernel: autoencoder_forward.8
= control target key start
LH: loop header
LB: loop body
LE: loop exit
PB: predicated region body
PF: predicated region fallthrough
CT: control target
= control target key end

     0   :  { %vm106_vm0 = vcmask 523264   ;;  %s1879_s1 = inlined_call_operand.vmem [shape: f32[576,128], index: 1, kind: input, shape index: {}]   ;;  %s1880_s0 = inlined_call_operand.vmem [shape: f32[4,32,576], index: 0, kind: input, shape index: {}]   ;;  %s1881_s2 = inlined_call_operand.vmem [shape: f32[1,128], index: 2, kind: input, shape index: {}]   ;;  %s1882_s3 = inlined_call_operand.vmem [shape: f32[32,128], index: 3, kind: output, shape index: {}]  }
   0x1   :  { %v930_v0 = vld [vmem:[%s1879_s1 + $0x78] sm:$0xff]  ;;  %v947_v3 = vld [vmem:[%s1879_s1 + $0x70] sm:$0xff]  ;;  %v969_v7 = vld [vmem:[%s1879_s1 + $0x68] sm:$0xff] }
   0x2   :  { %v935_v1 = vld [vmem:[%s1879_s1 + $0x178] sm:$0xff]  ;;  %119 = vmatpush.msra.mxu0 %v930_v0  ;;  %v957_v5 = vld [vmem:[%s1879_s1 + $0x170] sm:$0xff]  ;;  %v981_v9 = vld [vmem:[%s1879_s1 + $0x168] sm:$0xff] }
   0x3   :  { %v940_v2 = vld [vmem:[%s1879_s1 + $0x1f8] sm:$0xff]  ;;  %177 = vmatpush.msra.mxu2 %v935_v1  ;;  %1913 = vst [vmem:[#allocation2_spill] sm:$0xff] %v957_v5  ;;  %v964_v6 = vld [vmem:[%s1879_s1 + $0x1f0] sm:$0xff]  ;;  %v986_v10 = vld [vmem:[%s1879_s1 + $0x1e8] sm:$0xff] }
   0x4   :  { %v952_v4 = vld [vmem:[%s1879_s1 + $0xf8] sm:$0xff]  ;;  %206 = vmatpush.msra.mxu3 %v940_v2  ;;  %v974_v8 = vld [vmem:[%s1879_s1 + $0xf0] sm:$0xff]  ;;  %120 = vmatpush.msra.mxu0 %v947_v3  ;;  %1914 = vst [vmem:[#allocation3_spill] sm:$0xff] %v981_v9  ;;  %v993_v11 = vld [vmem:[%s1879_s1 + $0x60] sm:$0xff] }
   0x5   :  { %148 = vmatpush.msra.mxu1 %v952_v4  ;;  %178 = vmatpush.msra.mxu2 %v957_v5  ;;  %v998_v12 = vld [vmem:[%s1879_s1 + $0xe8] sm:$0xff]  ;;  %v1003_v13 = vld [vmem:[%s1879_s1 + $0x160] sm:$0xff]  ;;  %v1022_v16 = vld [vmem:[%s1879_s1 + $0x58] sm:$0xff] }
   0x6   :  { %207 = vmatpush.msra.mxu3 %v964_v6  ;;  %121 = vmatpush.msra.mxu0 %v969_v7  ;;  %v1010_v14 = vld [vmem:[%s1879_s1 + $0x1e0] sm:$0xff]  ;;  %v1027_v17 = vld [vmem:[%s1879_s1 + $0x158] sm:$0xff]  ;;  %v1046_v20 = vld [vmem:[%s1879_s1 + $0x50] sm:$0xff] }
   0x7   :  { %149 = vmatpush.msra.mxu1 %v974_v8  ;;  %179 = vmatpush.msra.mxu2 %v981_v9  ;;  %v1015_v15 = vld [vmem:[%s1879_s1 + $0xe0] sm:$0xff]  ;;  %v1034_v18 = vld [vmem:[%s1879_s1 + $0x1d8] sm:$0xff]  ;;  %v1051_v21 = vld [vmem:[%s1879_s1 + $0x150] sm:$0xff] }
   0x8   :  { %208 = vmatpush.msra.mxu3 %v986_v10  ;;  %122 = vmatpush.msra.mxu0 %v993_v11  ;;  %v1039_v19 = vld [vmem:[%s1879_s1 + $0xd8] sm:$0xff]  ;;  %1915 = vst [vmem:[#allocation4_spill] sm:$0xff] %v1051_v21  ;;  %v1058_v22 = vld [vmem:[%s1879_s1 + $0x1d0] sm:$0xff]  ;;  %v1070_v24 = vld [vmem:[%s1879_s1 + $0x48] sm:$0xff] }
   0x9   :  { %150 = vmatpush.msra.mxu1 %v998_v12  ;;  %180 = vmatpush.msra.mxu2 %v1003_v13  ;;  %v1063_v23 = vld [vmem:[%s1879_s1 + $0xd0] sm:$0xff]  ;;  %v1075_v25 = vld [vmem:[%s1879_s1 + $0x148] sm:$0xff]  ;;  %v1094_v28 = vld [vmem:[%s1879_s1 + $0x40] sm:$0xff] }
   0xa   :  { %209 = vmatpush.msra.mxu3 %v1010_v14  ;;  %123 = vmatpush.msra.mxu0 %v1022_v16  ;;  %1916 = vst [vmem:[#allocation5_spill] sm:$0xff] %v1075_v25  ;;  %v1082_v26 = vld [vmem:[%s1879_s1 + $0x1c8] sm:$0xff]  ;;  %v1099_v29 = vld [vmem:[%s1879_s1 + $0x140] sm:$0xff]  ;;  %v1118_v32 = vld [vmem:[%s1879_s1 + $0x38] sm:$0xff] }
   0xb   :  { %151 = vmatpush.msra.mxu1 %v1015_v15  ;;  %181 = vmatpush.msra.mxu2 %v1027_v17  ;;  %v1087_v27 = vld [vmem:[%s1879_s1 + $0xc8] sm:$0xff]  ;;  %v1106_v30 = vld [vmem:[%s1879_s1 + $0x1c0] sm:$0xff]  ;;  %v1123_v33 = vld [vmem:[%s1879_s1 + $0x138] sm:$0xff] }
   0xc   :  { %210 = vmatpush.msra.mxu3 %v1034_v18  ;;  %124 = vmatpush.msra.mxu0 %v1046_v20  ;;  %v1111_v31 = vld [vmem:[%s1879_s1 + $0xc0] sm:$0xff]  ;;  %v1130_v34 = vld [vmem:[%s1879_s1 + $0x1b8] sm:$0xff]  ;;  %v1142_v36 = vld [vmem:[%s1879_s1 + $0x30] sm:$0xff] }
   0xd   :  { %152 = vmatpush.msra.mxu1 %v1039_v19  ;;  %182 = vmatpush.msra.mxu2 %v1051_v21  ;;  %v1135_v35 = vld [vmem:[%s1879_s1 + $0xb8] sm:$0xff]  ;;  %v1147_v37 = vld [vmem:[%s1879_s1 + $0x130] sm:$0xff]  ;;  %v1166_v40 = vld [vmem:[%s1879_s1 + $0x28] sm:$0xff] }
   0xe   :  { %211 = vmatpush.msra.mxu3 %v1058_v22  ;;  %125 = vmatpush.msra.mxu0 %v1070_v24  ;;  %1917 = vst [vmem:[#allocation6_spill] sm:$0xff] %v1135_v35  ;;  %v1154_v38 = vld [vmem:[%s1879_s1 + $0x1b0] sm:$0xff]  ;;  %v1171_v41 = vld [vmem:[%s1879_s1 + $0x128] sm:$0xff]  ;;  %v1190_v44 = vld [vmem:[%s1879_s1 + $0x20] sm:$0xff] }
   0xf   :  { %153 = vmatpush.msra.mxu1 %v1063_v23  ;;  %183 = vmatpush.msra.mxu2 %v1075_v25  ;;  %1918 = vst [vmem:[#allocation7_spill] sm:$0xff] %v1147_v37  ;;  %v1159_v39 = vld [vmem:[%s1879_s1 + $0xb0] sm:$0xff]  ;;  %v1178_v42 = vld [vmem:[%s1879_s1 + $0x1a8] sm:$0xff]  ;;  %v1195_v45 = vld [vmem:[%s1879_s1 + $0x120] sm:$0xff] }
  0x10   :  { %212 = vmatpush.msra.mxu3 %v1082_v26  ;;  %126 = vmatpush.msra.mxu0 %v1094_v28  ;;  %1919 = vst [vmem:[#allocation8_spill] sm:$0xff] %v1159_v39  ;;  %v1183_v43 = vld [vmem:[%s1879_s1 + $0xa8] sm:$0xff]  ;;  %v1202_v46 = vld [vmem:[%s1879_s1 + $0x1a0] sm:$0xff]  ;;  %v1214_v48 = vld [vmem:[%s1879_s1 + $0x18] sm:$0xff] }
  0x11   :  { %154 = vmatpush.msra.mxu1 %v1087_v27  ;;  %184 = vmatpush.msra.mxu2 %v1099_v29  ;;  %1920 = vst [vmem:[#allocation9_spill] sm:$0xff] %v1171_v41  ;;  %v1207_v47 = vld [vmem:[%s1879_s1 + $0xa0] sm:$0xff]  ;;  %v1219_v49 = vld [vmem:[%s1879_s1 + $0x118] sm:$0xff]  ;;  %v1238_v52 = vld [vmem:[%s1879_s1 + $0x10] sm:$0xff] }
  0x12   :  { %213 = vmatpush.msra.mxu3 %v1106_v30  ;;  %127 = vmatpush.msra.mxu0 %v1118_v32  ;;  %1921 = vst [vmem:[#allocation10_spill] sm:$0xff] %v1178_v42  ;;  %v1226_v50 = vld [vmem:[%s1879_s1 + $0x198] sm:$0xff]  ;;  %v1243_v53 = vld [vmem:[%s1879_s1 + $0x110] sm:$0xff]  ;;  %v1262_v56 = vld [vmem:[%s1879_s1 + $0x8] sm:$0xff] }
  0x13   :  { %155 = vmatpush.msra.mxu1 %v1111_v31  ;;  %185 = vmatpush.msra.mxu2 %v1123_v33  ;;  %1922 = vst [vmem:[#allocation11_spill] sm:$0xff] %v1183_v43  ;;  %v1231_v51 = vld [vmem:[%s1879_s1 + $0x98] sm:$0xff]  ;;  %v1250_v54 = vld [vmem:[%s1879_s1 + $0x190] sm:$0xff]  ;;  %v1267_v57 = vld [vmem:[%s1879_s1 + $0x108] sm:$0xff] }
  0x14   :  { %214 = vmatpush.msra.mxu3 %v1130_v34  ;;  %128 = vmatpush.msra.mxu0 %v1142_v36  ;;  %1923 = vst [vmem:[#allocation12_spill] sm:$0xff] %v1202_v46  ;;  %v1255_v55 = vld [vmem:[%s1879_s1 + $0x90] sm:$0xff]  ;;  %v1274_v58 = vld [vmem:[%s1879_s1 + $0x188] sm:$0xff]  ;;  %v1286_v60 = vld [vmem:[%s1879_s1] sm:$0xff] }
  0x15   :  { %156 = vmatpush.msra.mxu1 %v1135_v35  ;;  %186 = vmatpush.msra.mxu2 %v1147_v37  ;;  %1924 = vst [vmem:[#allocation13_spill] sm:$0xff] %v1226_v50  ;;  %v1279_v59 = vld [vmem:[%s1879_s1 + $0x88] sm:$0xff]  ;;  %v1291_v61 = vld [vmem:[%s1879_s1 + $0x100] sm:$0xff] }
  0x16   :  { %215 = vmatpush.msra.mxu3 %v1154_v38  ;;  %129 = vmatpush.msra.mxu0 %v1166_v40  ;;  %1925 = vst [vmem:[#allocation14_spill] sm:$0xff] %v1231_v51  ;;  %v1298_v62 = vld [vmem:[%s1879_s1 + $0x180] sm:$0xff] }
  0x17   :  { %157 = vmatpush.msra.mxu1 %v1159_v39  ;;  %187 = vmatpush.msra.mxu2 %v1171_v41  ;;  %1926 = vst [vmem:[#allocation15_spill] sm:$0xff] %v1250_v54  ;;  %v86_v63 = vld [vmem:[%s1880_s0] sm:$0xff] }
  0x18   :  { %216 = vmatpush.msra.mxu3 %v1178_v42  ;;  %130 = vmatpush.msra.mxu0 %v1190_v44  ;;  %1927 = vst [vmem:[#allocation16_spill] sm:$0xff] %v1255_v55  ;;  %v1325_v42 = vld [vmem:[%s1879_s1 + $0x238] sm:$0xff] }
  0x19   :  { %158 = vmatpush.msra.mxu1 %v1183_v43  ;;  %188 = vmatpush.msra.mxu2 %v1195_v45  ;;  %1928 = vst [vmem:[#allocation17_spill] sm:$0xff] %v1267_v57 }
  0x1a   :  { %217 = vmatpush.msra.mxu3 %v1202_v46  ;;  %131 = vmatpush.msra.mxu0 %v1214_v48  ;;  %1929 = vst [vmem:[#allocation18_spill] sm:$0xff] %v1274_v58  ;;  %v1316_v46 = vld [vmem:[%s1879_s1 + $0x80] sm:$0xff] }
  0x1b   :  { %159 = vmatpush.msra.mxu1 %v1207_v47  ;;  %189 = vmatpush.msra.mxu2 %v1219_v49  ;;  %1930 = vst [vmem:[#allocation19_spill] sm:$0xff] %v1279_v59 }
  0x1c   :  { %218 = vmatpush.msra.mxu3 %v1226_v50  ;;  %132 = vmatpush.msra.mxu0 %v1238_v52  ;;  %v89_v50 = vld [vmem:[%s1880_s0 + $0x18] sm:$0xff] }
  0x1d   :  { %160 = vmatpush.msra.mxu1 %v1231_v51  ;;  %190 = vmatpush.msra.mxu2 %v1243_v53 }
  0x1e   :  { %219 = vmatpush.msra.mxu3 %v1250_v54  ;;  %133 = vmatpush.msra.mxu0 %v1262_v56  ;;  %v88_v54 = vld [vmem:[%s1880_s0 + $0x10] sm:$0xff] }
  0x1f   :  { %161 = vmatpush.msra.mxu1 %v1255_v55  ;;  %191 = vmatpush.msra.mxu2 %v1267_v57 }
  0x20   :  { %220 = vmatpush.msra.mxu3 %v1274_v58  ;;  %134 = vmatpush.msra.mxu0 %v1286_v60  ;;  %v87_v58 = vld [vmem:[%s1880_s0 + $0x8] sm:$0xff] }
  0x21   :  { %162 = vmatpush.msra.mxu1 %v1279_v59  ;;  %192 = vmatpush.msra.mxu2 %v1291_v61 }
  0x22   :  { %221 = vmatpush.msra.mxu3 %v1298_v62  ;;  %135 = vmatmul.f32.vlgmr.msra.gmra.mxu0 %v86_v63  ;;  %v1333_v63 = vld [vmem:[%s1879_s1 + $0x230] sm:$0xff] }
  0x23   :  { %193 = vmatmul.f32.vlgmr.msra.gmra.mxu2 %v88_v54  ;;  %222 = vmatmul.f32.vlgmr.msra.gmra.mxu3 %v89_v50  ;;  %v91_v50 = vld [vmem:[%s1880_s0 + $0x28] sm:$0xff]  ;;  %v93_v54 = vld [vmem:[%s1880_s0 + $0x38] sm:$0xff] }
  0x24   :  { %326 = vmatpush.msrb.mxu2 %v952_v4  ;;  %163 = vmatpush.msra.mxu1 %v1316_v46 }
  0x25   :  { %355 = vmatpush.msrb.mxu3 %v935_v1  ;;  %164 = vmatmul.f32.vlgmr.msra.gmra.mxu1 %v87_v58  ;;  %v94_v58 = vld [vmem:[%s1880_s0 + $0x40] sm:$0xff] }
  0x26   :  { %243 = vmatpush.msrb.mxu0 %v1325_v42  ;;  %327 = vmatpush.msrb.mxu2 %v974_v8 }
  0x27   :  { %297 = vmatpush.msrb.mxu1 %v930_v0  ;;  %356 = vmatpush.msrb.mxu3 %v957_v5  ;;  %v92_v5 = vld [vmem:[%s1880_s0 + $0x30] sm:$0xff] }
  0x28   :  { %328 = vmatpush.msrb.mxu2 %v998_v12  ;;  %244 = vmatpush.msrb.mxu0 %v1333_v63 }
  0x29   :  { %298 = vmatpush.msrb.mxu1 %v947_v3  ;;  %357 = vmatpush.msrb.mxu3 %v981_v9  ;;  %v1361_v9 = vld [vmem:[%s1879_s1 + $0x228] sm:$0xff] }
  0x2a   :  { %329 = vmatpush.msrb.mxu2 %v1015_v15  ;;  %138 = vmatmul.f32.gmra.mxu0 %v91_v50  ;;  %v1369_v50 = vld [vmem:[%s1879_s1 + $0x220] sm:$0xff] }
  0x2b   :  { %299 = vmatpush.msrb.mxu1 %v969_v7  ;;  %358 = vmatpush.msrb.mxu3 %v1003_v13 }
  0x2c   :  { %196 = vmatmul.f32.gmra.mxu2 %v93_v54  ;;  %225 = vmatmul.f32.gmra.mxu3 %v94_v58  ;;  %v96_v54 = vld [vmem:[%s1880_s0 + $0x50] sm:$0xff]  ;;  %v99_v58 = vld [vmem:[%s1880_s0 + $0x68] sm:$0xff] }
  0x2d   :  { %330 = vmatpush.msrb.mxu2 %v1039_v19  ;;  %300 = vmatpush.msrb.mxu1 %v993_v11 }
  0x2e   :  { %359 = vmatpush.msrb.mxu3 %v1027_v17  ;;  %167 = vmatmul.f32.gmra.mxu1 %v92_v5  ;;  %v98_v5 = vld [vmem:[%s1880_s0 + $0x60] sm:$0xff] }
  0x2f   :  { %245 = vmatpush.msrb.mxu0 %v1361_v9  ;;  %331 = vmatpush.msrb.mxu2 %v1063_v23 }
  0x30   :  { %301 = vmatpush.msrb.mxu1 %v1022_v16  ;;  %360 = vmatpush.msrb.mxu3 %v1051_v21  ;;  %v97_v21 = vld [vmem:[%s1880_s0 + $0x58] sm:$0xff] }
  0x31   :  { %332 = vmatpush.msrb.mxu2 %v1087_v27  ;;  %246 = vmatpush.msrb.mxu0 %v1369_v50 }
  0x32   :  { %302 = vmatpush.msrb.mxu1 %v1046_v20  ;;  %361 = vmatpush.msrb.mxu3 %v1075_v25  ;;  %v1397_v25 = vld [vmem:[%s1879_s1 + $0x218] sm:$0xff] }
  0x33   :  { %333 = vmatpush.msrb.mxu2 %v1111_v31  ;;  %141 = vmatmul.f32.gmra.mxu0 %v96_v54  ;;  %v1405_v54 = vld [vmem:[%s1879_s1 + $0x210] sm:$0xff] }
  0x34   :  { %303 = vmatpush.msrb.mxu1 %v1070_v24  ;;  %362 = vmatpush.msrb.mxu3 %v1099_v29 }
  0x35   :  { %199 = vmatmul.f32.gmra.mxu2 %v98_v5  ;;  %228 = vmatmul.f32.gmra.mxu3 %v99_v58  ;;  %v101_v5 = vld [vmem:[%s1880_s0 + $0x78] sm:$0xff]  ;;  %v104_v58 = vld [vmem:[%s1880_s0 + $0x90] sm:$0xff] }
  0x36   :  { %334 = vmatpush.msrb.mxu2 %v1135_v35  ;;  %304 = vmatpush.msrb.mxu1 %v1094_v28 }
  0x37   :  { %363 = vmatpush.msrb.mxu3 %v1123_v33  ;;  %170 = vmatmul.f32.gmra.mxu1 %v97_v21  ;;  %v103_v21 = vld [vmem:[%s1880_s0 + $0x88] sm:$0xff] }
  0x38   :  { %247 = vmatpush.msrb.mxu0 %v1397_v25  ;;  %335 = vmatpush.msrb.mxu2 %v1159_v39 }
  0x39   :  { %305 = vmatpush.msrb.mxu1 %v1118_v32  ;;  %364 = vmatpush.msrb.mxu3 %v1147_v37  ;;  %v102_v37 = vld [vmem:[%s1880_s0 + $0x80] sm:$0xff] }
  0x3a   :  { %336 = vmatpush.msrb.mxu2 %v1183_v43  ;;  %248 = vmatpush.msrb.mxu0 %v1405_v54 }
  0x3b   :  { %306 = vmatpush.msrb.mxu1 %v1142_v36  ;;  %365 = vmatpush.msrb.mxu3 %v1171_v41  ;;  %v1433_v41 = vld [vmem:[%s1879_s1 + $0x208] sm:$0xff] }
  0x3c   :  { %337 = vmatpush.msrb.mxu2 %v1207_v47  ;;  %144 = vmatmul.f32.gmra.mxu0 %v101_v5  ;;  %v1441_v5 = vld [vmem:[%s1879_s1 + $0x200] sm:$0xff] }
  0x3d   :  { %307 = vmatpush.msrb.mxu1 %v1166_v40  ;;  %366 = vmatpush.msrb.mxu3 %v1195_v45 }
  0x3e   :  { %202 = vmatmul.f32.gmra.mxu2 %v103_v21  ;;  %231 = vmatmul.f32.gmra.mxu3 %v104_v58  ;;  %v90_v21 = vld [vmem:[%s1880_s0 + $0x20] sm:$0xff]  ;;  %v836_v58 = vld [vmem:[%s1880_s0 + $0xb0] sm:$0xff] }
  0x3f   :  { %338 = vmatpush.msrb.mxu2 %v1231_v51  ;;  %308 = vmatpush.msrb.mxu1 %v1190_v44 }
  0x40   :  { %367 = vmatpush.msrb.mxu3 %v1219_v49  ;;  %173 = vmatmul.f32.gmra.mxu1 %v102_v37  ;;  %v835_v37 = vld [vmem:[%s1880_s0 + $0xa8] sm:$0xff] }
  0x41   :  { %249 = vmatpush.msrb.mxu0 %v1433_v41  ;;  %339 = vmatpush.msrb.mxu2 %v1255_v55 }
  0x42   :  { %309 = vmatpush.msrb.mxu1 %v1214_v48  ;;  %368 = vmatpush.msrb.mxu3 %v1243_v53 }
  0x43   :  { %340 = vmatpush.msrb.mxu2 %v1279_v59  ;;  %250 = vmatpush.msrb.mxu0 %v1441_v5 }
  0x44   :  { %310 = vmatpush.msrb.mxu1 %v1238_v52  ;;  %369 = vmatpush.msrb.mxu3 %v1267_v57  ;;  %v834_v57 = vld [vmem:[%s1880_s0 + $0xa0] sm:$0xff] }
  0x45   :  { %341 = vmatpush.msrb.mxu2 %v1316_v46  ;;  %830 = vmatmul.msk.f32.vlgmr.msrb.gmra.mxu0 %vm106_vm0, %v90_v21  ;;  %v95_v21 = vld [vmem:[%s1880_s0 + $0x48] sm:$0xff] }
  0x46   :  { %311 = vmatpush.msrb.mxu1 %v1262_v56  ;;  %370 = vmatpush.msrb.mxu3 %v1291_v61 }
  0x47   :  { %342 = vmatmul.f32.vlgmr.msrb.gmra.mxu2 %v835_v37  ;;  %371 = vmatmul.f32.vlgmr.msrb.gmra.mxu3 %v836_v58  ;;  %v841_v37 = vld [vmem:[%s1880_s0 + $0xd8] sm:$0xff]  ;;  %v839_v58 = vld [vmem:[%s1880_s0 + $0xc8] sm:$0xff] }
  0x48   :  { %479 = vmatpush.msra.mxu2 %v930_v0  ;;  %312 = vmatpush.msrb.mxu1 %v1286_v60 }
  0x49   :  { %384 = vmatpush.msra.mxu0 %v940_v2  ;;  %508 = vmatpush.msra.mxu3 %v952_v4 }
  0x4a   :  { %313 = vmatmul.f32.vlgmr.msrb.gmra.mxu1 %v834_v57  ;;  %480 = vmatpush.msra.mxu2 %v947_v3  ;;  %v840_v57 = vld [vmem:[%s1880_s0 + $0xd0] sm:$0xff] }
  0x4b   :  { %385 = vmatpush.msra.mxu0 %v964_v6  ;;  %509 = vmatpush.msra.mxu3 %v974_v8 }
  0x4c   :  { %421 = vmatpush.msra.mxu1 %v1325_v42  ;;  %481 = vmatpush.msra.mxu2 %v969_v7 }
  0x4d   :  { %386 = vmatpush.msra.mxu0 %v986_v10  ;;  %510 = vmatpush.msra.mxu3 %v998_v12 }
  0x4e   :  { %482 = vmatpush.msra.mxu2 %v993_v11  ;;  %831 = vmatmul.msk.f32.gmra.mxu0 %vm106_vm0, %v95_v21  ;;  %v100_v21 = vld [vmem:[%s1880_s0 + $0x70] sm:$0xff] }
  0x4f   :  { %387 = vmatpush.msra.mxu0 %v1010_v14  ;;  %511 = vmatpush.msra.mxu3 %v1015_v15 }
  0x50   :  { %345 = vmatmul.f32.gmra.mxu2 %v840_v57  ;;  %374 = vmatmul.f32.gmra.mxu3 %v841_v37  ;;  %v845_v57 = vld [vmem:[%s1880_s0 + $0xf8] sm:$0xff]  ;;  %v846_v37 = vld [vmem:[%s1880_s0 + $0x100] sm:$0xff] }
  0x51   :  { %422 = vmatpush.msra.mxu1 %v1333_v63  ;;  %483 = vmatpush.msra.mxu2 %v1022_v16 }
  0x52   :  { %388 = vmatpush.msra.mxu0 %v1034_v18  ;;  %512 = vmatpush.msra.mxu3 %v1039_v19 }
  0x53   :  { %316 = vmatmul.f32.gmra.mxu1 %v839_v58  ;;  %484 = vmatpush.msra.mxu2 %v1046_v20  ;;  %v844_v58 = vld [vmem:[%s1880_s0 + $0xf0] sm:$0xff] }
  0x54   :  { %389 = vmatpush.msra.mxu0 %v1058_v22  ;;  %513 = vmatpush.msra.mxu3 %v1063_v23 }
  0x55   :  { %423 = vmatpush.msra.mxu1 %v1361_v9  ;;  %485 = vmatpush.msra.mxu2 %v1070_v24 }
  0x56   :  { %390 = vmatpush.msra.mxu0 %v1082_v26  ;;  %514 = vmatpush.msra.mxu3 %v1087_v27 }
  0x57   :  { %486 = vmatpush.msra.mxu2 %v1094_v28  ;;  %832 = vmatmul.msk.f32.gmra.mxu0 %vm106_vm0, %v100_v21  ;;  %v105_v21 = vld [vmem:[%s1880_s0 + $0x98] sm:$0xff] }
  0x58   :  { %391 = vmatpush.msra.mxu0 %v1106_v30  ;;  %515 = vmatpush.msra.mxu3 %v1111_v31 }
  0x59   :  { %348 = vmatmul.f32.gmra.mxu2 %v845_v57  ;;  %377 = vmatmul.f32.gmra.mxu3 %v846_v37  ;;  %v1931_v57 = vld [vmem:[#allocation10_spill] sm:$0xff] }
  0x5a   :  { %424 = vmatpush.msra.mxu1 %v1369_v50  ;;  %487 = vmatpush.msra.mxu2 %v1118_v32  ;;  %v850_v37 = vld [vmem:[%s1880_s0 + $0x120] sm:$0xff] }
  0x5b   :  { %392 = vmatpush.msra.mxu0 %v1130_v34  ;;  %516 = vmatpush.msra.mxu3 %v1135_v35  ;;  %v1933_v35 = vld [vmem:[#allocation13_spill] sm:$0xff] }
  0x5c   :  { %319 = vmatmul.f32.gmra.mxu1 %v844_v58  ;;  %488 = vmatpush.msra.mxu2 %v1142_v36  ;;  %v851_v58 = vld [vmem:[%s1880_s0 + $0x128] sm:$0xff] }
  0x5d   :  { %393 = vmatpush.msra.mxu0 %v1154_v38  ;;  %517 = vmatpush.msra.mxu3 %v1159_v39  ;;  %v1932_v39 = vld [vmem:[#allocation12_spill] sm:$0xff] }
  0x5e   :  { %425 = vmatpush.msra.mxu1 %v1397_v25  ;;  %489 = vmatpush.msra.mxu2 %v1166_v40 }
  0x5f   :  { %394 = vmatpush.msra.mxu0 %v1931_v57  ;;  %518 = vmatpush.msra.mxu3 %v1183_v43  ;;  %v849_v43 = vld [vmem:[%s1880_s0 + $0x118] sm:$0xff] }
  0x60   :  { %490 = vmatpush.msra.mxu2 %v1190_v44  ;;  %833 = vmatmul.msk.f32.gmra.mxu0 %vm106_vm0, %v105_v21  ;;  %v1934_v21 = vld [vmem:[#allocation15_spill] sm:$0xff] }
  0x61   :  { %395 = vmatpush.msra.mxu0 %v1932_v39  ;;  %519 = vmatpush.msra.mxu3 %v1207_v47 }
  0x62   :  { %351 = vmatmul.f32.gmra.mxu2 %v850_v37  ;;  %380 = vmatmul.f32.gmra.mxu3 %v851_v58  ;;  %v1935_v37 = vld [vmem:[#allocation18_spill] sm:$0xff]  ;;  %v837_v58 = vld [vmem:[%s1880_s0 + $0xb8] sm:$0xff] }
  0x63   :  { %426 = vmatpush.msra.mxu1 %v1405_v54  ;;  %491 = vmatpush.msra.mxu2 %v1214_v48 }
  0x64   :  { %396 = vmatpush.msra.mxu0 %v1933_v35  ;;  %520 = vmatpush.msra.mxu3 %v1231_v51  ;;  %v1936_v51 = vld [vmem:[#allocation2_spill] sm:$0xff] }
  0x65   :  { %322 = vmatmul.f32.gmra.mxu1 %v849_v43  ;;  %492 = vmatpush.msra.mxu2 %v1238_v52  ;;  %v858_v43 = vld [vmem:[%s1880_s0 + $0x140] sm:$0xff] }
  0x66   :  { %397 = vmatpush.msra.mxu0 %v1934_v21  ;;  %521 = vmatpush.msra.mxu3 %v1255_v55  ;;  %v859_v55 = vld [vmem:[%s1880_s0 + $0x148] sm:$0xff] }
  0x67   :  { %427 = vmatpush.msra.mxu1 %v1433_v41  ;;  %493 = vmatpush.msra.mxu2 %v1262_v56 }
  0x68   :  { %398 = vmatpush.msra.mxu0 %v1935_v37  ;;  %522 = vmatpush.msra.mxu3 %v1279_v59  ;;  %v838_v59 = vld [vmem:[%s1880_s0 + $0xc0] sm:$0xff] }
  0x69   :  { %494 = vmatpush.msra.mxu2 %v1286_v60  ;;  %428 = vmatpush.msra.mxu1 %v1441_v5 }
  0x6a   :  { %399 = vmatpush.msra.mxu0 %v1298_v62  ;;  %523 = vmatpush.msra.mxu3 %v1316_v46 }
  0x6b   :  { %400 = vmatmul.f32.vlgmr.msra.gmra.mxu0 %v837_v58  ;;  %495 = vmatmul.f32.vlgmr.msra.gmra.mxu2 %v858_v43  ;;  %v1937_v58 = vld [vmem:[#allocation3_spill] sm:$0xff]  ;;  %v868_v43 = vld [vmem:[%s1880_s0 + $0x190] sm:$0xff] }
  0x6c   :  { %524 = vmatmul.f32.vlgmr.msra.gmra.mxu3 %v859_v55  ;;  %603 = vmatpush.msrb.mxu2 %v1325_v42  ;;  %v863_v55 = vld [vmem:[%s1880_s0 + $0x168] sm:$0xff] }
  0x6d   :  { %537 = vmatpush.msrb.mxu0 %v935_v1  ;;  %854 = vmatmul.msk.f32.vlgmr.msra.gmra.mxu1 %vm106_vm0, %v838_v59  ;;  %v864_v59 = vld [vmem:[%s1880_s0 + $0x170] sm:$0xff] }
  0x6e   :  { %661 = vmatpush.msrb.mxu3 %v930_v0  ;;  %566 = vmatpush.msrb.mxu1 %v940_v2  ;;  %v842_v0 = vld [vmem:[%s1880_s0 + $0xe0] sm:$0xff] }
  0x6f   :  { %538 = vmatpush.msrb.mxu0 %v1936_v51  ;;  %604 = vmatpush.msrb.mxu2 %v1333_v63 }
  0x70   :  { %662 = vmatpush.msrb.mxu3 %v947_v3  ;;  %567 = vmatpush.msrb.mxu1 %v964_v6  ;;  %v843_v3 = vld [vmem:[%s1880_s0 + $0xe8] sm:$0xff] }
  0x71   :  { %539 = vmatpush.msrb.mxu0 %v1937_v58  ;;  %605 = vmatpush.msrb.mxu2 %v1361_v9 }
  0x72   :  { %663 = vmatpush.msrb.mxu3 %v969_v7  ;;  %568 = vmatpush.msrb.mxu1 %v986_v10  ;;  %v1938_v7 = vld [vmem:[#allocation4_spill] sm:$0xff] }
  0x73   :  { %540 = vmatpush.msrb.mxu0 %v1003_v13  ;;  %498 = vmatmul.f32.gmra.mxu2 %v863_v55  ;;  %v869_v55 = vld [vmem:[%s1880_s0 + $0x198] sm:$0xff] }
  0x74   :  { %403 = vmatmul.f32.gmra.mxu0 %v842_v0  ;;  %527 = vmatmul.f32.gmra.mxu3 %v864_v59  ;;  %v873_v0 = vld [vmem:[%s1880_s0 + $0x1b8] sm:$0xff]  ;;  %v874_v59 = vld [vmem:[%s1880_s0 + $0x1c0] sm:$0xff] }
  0x75   :  { %664 = vmatpush.msrb.mxu3 %v993_v11  ;;  %541 = vmatpush.msrb.mxu0 %v1027_v17  ;;  %v1939_v11 = vld [vmem:[#allocation5_spill] sm:$0xff] }
  0x76   :  { %569 = vmatpush.msrb.mxu1 %v1010_v14  ;;  %606 = vmatpush.msrb.mxu2 %v1369_v50 }
  0x77   :  { %855 = vmatmul.msk.f32.gmra.mxu1 %vm106_vm0, %v843_v3  ;;  %665 = vmatpush.msrb.mxu3 %v1022_v16  ;;  %v847_v16 = vld [vmem:[%s1880_s0 + $0x108] sm:$0xff]  ;;  %v889_v3 = vld [vmem:[%s1880_s0 + $0x218] sm:$0xff] }
  0x78   :  { %542 = vmatpush.msrb.mxu0 %v1938_v7  ;;  %570 = vmatpush.msrb.mxu1 %v1034_v18 }
  0x79   :  { %666 = vmatpush.msrb.mxu3 %v1046_v20  ;;  %607 = vmatpush.msrb.mxu2 %v1397_v25  ;;  %v848_v20 = vld [vmem:[%s1880_s0 + $0x110] sm:$0xff] }
  0x7a   :  { %543 = vmatpush.msrb.mxu0 %v1939_v11  ;;  %571 = vmatpush.msrb.mxu1 %v1058_v22 }
  0x7b   :  { %667 = vmatpush.msrb.mxu3 %v1070_v24  ;;  %501 = vmatmul.f32.gmra.mxu2 %v868_v43  ;;  %v1940_v24 = vld [vmem:[#allocation7_spill] sm:$0xff] }
  0x7c   :  { %544 = vmatpush.msrb.mxu0 %v1099_v29  ;;  %572 = vmatpush.msrb.mxu1 %v1082_v26 }
  0x7d   :  { %406 = vmatmul.f32.gmra.mxu0 %v847_v16  ;;  %530 = vmatmul.f32.gmra.mxu3 %v869_v55  ;;  %v893_v16 = vld [vmem:[%s1880_s0 + $0x238] sm:$0xff]  ;;  %v895_v55 = vld [vmem:[%s1880_s0 + $0x248] sm:$0xff] }
  0x7e   :  { %668 = vmatpush.msrb.mxu3 %v1094_v28  ;;  %545 = vmatpush.msrb.mxu0 %v1123_v33  ;;  %v1941_v28 = vld [vmem:[#allocation9_spill] sm:$0xff] }
  0x7f   :  { %573 = vmatpush.msrb.mxu1 %v1106_v30  ;;  %608 = vmatpush.msrb.mxu2 %v1405_v54 }
  0x80   :  { %856 = vmatmul.msk.f32.gmra.mxu1 %vm106_vm0, %v848_v20  ;;  %669 = vmatpush.msrb.mxu3 %v1118_v32  ;;  %v852_v32 = vld [vmem:[%s1880_s0 + $0x130] sm:$0xff] }
  0x81   :  { %546 = vmatpush.msrb.mxu0 %v1940_v24  ;;  %574 = vmatpush.msrb.mxu1 %v1130_v34  ;;  %v896_v20 = vld [vmem:[%s1880_s0 + $0x250] sm:$0xff] }
  0x82   :  { %670 = vmatpush.msrb.mxu3 %v1142_v36  ;;  %609 = vmatpush.msrb.mxu2 %v1433_v41  ;;  %v853_v36 = vld [vmem:[%s1880_s0 + $0x138] sm:$0xff] }
  0x83   :  { %547 = vmatpush.msrb.mxu0 %v1941_v28  ;;  %575 = vmatpush.msrb.mxu1 %v1154_v38 }
  0x84   :  { %671 = vmatpush.msrb.mxu3 %v1166_v40  ;;  %504 = vmatmul.f32.gmra.mxu2 %v873_v0  ;;  %v862_v40 = vld [vmem:[%s1880_s0 + $0x160] sm:$0xff] }
  0x85   :  { %548 = vmatpush.msrb.mxu0 %v1195_v45  ;;  %576 = vmatpush.msrb.mxu1 %v1931_v57 }
  0x86   :  { %409 = vmatmul.f32.gmra.mxu0 %v852_v32  ;;  %533 = vmatmul.f32.gmra.mxu3 %v874_v59 }
  0x87   :  { %672 = vmatpush.msrb.mxu3 %v1190_v44  ;;  %549 = vmatpush.msrb.mxu0 %v1219_v49  ;;  %v1942_v44 = vld [vmem:[#allocation17_spill] sm:$0xff] }
  0x88   :  { %577 = vmatpush.msrb.mxu1 %v1932_v39  ;;  %610 = vmatpush.msrb.mxu2 %v1441_v5 }
  0x89   :  { %857 = vmatmul.msk.f32.gmra.mxu1 %vm106_vm0, %v853_v36  ;;  %673 = vmatpush.msrb.mxu3 %v1214_v48  ;;  %v860_v48 = vld [vmem:[%s1880_s0 + $0x150] sm:$0xff] }
  0x8a   :  { %550 = vmatpush.msrb.mxu0 %v1243_v53  ;;  %578 = vmatpush.msrb.mxu1 %v1933_v35 }
  0x8b   :  { %674 = vmatpush.msrb.mxu3 %v1238_v52  ;;  %748 = vmatpush.msra.mxu2 %v940_v2  ;;  %v861_v2 = vld [vmem:[%s1880_s0 + $0x158] sm:$0xff]  ;;  %v882_v52 = vld [vmem:[%s1880_s0 + $0x1e0] sm:$0xff] }
  0x8c   :  { %551 = vmatpush.msrb.mxu0 %v1942_v44  ;;  %579 = vmatpush.msrb.mxu1 %v1934_v21 }
  0x8d   :  { %675 = vmatpush.msrb.mxu3 %v1262_v56  ;;  %878 = vmatmul.msk.f32.vlgmr.msrb.gmra.mxu2 %vm106_vm0, %v862_v40  ;;  %v885_v56 = vld [vmem:[%s1880_s0 + $0x1f8] sm:$0xff] }
  0x8e   :  { %552 = vmatpush.msrb.mxu0 %v1291_v61  ;;  %580 = vmatpush.msrb.mxu1 %v1935_v37 }
  0x8f   :  { %553 = vmatmul.f32.vlgmr.msrb.gmra.mxu0 %v860_v48  ;;  %676 = vmatpush.msrb.mxu3 %v1286_v60  ;;  %v898_v48 = vld [vmem:[%s1880_s0 + $0x260] sm:$0xff] }
  0x90   :  { %581 = vmatpush.msrb.mxu1 %v1298_v62  ;;  %690 = vmatpush.msra.mxu0 %v952_v4  ;;  %v865_v4 = vld [vmem:[%s1880_s0 + $0x178] sm:$0xff] }
  0x91   :  { %582 = vmatmul.f32.vlgmr.msrb.gmra.mxu1 %v861_v2  ;;  %677 = vmatmul.f32.vlgmr.msrb.gmra.mxu3 %v882_v52  ;;  %v900_v2 = vld [vmem:[%s1880_s0 + $0x270] sm:$0xff]  ;;  %v901_v52 = vld [vmem:[%s1880_s0 + $0x278] sm:$0xff] }
  0x92   :  { %749 = vmatpush.msra.mxu2 %v964_v6  ;;  %785 = vmatpush.msra.mxu3 %v1325_v42  ;;  %v867_v6 = vld [vmem:[%s1880_s0 + $0x188] sm:$0xff]  ;;  %v1947_v42 = vld [vmem:[#allocation16_spill] sm:$0xff] }
  0x93   :  { %691 = vmatpush.msra.mxu0 %v974_v8  ;;  %719 = vmatpush.msra.mxu1 %v935_v1  ;;  %v887_v1 = vld [vmem:[%s1880_s0 + $0x208] sm:$0xff]  ;;  %v866_v8 = vld [vmem:[%s1880_s0 + $0x180] sm:$0xff] }
  0x94   :  { %750 = vmatpush.msra.mxu2 %v986_v10  ;;  %786 = vmatpush.msra.mxu3 %v1333_v63  ;;  %v872_v10 = vld [vmem:[%s1880_s0 + $0x1b0] sm:$0xff]  ;;  %v886_v63 = vld [vmem:[%s1880_s0 + $0x200] sm:$0xff] }
  0x95   :  { %692 = vmatpush.msra.mxu0 %v998_v12  ;;  %720 = vmatpush.msra.mxu1 %v1936_v51  ;;  %v1948_v51 = vld [vmem:[#allocation19_spill] sm:$0xff] }
  0x96   :  { %751 = vmatpush.msra.mxu2 %v1010_v14  ;;  %787 = vmatpush.msra.mxu3 %v1361_v9  ;;  %v870_v9 = vld [vmem:[%s1880_s0 + $0x1a0] sm:$0xff]  ;;  %v871_v14 = vld [vmem:[%s1880_s0 + $0x1a8] sm:$0xff] }
  0x97   :  { %693 = vmatpush.msra.mxu0 %v1015_v15  ;;  %721 = vmatpush.msra.mxu1 %v1937_v58  ;;  %v1943_v15 = vld [vmem:[#allocation6_spill] sm:$0xff] }
  0x98   :  { %556 = vmatmul.f32.gmra.mxu0 %v865_v4  ;;  %879 = vmatmul.msk.f32.gmra.mxu2 %vm106_vm0, %v867_v6  ;;  %v899_v4 = vld [vmem:[%s1880_s0 + $0x268] sm:$0xff] }
  0x99   :  { %752 = vmatpush.msra.mxu2 %v1034_v18  ;;  %694 = vmatpush.msra.mxu0 %v1039_v19  ;;  %v1944_v19 = vld [vmem:[#allocation8_spill] sm:$0xff] }
  0x9a   :  { %722 = vmatpush.msra.mxu1 %v1003_v13  ;;  %680 = vmatmul.f32.gmra.mxu3 %v887_v1  ;;  %v892_v13 = vld [vmem:[%s1880_s0 + $0x230] sm:$0xff] }
  0x9b   :  { %585 = vmatmul.f32.gmra.mxu1 %v866_v8  ;;  %753 = vmatpush.msra.mxu2 %v1058_v22 }
  0x9c   :  { %695 = vmatpush.msra.mxu0 %v1063_v23  ;;  %723 = vmatpush.msra.mxu1 %v1027_v17 }
  0x9d   :  { %754 = vmatpush.msra.mxu2 %v1082_v26  ;;  %788 = vmatpush.msra.mxu3 %v1369_v50  ;;  %v875_v26 = vld [vmem:[%s1880_s0 + $0x1c8] sm:$0xff] }
  0x9e   :  { %696 = vmatpush.msra.mxu0 %v1087_v27  ;;  %724 = vmatpush.msra.mxu1 %v1938_v7  ;;  %v877_v27 = vld [vmem:[%s1880_s0 + $0x1d8] sm:$0xff] }
  0x9f   :  { %755 = vmatpush.msra.mxu2 %v1106_v30  ;;  %789 = vmatpush.msra.mxu3 %v1397_v25  ;;  %v136_v12 = vpop.f32.mrf.mxu0  ;;  %v1945_v25 = vld [vmem:[#allocation11_spill] sm:$0xff] }
  0xa0   :  { %697 = vmatpush.msra.mxu0 %v1111_v31  ;;  %725 = vmatpush.msra.mxu1 %v1939_v11  ;;  %v897_v31 = vld [vmem:[%s1880_s0 + $0x258] sm:$0xff] }
  0xa1   :  { %559 = vmatmul.f32.gmra.mxu0 %v870_v9  ;;  %880 = vmatmul.msk.f32.gmra.mxu2 %vm106_vm0, %v872_v10 }
  0xa2   :  { %756 = vmatpush.msra.mxu2 %v1130_v34  ;;  %698 = vmatpush.msra.mxu0 %v1943_v15  ;;  %v165_v17 = vpop.f32.mrf.mxu1  ;;  %v876_v34 = vld [vmem:[%s1880_s0 + $0x1d0] sm:$0xff] }
  0xa3   :  { %726 = vmatpush.msra.mxu1 %v1099_v29  ;;  %683 = vmatmul.f32.gmra.mxu3 %v892_v13  ;;  %v166_v18 = vadd.f32 %v165_v17, %v136_v12 }
  0xa4   :  { %588 = vmatmul.f32.gmra.mxu1 %v871_v14  ;;  %757 = vmatpush.msra.mxu2 %v1154_v38  ;;  %v1946_v38 = vld [vmem:[#allocation14_spill] sm:$0xff] }
  0xa5   :  { %699 = vmatpush.msra.mxu0 %v1944_v19  ;;  %727 = vmatpush.msra.mxu1 %v1123_v33 }
  0xa6   :  { %758 = vmatpush.msra.mxu2 %v1931_v57  ;;  %790 = vmatpush.msra.mxu3 %v1405_v54  ;;  %v194_v22 = vpop.f32.mrf.mxu2  ;;  %v223_v23 = vpop.f32.mrf.mxu3 }
  0xa7   :  { %700 = vmatpush.msra.mxu0 %v1945_v25  ;;  %728 = vmatpush.msra.mxu1 %v1940_v24  ;;  %v195_v29 = vadd.f32 %v194_v22, %v166_v18  ;;  %v139_v30 = vpop.f32.mrf.mxu0 }
  0xa8   :  { %759 = vmatpush.msra.mxu2 %v1932_v39  ;;  %791 = vmatpush.msra.mxu3 %v1433_v41 }
  0xa9   :  { %701 = vmatpush.msra.mxu0 %v1207_v47  ;;  %729 = vmatpush.msra.mxu1 %v1941_v28  ;;  %v1761_v33 = vadd.f32 %v223_v23, %v195_v29  ;;  %v894_v28 = vld [vmem:[%s1880_s0 + $0x240] sm:$0xff] }
  0xaa   :  { %562 = vmatmul.f32.gmra.mxu0 %v875_v26  ;;  %881 = vmatmul.msk.f32.gmra.mxu2 %vm106_vm0, %v877_v27 }
  0xab   :  { %760 = vmatpush.msra.mxu2 %v1933_v35  ;;  %702 = vmatpush.msra.mxu0 %v1946_v38  ;;  %v168_v39 = vpop.f32.mrf.mxu1 }
  0xac   :  { %730 = vmatpush.msra.mxu1 %v1195_v45  ;;  %686 = vmatmul.f32.gmra.mxu3 %v897_v31  ;;  %v169_v41 = vadd.f32 %v168_v39, %v139_v30  ;;  %v883_v45 = vld [vmem:[%s1880_s0 + $0x1e8] sm:$0xff] }
  0xad   :  { %591 = vmatmul.f32.gmra.mxu1 %v876_v34  ;;  %761 = vmatpush.msra.mxu2 %v1934_v21 }
  0xae   :  { %703 = vmatpush.msra.mxu0 %v1947_v42  ;;  %731 = vmatpush.msra.mxu1 %v1219_v49 }
  0xaf   :  { %762 = vmatpush.msra.mxu2 %v1935_v37  ;;  %792 = vmatpush.msra.mxu3 %v1441_v5  ;;  %v197_v47 = vpop.f32.mrf.mxu2  ;;  %v226_v35 = vpop.f32.mrf.mxu3  ;;  %v890_v5 = vld [vmem:[%s1880_s0 + $0x220] sm:$0xff]  ;;  %v891_v37 = vld [vmem:[%s1880_s0 + $0x228] sm:$0xff] }
  0xb0   :  { %704 = vmatpush.msra.mxu0 %v1948_v51  ;;  %732 = vmatpush.msra.mxu1 %v1243_v53  ;;  %v198_v60 = vadd.f32 %v197_v47, %v169_v41  ;;  %v142_v49 = vpop.f32.mrf.mxu0  ;;  %v884_v53 = vld [vmem:[%s1880_s0 + $0x1f0] sm:$0xff] }
  0xb1   :  { %763 = vmatpush.msra.mxu2 %v1298_v62 }
  0xb2   :  { %705 = vmatpush.msra.mxu0 %v1316_v46  ;;  %733 = vmatpush.msra.mxu1 %v1942_v44  ;;  %v227_v50 = vadd.f32 %v226_v35, %v198_v60  ;;  %v888_v46 = vld [vmem:[%s1880_s0 + $0x210] sm:$0xff] }
  0xb3   :  { %706 = vmatmul.f32.vlgmr.msra.gmra.mxu0 %v883_v45  ;;  %764 = vmatmul.f32.vlgmr.msra.gmra.mxu2 %v885_v56 }
  0xb4   :  { %734 = vmatpush.msra.mxu1 %v1291_v61  ;;  %902 = vmatmul.msk.f32.vlgmr.msra.gmra.mxu3 %vm106_vm0, %v886_v63  ;;  %v171_v62 = vpop.f32.mrf.mxu1 }
  0xb5   :  { %735 = vmatmul.f32.vlgmr.msra.gmra.mxu1 %v884_v53  ;;  %v172_v54 = vadd.f32 %v171_v62, %v142_v49 }
  0xb8   :  { %v200_v57 = vpop.f32.mrf.mxu2  ;;  %v229_v21 = vpop.f32.mrf.mxu3 }
  0xb9   :  { %v201_v61 = vadd.f32 %v200_v57, %v172_v54  ;;  %v145_v58 = vpop.f32.mrf.mxu0 }
  0xbb   :  { %709 = vmatmul.f32.gmra.mxu0 %v888_v46  ;;  %767 = vmatmul.f32.gmra.mxu2 %v890_v5  ;;  %v230_v7 = vadd.f32 %v229_v21, %v201_v61 }
  0xbc   :  { %903 = vmatmul.msk.f32.gmra.mxu3 %vm106_vm0, %v891_v37 }
  0xbd   :  { %738 = vmatmul.f32.gmra.mxu1 %v889_v3  ;;  %v174_v43 = vpop.f32.mrf.mxu1 }
  0xbe   :  { %v175_v11 = vadd.f32 %v174_v43, %v145_v58 }
  0xc1   :  { %v203_v24 = vpop.f32.mrf.mxu2  ;;  %v232_v0 = vpop.f32.mrf.mxu3 }
  0xc2   :  { %v204_v32 = vadd.f32 %v203_v24, %v175_v11  ;;  %v252_v59 = vpop.f32.mrf.mxu0 }
  0xc3   :  { %712 = vmatmul.f32.gmra.mxu0 %v893_v16  ;;  %770 = vmatmul.f32.gmra.mxu2 %v895_v55  ;;  %v1820_v36 = vadd.f32 %v252_v59, %v1761_v33 }
  0xc4   :  { %904 = vmatmul.msk.f32.gmra.mxu3 %vm106_vm0, %v896_v20  ;;  %v233_v40 = vadd.f32 %v232_v0, %v204_v32 }
  0xc5   :  { %741 = vmatmul.f32.gmra.mxu1 %v894_v28 }
  0xc7   :  { %v314_v44 = vpop.f32.mrf.mxu1 }
  0xca   :  { %v343_v6 = vpop.f32.mrf.mxu2  ;;  %v372_v1 = vpop.f32.mrf.mxu3 }
  0xcb   :  { %715 = vmatmul.f32.gmra.mxu0 %v898_v48  ;;  %773 = vmatmul.f32.gmra.mxu2 %v900_v2  ;;  %v344_v8 = vadd.f32 %v343_v6, %v314_v44  ;;  %v255_v9 = vpop.f32.mrf.mxu0 }
  0xcc   :  { %905 = vmatmul.msk.f32.gmra.mxu3 %vm106_vm0, %v901_v52  ;;  %v1836_v10 = vadd.f32 %v255_v9, %v227_v50 }
  0xcd   :  { %744 = vmatmul.f32.gmra.mxu1 %v899_v4  ;;  %v373_v12 = vadd.f32 %v372_v1, %v344_v8 }
  0xd0   :  { %v317_v13 = vpop.f32.mrf.mxu1 }
  0xd3   :  { %v346_v14 = vpop.f32.mrf.mxu2  ;;  %v375_v15 = vpop.f32.mrf.mxu3 }
  0xd4   :  { %v347_v17 = vadd.f32 %v346_v14, %v317_v13  ;;  %v258_v18 = vpop.f32.mrf.mxu0 }
  0xd5   :  { %v1838_v19 = vadd.f32 %v258_v18, %v230_v7 }
  0xd6   :  { %v376_v22 = vadd.f32 %v375_v15, %v347_v17 }
  0xd9   :  { %v320_v23 = vpop.f32.mrf.mxu1 }
  0xdc   :  { %v349_v25 = vpop.f32.mrf.mxu2  ;;  %v378_v26 = vpop.f32.mrf.mxu3 }
  0xdd   :  { %v350_v27 = vadd.f32 %v349_v25, %v320_v23  ;;  %v261_v29 = vpop.f32.mrf.mxu0 }
  0xde   :  { %v1840_v30 = vadd.f32 %v261_v29, %v233_v40 }
  0xdf   :  { %v379_v31 = vadd.f32 %v378_v26, %v350_v27 }
  0xe2   :  { %v323_v33 = vpop.f32.mrf.mxu1 }
  0xe5   :  { %v352_v34 = vpop.f32.mrf.mxu2  ;;  %v381_v38 = vpop.f32.mrf.mxu3 }
  0xe6   :  { %v353_v39 = vadd.f32 %v352_v34, %v323_v33 }
  0xe8   :  { %v382_v41 = vadd.f32 %v381_v38, %v353_v39  ;;  %v401_v42 = vpop.f32.mrf.mxu0 }
  0xe9   :  { %v402_v47 = vadd.f32 %v401_v42, %v373_v12  ;;  %v906_v42 = vld [vmem:[%s1881_s2] ss:$0 sm:$0xff] }
  0xea   :  { %v430_v35 = vpop.f32.mrf.mxu1 }
  0xeb   :  { %v431_v51 = vadd.f32 %v430_v35, %v402_v47 }
  0xed   :  { %v442_v45 = vmax.f32 %v1820_v36, %v431_v51 }
  0xee   :  { %v496_v56 = vpop.f32.mrf.mxu2 }
  0xef   :  { %v525_v60 = vpop.f32.mrf.mxu3 }
  0xf0   :  { %v526_v9 = vadd.f32 %v525_v60, %v496_v56 }
  0xf1   :  { %v404_v49 = vpop.f32.mrf.mxu0 }
  0xf2   :  { %v405_v63 = vadd.f32 %v404_v49, %v376_v22 }
  0xf4   :  { %v433_v53 = vpop.f32.mrf.mxu1 }
  0xf5   :  { %v1843_v50 = vadd.f32 %v433_v53, %v405_v63 }
  0xf6   :  { %v499_v62 = vpop.f32.mrf.mxu2 }
  0xf7   :  { %v443_v54 = vmax.f32 %v1836_v10, %v1843_v50  ;;  %v528_v46 = vpop.f32.mrf.mxu3 }
  0xf8   :  { %v529_v23 = vadd.f32 %v528_v46, %v499_v62 }
  0xfa   :  { %v407_v5 = vpop.f32.mrf.mxu0 }
  0xfb   :  { %v408_v57 = vadd.f32 %v407_v5, %v379_v31 }
  0xfd   :  { %v436_v21 = vpop.f32.mrf.mxu1 }
  0xfe   :  { %v1847_v37 = vadd.f32 %v436_v21, %v408_v57  ;;  %v502_v61 = vpop.f32.mrf.mxu2 }
 0x100   :  { %v444_v58 = vmax.f32 %v1838_v19, %v1847_v37  ;;  %v531_v3 = vpop.f32.mrf.mxu3 }
 0x101   :  { %v532_v56 = vadd.f32 %v531_v3, %v502_v61 }
 0x103   :  { %v410_v7 = vpop.f32.mrf.mxu0 }
 0x104   :  { %v411_v43 = vadd.f32 %v410_v7, %v382_v41 }
 0x106   :  { %v439_v11 = vpop.f32.mrf.mxu1 }
 0x107   :  { %v1851_v16 = vadd.f32 %v439_v11, %v411_v43  ;;  %v505_v55 = vpop.f32.mrf.mxu2 }
 0x109   :  { %v445_v20 = vmax.f32 %v1840_v30, %v1851_v16  ;;  %v534_v24 = vpop.f32.mrf.mxu3 }
 0x10c   :  { %v554_v0 = vpop.f32.mrf.mxu0 }
 0x10d   :  { %v555_v13 = vadd.f32 %v554_v0, %v526_v9  ;;  %v535_v0 = vadd.f32 %v534_v24, %v505_v55 }
 0x10e   :  { %v583_v28 = vpop.f32.mrf.mxu1 }
 0x10f   :  { %v584_v22 = vadd.f32 %v583_v28, %v555_v13 }
 0x110   :  { %v612_v32 = vpop.f32.mrf.mxu2 }
 0x111   :  { %v613_v25 = vadd.f32 %v612_v32, %v584_v22 }
 0x113   :  { %v624_v38 = vmax.f32 %v442_v45, %v613_v25 }
 0x114   :  { %v678_v59 = vpop.f32.mrf.mxu3 }
 0x115   :  { %v557_v36 = vpop.f32.mrf.mxu0 }
 0x116   :  { %v558_v29 = vadd.f32 %v557_v36, %v529_v23 }
 0x118   :  { %v586_v40 = vpop.f32.mrf.mxu1 }
 0x119   :  { %v587_v35 = vadd.f32 %v586_v40, %v558_v29 }
 0x11b   :  { %v615_v44 = vpop.f32.mrf.mxu2 }
 0x11c   :  { %v616_v60 = vadd.f32 %v615_v44, %v587_v35 }
 0x11d   :  { %v681_v48 = vpop.f32.mrf.mxu3 }
 0x11e   :  { %v560_v2 = vpop.f32.mrf.mxu0  ;;  %v625_v45 = vmax.f32 %v443_v54, %v616_v60 }
 0x11f   :  { %v561_v62 = vadd.f32 %v560_v2, %v532_v56 }
 0x121   :  { %v589_v52 = vpop.f32.mrf.mxu1 }
 0x122   :  { %v590_v3 = vadd.f32 %v589_v52, %v561_v62 }
 0x124   :  { %v618_v4 = vpop.f32.mrf.mxu2 }
 0x125   :  { %v619_v28 = vadd.f32 %v618_v4, %v590_v3 }
 0x126   :  { %v684_v6 = vpop.f32.mrf.mxu3 }
 0x127   :  { %v563_v1 = vpop.f32.mrf.mxu0  ;;  %v626_v50 = vmax.f32 %v444_v58, %v619_v28 }
 0x128   :  { %v564_v40 = vadd.f32 %v563_v1, %v535_v0 }
 0x12a   :  { %v592_v8 = vpop.f32.mrf.mxu1 }
 0x12b   :  { %v593_v24 = vadd.f32 %v592_v8, %v564_v40 }
 0x12d   :  { %v621_v12 = vpop.f32.mrf.mxu2 }
 0x12f   :  { %v687_v14 = vpop.f32.mrf.mxu3 }
 0x130   :  { %v707_v15 = vpop.f32.mrf.mxu0 }
 0x131   :  { %v708_v17 = vadd.f32 %v707_v15, %v678_v59 }
 0x132   :  { %v736_v18 = vpop.f32.mrf.mxu1 }
 0x133   :  { %v737_v26 = vadd.f32 %v736_v18, %v708_v17 }
 0x136   :  { %v765_v27 = vpop.f32.mrf.mxu2 }
 0x137   :  { %v766_v31 = vadd.f32 %v765_v27, %v737_v26  ;;  %v794_v33 = vpop.f32.mrf.mxu3 }
 0x138   :  { %v710_v34 = vpop.f32.mrf.mxu0 }
 0x139   :  { %v711_v39 = vadd.f32 %v710_v34, %v681_v48  ;;  %v795_v41 = vadd.f32 %v794_v33, %v766_v31 }
 0x13a   :  { %v739_v47 = vpop.f32.mrf.mxu1 }
 0x13b   :  { %v806_v51 = vmax.f32 %v624_v38, %v795_v41  ;;  %v740_v63 = vadd.f32 %v739_v47, %v711_v39 }
 0x13d   :  { %v814_v49 = vadd.f32 %v906_v42, %v806_v51 }
 0x13e   :  { %v768_v53 = vpop.f32.mrf.mxu2 }
 0x13f   :  { %v818_v46 = vmax.f32 %v814_v49, 0.0  ;;  %v769_v5 = vadd.f32 %v768_v53, %v740_v63  ;;  %v797_v57 = vpop.f32.mrf.mxu3 }
 0x140   :  { %v713_v21 = vpop.f32.mrf.mxu0 }
 0x141   :  { %822 = vst [vmem:[%s1882_s3] sm:$0xff] %v818_v46  ;;  %v714_v7 = vadd.f32 %v713_v21, %v684_v6  ;;  %v798_v43 = vadd.f32 %v797_v57, %v769_v5  ;;  %v622_v6 = vadd.f32 %v621_v12, %v593_v24 }
 0x142   :  { %v742_v61 = vpop.f32.mrf.mxu1 }
 0x143   :  { %v807_v11 = vmax.f32 %v625_v45, %v798_v43  ;;  %v743_v59 = vadd.f32 %v742_v61, %v714_v7  ;;  %v627_v19 = vmax.f32 %v445_v20, %v622_v6 }
 0x145   :  { %v815_v32 = vadd.f32 %v906_v42, %v807_v11 }
 0x146   :  { %v771_v36 = vpop.f32.mrf.mxu2 }
 0x147   :  { %v819_v44 = vmax.f32 %v815_v32, 0.0  ;;  %v772_v48 = vadd.f32 %v771_v36, %v743_v59  ;;  %v800_v2 = vpop.f32.mrf.mxu3 }
 0x148   :  { %v716_v10 = vpop.f32.mrf.mxu0 }
 0x149   :  { %823 = vst [vmem:[%s1882_s3 + $0x8] sm:$0xff] %v819_v44  ;;  %v717_v54 = vadd.f32 %v716_v10, %v687_v14  ;;  %v801_v52 = vadd.f32 %v800_v2, %v772_v48 }
 0x14a   :  { %v745_v55 = vpop.f32.mrf.mxu1 }
 0x14b   :  { %v808_v4 = vmax.f32 %v626_v50, %v801_v52  ;;  %v746_v1 = vadd.f32 %v745_v55, %v717_v54 }
 0x14d   :  { %v816_v9 = vadd.f32 %v906_v42, %v808_v4 }
 0x14e   :  { %v774_v13 = vpop.f32.mrf.mxu2 }
 0x14f   :  { %v820_v15 = vmax.f32 %v816_v9, 0.0  ;;  %v775_v17 = vadd.f32 %v774_v13, %v746_v1  ;;  %v803_v18 = vpop.f32.mrf.mxu3 }
 0x151   :  { %824 = vst [vmem:[%s1882_s3 + $0x10] sm:$0xff] %v820_v15  ;;  %v804_v37 = vadd.f32 %v803_v18, %v775_v17 }
 0x153   :  { %v809_v58 = vmax.f32 %v627_v19, %v804_v37 }
 0x155   :  { %v817_v14 = vadd.f32 %v906_v42, %v809_v58 }
 0x157   :  { %v821_v8 = vmax.f32 %v817_v14, 0.0 }
 0x159   :  { %825 = vst [vmem:[%s1882_s3 + $0x18] sm:$0xff] %v821_v8 }

// kernel: tile.18
= control target key start
LH: loop header
LB: loop body
LE: loop exit
PB: predicated region body
PF: predicated region fallthrough
CT: control target
= control target key end

     0   :  { %s22_s0 = inlined_call_operand.vmem [shape: f32[64], index: 0, kind: input, shape index: {}]   ;;  %s23_s1 = inlined_call_operand.vmem [shape: f32[4,64], index: 1, kind: output, shape index: {}]  }
   0x1   :  { %v4_v0 = vld [vmem:[%s22_s0] ss:$0 sm:$0xff] }
   0x2   :  { %5 = vst [vmem:[%s23_s1] sm:$0xf] %v4_v0 }

// kernel: autoencoder_forward.9
= control target key start
LH: loop header
LB: loop body
LE: loop exit
PB: predicated region body
PF: predicated region fallthrough
CT: control target
= control target key end

     0   :  { %s947_s1 = inlined_call_operand.vmem [shape: f32[512,256], index: 1, kind: input, shape index: {}]   ;;  %s948_s0 = inlined_call_operand.vmem [shape: f32[32,512], index: 0, kind: input, shape index: {}]   ;;  %s949_s2 = inlined_call_operand.vmem [shape: f32[1,256], index: 2, kind: input, shape index: {}]   ;;  %s950_s3 = inlined_call_operand.vmem [shape: f32[32,256], index: 3, kind: output, shape index: {}]  }
   0x1   :  { %v124_v0 = vld [vmem:[%s947_s1 + $0x2f0] sm:$0xff]  ;;  %v122_v2 = vld [vmem:[%s947_s1 + $0x2e0] sm:$0xff] }
   0x2   :  { %v60_v1 = vld [vmem:[%s947_s1 + $0xf0] sm:$0xff]  ;;  %222 = vmatpush.msra.mxu2 %v124_v0  ;;  %v58_v4 = vld [vmem:[%s947_s1 + $0xe0] sm:$0xff]  ;;  %v125_v0 = vld [vmem:[%s947_s1 + $0x2f8] sm:$0xff] }
   0x3   :  { %164 = vmatpush.msra.mxu0 %v60_v1  ;;  %v156_v3 = vld [vmem:[%s947_s1 + $0x3f0] sm:$0xff]  ;;  %v154_v7 = vld [vmem:[%s947_s1 + $0x3e0] sm:$0xff] }
   0x4   :  { %v92_v5 = vld [vmem:[%s947_s1 + $0x1f0] sm:$0xff]  ;;  %251 = vmatpush.msra.mxu3 %v156_v3  ;;  %223 = vmatpush.msra.mxu2 %v122_v2  ;;  %v90_v9 = vld [vmem:[%s947_s1 + $0x1e0] sm:$0xff]  ;;  %v641_v2 = vld [vmem:[%s948_s0 + $0x18] sm:$0xff] }
   0x5   :  { %193 = vmatpush.msra.mxu1 %v92_v5  ;;  %v120_v6 = vld [vmem:[%s947_s1 + $0x2d0] sm:$0xff]  ;;  %165 = vmatpush.msra.mxu0 %v58_v4  ;;  %v118_v11 = vld [vmem:[%s947_s1 + $0x2c0] sm:$0xff]  ;;  %v61_v3 = vld [vmem:[%s947_s1 + $0xf8] sm:$0xff] }
   0x6   :  { %v56_v8 = vld [vmem:[%s947_s1 + $0xd0] sm:$0xff]  ;;  %252 = vmatpush.msra.mxu3 %v154_v7  ;;  %v54_v12 = vld [vmem:[%s947_s1 + $0xc0] sm:$0xff]  ;;  %224 = vmatpush.msra.mxu2 %v120_v6  ;;  %v123_v4 = vld [vmem:[%s947_s1 + $0x2e8] sm:$0xff] }
   0x7   :  { %v152_v10 = vld [vmem:[%s947_s1 + $0x3d0] sm:$0xff]  ;;  %194 = vmatpush.msra.mxu1 %v90_v9  ;;  %166 = vmatpush.msra.mxu0 %v56_v8  ;;  %v150_v14 = vld [vmem:[%s947_s1 + $0x3c0] sm:$0xff]  ;;  %v157_v5 = vld [vmem:[%s947_s1 + $0x3f8] sm:$0xff] }
   0x8   :  { %v88_v13 = vld [vmem:[%s947_s1 + $0x1d0] sm:$0xff]  ;;  %v86_v15 = vld [vmem:[%s947_s1 + $0x1c0] sm:$0xff]  ;;  %253 = vmatpush.msra.mxu3 %v152_v10  ;;  %225 = vmatpush.msra.mxu2 %v118_v11  ;;  %v59_v7 = vld [vmem:[%s947_s1 + $0xe8] sm:$0xff] }
   0x9   :  { %195 = vmatpush.msra.mxu1 %v88_v13  ;;  %v116_v16 = vld [vmem:[%s947_s1 + $0x2b0] sm:$0xff]  ;;  %167 = vmatpush.msra.mxu0 %v54_v12  ;;  %v114_v20 = vld [vmem:[%s947_s1 + $0x2a0] sm:$0xff]  ;;  %v664_v8 = vld [vmem:[%s948_s0 + $0x8] sm:$0xff] }
   0xa   :  { %v52_v17 = vld [vmem:[%s947_s1 + $0xb0] sm:$0xff]  ;;  %254 = vmatpush.msra.mxu3 %v150_v14  ;;  %v50_v21 = vld [vmem:[%s947_s1 + $0xa0] sm:$0xff]  ;;  %226 = vmatpush.msra.mxu2 %v116_v16  ;;  %v121_v9 = vld [vmem:[%s947_s1 + $0x2d8] sm:$0xff] }
   0xb   :  { %v148_v18 = vld [vmem:[%s947_s1 + $0x3b0] sm:$0xff]  ;;  %196 = vmatpush.msra.mxu1 %v86_v15  ;;  %168 = vmatpush.msra.mxu0 %v52_v17  ;;  %v146_v22 = vld [vmem:[%s947_s1 + $0x3a0] sm:$0xff]  ;;  %v93_v10 = vld [vmem:[%s947_s1 + $0x1f8] sm:$0xff] }
   0xc   :  { %v84_v19 = vld [vmem:[%s947_s1 + $0x1b0] sm:$0xff]  ;;  %v82_v23 = vld [vmem:[%s947_s1 + $0x1a0] sm:$0xff]  ;;  %255 = vmatpush.msra.mxu3 %v148_v18  ;;  %227 = vmatpush.msra.mxu2 %v114_v20  ;;  %v155_v11 = vld [vmem:[%s947_s1 + $0x3e8] sm:$0xff] }
   0xd   :  { %197 = vmatpush.msra.mxu1 %v84_v19  ;;  %v112_v24 = vld [vmem:[%s947_s1 + $0x290] sm:$0xff]  ;;  %169 = vmatpush.msra.mxu0 %v50_v21  ;;  %v110_v28 = vld [vmem:[%s947_s1 + $0x280] sm:$0xff]  ;;  %v57_v12 = vld [vmem:[%s947_s1 + $0xd8] sm:$0xff] }
   0xe   :  { %v48_v25 = vld [vmem:[%s947_s1 + $0x90] sm:$0xff]  ;;  %256 = vmatpush.msra.mxu3 %v146_v22  ;;  %v46_v29 = vld [vmem:[%s947_s1 + $0x80] sm:$0xff]  ;;  %228 = vmatpush.msra.mxu2 %v112_v24  ;;  %v119_v13 = vld [vmem:[%s947_s1 + $0x2c8] sm:$0xff] }
   0xf   :  { %v144_v26 = vld [vmem:[%s947_s1 + $0x390] sm:$0xff]  ;;  %198 = vmatpush.msra.mxu1 %v82_v23  ;;  %170 = vmatpush.msra.mxu0 %v48_v25  ;;  %v142_v30 = vld [vmem:[%s947_s1 + $0x380] sm:$0xff]  ;;  %v91_v14 = vld [vmem:[%s947_s1 + $0x1e8] sm:$0xff] }
  0x10   :  { %v80_v27 = vld [vmem:[%s947_s1 + $0x190] sm:$0xff]  ;;  %v78_v31 = vld [vmem:[%s947_s1 + $0x180] sm:$0xff]  ;;  %257 = vmatpush.msra.mxu3 %v144_v26  ;;  %229 = vmatpush.msra.mxu2 %v110_v28  ;;  %v153_v15 = vld [vmem:[%s947_s1 + $0x3d8] sm:$0xff] }
  0x11   :  { %199 = vmatpush.msra.mxu1 %v80_v27  ;;  %v108_v32 = vld [vmem:[%s947_s1 + $0x270] sm:$0xff]  ;;  %171 = vmatpush.msra.mxu0 %v46_v29  ;;  %v106_v36 = vld [vmem:[%s947_s1 + $0x260] sm:$0xff]  ;;  %v55_v17 = vld [vmem:[%s947_s1 + $0xc8] sm:$0xff] }
  0x12   :  { %v44_v33 = vld [vmem:[%s947_s1 + $0x70] sm:$0xff]  ;;  %258 = vmatpush.msra.mxu3 %v142_v30  ;;  %v42_v37 = vld [vmem:[%s947_s1 + $0x60] sm:$0xff]  ;;  %230 = vmatpush.msra.mxu2 %v108_v32  ;;  %v89_v18 = vld [vmem:[%s947_s1 + $0x1d8] sm:$0xff] }
  0x13   :  { %v140_v34 = vld [vmem:[%s947_s1 + $0x370] sm:$0xff]  ;;  %200 = vmatpush.msra.mxu1 %v78_v31  ;;  %172 = vmatpush.msra.mxu0 %v44_v33  ;;  %v138_v38 = vld [vmem:[%s947_s1 + $0x360] sm:$0xff]  ;;  %v117_v19 = vld [vmem:[%s947_s1 + $0x2b8] sm:$0xff] }
  0x14   :  { %v76_v35 = vld [vmem:[%s947_s1 + $0x170] sm:$0xff]  ;;  %v74_v39 = vld [vmem:[%s947_s1 + $0x160] sm:$0xff]  ;;  %259 = vmatpush.msra.mxu3 %v140_v34  ;;  %231 = vmatpush.msra.mxu2 %v106_v36  ;;  %v151_v20 = vld [vmem:[%s947_s1 + $0x3c8] sm:$0xff] }
  0x15   :  { %201 = vmatpush.msra.mxu1 %v76_v35  ;;  %v104_v40 = vld [vmem:[%s947_s1 + $0x250] sm:$0xff]  ;;  %173 = vmatpush.msra.mxu0 %v42_v37  ;;  %v102_v44 = vld [vmem:[%s947_s1 + $0x240] sm:$0xff]  ;;  %v714_v22 = vld [vmem:[%s948_s0 + $0x38] sm:$0xff] }
  0x16   :  { %v40_v41 = vld [vmem:[%s947_s1 + $0x50] sm:$0xff]  ;;  %260 = vmatpush.msra.mxu3 %v138_v38  ;;  %v38_v45 = vld [vmem:[%s947_s1 + $0x40] sm:$0xff]  ;;  %232 = vmatpush.msra.mxu2 %v104_v40  ;;  %v53_v23 = vld [vmem:[%s947_s1 + $0xb8] sm:$0xff] }
  0x17   :  { %v136_v42 = vld [vmem:[%s947_s1 + $0x350] sm:$0xff]  ;;  %202 = vmatpush.msra.mxu1 %v74_v39  ;;  %174 = vmatpush.msra.mxu0 %v40_v41  ;;  %v134_v46 = vld [vmem:[%s947_s1 + $0x340] sm:$0xff]  ;;  %v87_v24 = vld [vmem:[%s947_s1 + $0x1c8] sm:$0xff] }
  0x18   :  { %v72_v43 = vld [vmem:[%s947_s1 + $0x150] sm:$0xff]  ;;  %v70_v47 = vld [vmem:[%s947_s1 + $0x140] sm:$0xff]  ;;  %261 = vmatpush.msra.mxu3 %v136_v42  ;;  %233 = vmatpush.msra.mxu2 %v102_v44  ;;  %v115_v25 = vld [vmem:[%s947_s1 + $0x2a8] sm:$0xff] }
  0x19   :  { %203 = vmatpush.msra.mxu1 %v72_v43  ;;  %v100_v48 = vld [vmem:[%s947_s1 + $0x230] sm:$0xff]  ;;  %175 = vmatpush.msra.mxu0 %v38_v45  ;;  %v98_v52 = vld [vmem:[%s947_s1 + $0x220] sm:$0xff]  ;;  %v149_v26 = vld [vmem:[%s947_s1 + $0x3b8] sm:$0xff] }
  0x1a   :  { %v36_v49 = vld [vmem:[%s947_s1 + $0x30] sm:$0xff]  ;;  %262 = vmatpush.msra.mxu3 %v134_v46  ;;  %v34_v53 = vld [vmem:[%s947_s1 + $0x20] sm:$0xff]  ;;  %234 = vmatpush.msra.mxu2 %v100_v48  ;;  %v732_v27 = vld [vmem:[%s948_s0 + $0x28] sm:$0xff] }
  0x1b   :  { %v132_v50 = vld [vmem:[%s947_s1 + $0x330] sm:$0xff]  ;;  %204 = vmatpush.msra.mxu1 %v70_v47  ;;  %176 = vmatpush.msra.mxu0 %v36_v49  ;;  %v130_v54 = vld [vmem:[%s947_s1 + $0x320] sm:$0xff]  ;;  %v51_v28 = vld [vmem:[%s947_s1 + $0xa8] sm:$0xff] }
  0x1c   :  { %v68_v51 = vld [vmem:[%s947_s1 + $0x130] sm:$0xff]  ;;  %v66_v55 = vld [vmem:[%s947_s1 + $0x120] sm:$0xff]  ;;  %263 = vmatpush.msra.mxu3 %v132_v50  ;;  %235 = vmatpush.msra.mxu2 %v98_v52  ;;  %v85_v29 = vld [vmem:[%s947_s1 + $0x1b8] sm:$0xff] }
  0x1d   :  { %205 = vmatpush.msra.mxu1 %v68_v51  ;;  %v96_v56 = vld [vmem:[%s947_s1 + $0x210] sm:$0xff]  ;;  %177 = vmatpush.msra.mxu0 %v34_v53  ;;  %v94_v60 = vld [vmem:[%s947_s1 + $0x200] sm:$0xff]  ;;  %v113_v30 = vld [vmem:[%s947_s1 + $0x298] sm:$0xff] }
  0x1e   :  { %v32_v57 = vld [vmem:[%s947_s1 + $0x10] sm:$0xff]  ;;  %264 = vmatpush.msra.mxu3 %v130_v54  ;;  %v30_v61 = vld [vmem:[%s947_s1] sm:$0xff]  ;;  %236 = vmatpush.msra.mxu2 %v96_v56  ;;  %v147_v31 = vld [vmem:[%s947_s1 + $0x3a8] sm:$0xff] }
  0x1f   :  { %v128_v58 = vld [vmem:[%s947_s1 + $0x310] sm:$0xff]  ;;  %206 = vmatpush.msra.mxu1 %v66_v55  ;;  %178 = vmatpush.msra.mxu0 %v32_v57  ;;  %v126_v63 = vld [vmem:[%s947_s1 + $0x300] sm:$0xff]  ;;  %v49_v32 = vld [vmem:[%s947_s1 + $0x98] sm:$0xff] }
  0x20   :  { %v64_v59 = vld [vmem:[%s947_s1 + $0x110] sm:$0xff]  ;;  %265 = vmatpush.msra.mxu3 %v128_v58  ;;  %v636_v1 = vld [vmem:[%s948_s0] sm:$0xff]  ;;  %237 = vmatpush.msra.mxu2 %v94_v60  ;;  %v83_v33 = vld [vmem:[%s947_s1 + $0x1a8] sm:$0xff] }
  0x21   :  { %v625_v62 = vld [vmem:[%s948_s0 + $0x10] sm:$0xff]  ;;  %207 = vmatpush.msra.mxu1 %v64_v59  ;;  %179 = vmatpush.msra.mxu0 %v30_v61  ;;  %v62_v6 = vld [vmem:[%s947_s1 + $0x100] sm:$0xff]  ;;  %v111_v34 = vld [vmem:[%s947_s1 + $0x288] sm:$0xff] }
  0x22   :  { %238 = vmatmul.f32.vlgmr.msra.gmra.mxu2 %v625_v62  ;;  %266 = vmatpush.msra.mxu3 %v126_v63  ;;  %v691_v16 = vld [vmem:[%s948_s0 + $0x30] sm:$0xff]  ;;  %v708_v21 = vld [vmem:[%s948_s0 + $0x20] sm:$0xff]  ;;  %v145_v35 = vld [vmem:[%s947_s1 + $0x398] sm:$0xff] }
  0x23   :  { %338 = vmatpush.msrb.mxu2 %v125_v0  ;;  %180 = vmatmul.f32.vlgmr.msra.gmra.mxu0 %v636_v1  ;;  %v763_v36 = vld [vmem:[%s948_s0 + $0x50] sm:$0xff]  ;;  %v47_v37 = vld [vmem:[%s947_s1 + $0x88] sm:$0xff]  ;;  %v81_v38 = vld [vmem:[%s947_s1 + $0x198] sm:$0xff] }
  0x24   :  { %267 = vmatmul.f32.vlgmr.msra.gmra.mxu3 %v641_v2  ;;  %280 = vmatpush.msrb.mxu0 %v61_v3  ;;  %v109_v39 = vld [vmem:[%s947_s1 + $0x278] sm:$0xff]  ;;  %v143_v40 = vld [vmem:[%s947_s1 + $0x388] sm:$0xff]  ;;  %v780_v41 = vld [vmem:[%s948_s0 + $0x40] sm:$0xff] }
  0x25   :  { %339 = vmatpush.msrb.mxu2 %v123_v4  ;;  %367 = vmatpush.msrb.mxu3 %v157_v5  ;;  %v786_v42 = vld [vmem:[%s948_s0 + $0x58] sm:$0xff]  ;;  %v79_v44 = vld [vmem:[%s947_s1 + $0x188] sm:$0xff]  ;;  %v835_v56 = vld [vmem:[%s948_s0 + $0x70] sm:$0xff] }
  0x26   :  { %208 = vmatpush.msra.mxu1 %v62_v6  ;;  %281 = vmatpush.msrb.mxu0 %v59_v7  ;;  %v45_v43 = vld [vmem:[%s947_s1 + $0x78] sm:$0xff]  ;;  %v107_v45 = vld [vmem:[%s947_s1 + $0x268] sm:$0xff]  ;;  %v26_v61 = vld [vmem:[%s948_s0 + $0x60] sm:$0xff] }
  0x27   :  { %209 = vmatmul.f32.vlgmr.msra.gmra.mxu1 %v664_v8  ;;  %340 = vmatpush.msrb.mxu2 %v121_v9  ;;  %v141_v46 = vld [vmem:[%s947_s1 + $0x378] sm:$0xff]  ;;  %v804_v47 = vld [vmem:[%s948_s0 + $0x48] sm:$0xff] }
  0x28   :  { %309 = vmatpush.msrb.mxu1 %v93_v10  ;;  %368 = vmatpush.msrb.mxu3 %v155_v11  ;;  %v43_v48 = vld [vmem:[%s947_s1 + $0x68] sm:$0xff]  ;;  %v77_v49 = vld [vmem:[%s947_s1 + $0x178] sm:$0xff] }
  0x29   :  { %282 = vmatpush.msrb.mxu0 %v57_v12  ;;  %341 = vmatpush.msrb.mxu2 %v119_v13  ;;  %v105_v50 = vld [vmem:[%s947_s1 + $0x258] sm:$0xff]  ;;  %v139_v51 = vld [vmem:[%s947_s1 + $0x368] sm:$0xff] }
  0x2a   :  { %310 = vmatpush.msrb.mxu1 %v91_v14  ;;  %369 = vmatpush.msrb.mxu3 %v153_v15  ;;  %v41_v52 = vld [vmem:[%s947_s1 + $0x58] sm:$0xff]  ;;  %v75_v53 = vld [vmem:[%s947_s1 + $0x168] sm:$0xff] }
  0x2b   :  { %241 = vmatmul.f32.gmra.mxu2 %v691_v16  ;;  %283 = vmatpush.msrb.mxu0 %v55_v17  ;;  %v103_v54 = vld [vmem:[%s947_s1 + $0x248] sm:$0xff]  ;;  %v137_v55 = vld [vmem:[%s947_s1 + $0x358] sm:$0xff] }
  0x2c   :  { %311 = vmatpush.msrb.mxu1 %v89_v18  ;;  %342 = vmatpush.msrb.mxu2 %v117_v19  ;;  %v39_v57 = vld [vmem:[%s947_s1 + $0x48] sm:$0xff]  ;;  %v73_v58 = vld [vmem:[%s947_s1 + $0x158] sm:$0xff] }
  0x2d   :  { %370 = vmatpush.msrb.mxu3 %v151_v20  ;;  %183 = vmatmul.f32.gmra.mxu0 %v708_v21  ;;  %v101_v59 = vld [vmem:[%s947_s1 + $0x238] sm:$0xff]  ;;  %v135_v60 = vld [vmem:[%s947_s1 + $0x348] sm:$0xff] }
  0x2e   :  { %270 = vmatmul.f32.gmra.mxu3 %v714_v22  ;;  %284 = vmatpush.msrb.mxu0 %v53_v23  ;;  %v29_v63 = vld [vmem:[%s948_s0 + $0x78] sm:$0xff]  ;;  %v71_v3 = vld [vmem:[%s947_s1 + $0x148] sm:$0xff] }
  0x2f   :  { %312 = vmatpush.msrb.mxu1 %v87_v24  ;;  %343 = vmatpush.msrb.mxu2 %v115_v25  ;;  %v37_v0 = vld [vmem:[%s947_s1 + $0x38] sm:$0xff]  ;;  %v99_v4 = vld [vmem:[%s947_s1 + $0x228] sm:$0xff] }
  0x30   :  { %371 = vmatpush.msrb.mxu3 %v149_v26  ;;  %212 = vmatmul.f32.gmra.mxu1 %v732_v27  ;;  %v133_v5 = vld [vmem:[%s947_s1 + $0x338] sm:$0xff]  ;;  %v27_v6 = vld [vmem:[%s948_s0 + $0x68] sm:$0xff] }
  0x31   :  { %285 = vmatpush.msrb.mxu0 %v51_v28  ;;  %313 = vmatpush.msrb.mxu1 %v85_v29  ;;  %v35_v7 = vld [vmem:[%s947_s1 + $0x28] sm:$0xff]  ;;  %v69_v9 = vld [vmem:[%s947_s1 + $0x138] sm:$0xff] }
  0x32   :  { %344 = vmatpush.msrb.mxu2 %v113_v30  ;;  %372 = vmatpush.msrb.mxu3 %v147_v31  ;;  %v97_v10 = vld [vmem:[%s947_s1 + $0x218] sm:$0xff]  ;;  %v131_v11 = vld [vmem:[%s947_s1 + $0x328] sm:$0xff] }
  0x33   :  { %286 = vmatpush.msrb.mxu0 %v49_v32  ;;  %314 = vmatpush.msrb.mxu1 %v83_v33  ;;  %v33_v12 = vld [vmem:[%s947_s1 + $0x18] sm:$0xff]  ;;  %v67_v13 = vld [vmem:[%s947_s1 + $0x128] sm:$0xff] }
  0x34   :  { %345 = vmatpush.msrb.mxu2 %v111_v34  ;;  %373 = vmatpush.msrb.mxu3 %v145_v35  ;;  %v95_v14 = vld [vmem:[%s947_s1 + $0x208] sm:$0xff]  ;;  %v129_v15 = vld [vmem:[%s947_s1 + $0x318] sm:$0xff] }
  0x35   :  { %244 = vmatmul.f32.gmra.mxu2 %v763_v36  ;;  %287 = vmatpush.msrb.mxu0 %v47_v37  ;;  %v31_v17 = vld [vmem:[%s947_s1 + $0x8] sm:$0xff]  ;;  %v65_v18 = vld [vmem:[%s947_s1 + $0x118] sm:$0xff] }
  0x36   :  { %315 = vmatpush.msrb.mxu1 %v81_v38  ;;  %346 = vmatpush.msrb.mxu2 %v109_v39  ;;  %v127_v19 = vld [vmem:[%s947_s1 + $0x308] sm:$0xff] }
  0x37   :  { %374 = vmatpush.msrb.mxu3 %v143_v40  ;;  %186 = vmatmul.f32.gmra.mxu0 %v780_v41  ;;  %v63_v20 = vld [vmem:[%s947_s1 + $0x108] sm:$0xff] }
  0x38   :  { %273 = vmatmul.f32.gmra.mxu3 %v786_v42  ;;  %288 = vmatpush.msrb.mxu0 %v45_v43 }
  0x39   :  { %316 = vmatpush.msrb.mxu1 %v79_v44  ;;  %347 = vmatpush.msrb.mxu2 %v107_v45 }
  0x3a   :  { %375 = vmatpush.msrb.mxu3 %v141_v46  ;;  %215 = vmatmul.f32.gmra.mxu1 %v804_v47 }
  0x3b   :  { %289 = vmatpush.msrb.mxu0 %v43_v48  ;;  %317 = vmatpush.msrb.mxu1 %v77_v49 }
  0x3c   :  { %348 = vmatpush.msrb.mxu2 %v105_v50  ;;  %376 = vmatpush.msrb.mxu3 %v139_v51 }
  0x3d   :  { %290 = vmatpush.msrb.mxu0 %v41_v52  ;;  %318 = vmatpush.msrb.mxu1 %v75_v53 }
  0x3e   :  { %349 = vmatpush.msrb.mxu2 %v103_v54  ;;  %377 = vmatpush.msrb.mxu3 %v137_v55 }
  0x3f   :  { %247 = vmatmul.f32.gmra.mxu2 %v835_v56  ;;  %291 = vmatpush.msrb.mxu0 %v39_v57 }
  0x40   :  { %319 = vmatpush.msrb.mxu1 %v73_v58  ;;  %350 = vmatpush.msrb.mxu2 %v101_v59 }
  0x41   :  { %378 = vmatpush.msrb.mxu3 %v135_v60  ;;  %189 = vmatmul.f32.gmra.mxu0 %v26_v61 }
  0x42   :  { %276 = vmatmul.f32.gmra.mxu3 %v29_v63  ;;  %292 = vmatpush.msrb.mxu0 %v37_v0 }
  0x43   :  { %320 = vmatpush.msrb.mxu1 %v71_v3  ;;  %351 = vmatpush.msrb.mxu2 %v99_v4 }
  0x44   :  { %379 = vmatpush.msrb.mxu3 %v133_v5  ;;  %218 = vmatmul.f32.gmra.mxu1 %v27_v6 }
  0x45   :  { %293 = vmatpush.msrb.mxu0 %v35_v7  ;;  %321 = vmatpush.msrb.mxu1 %v69_v9 }
  0x46   :  { %352 = vmatpush.msrb.mxu2 %v97_v10  ;;  %380 = vmatpush.msrb.mxu3 %v131_v11 }
  0x47   :  { %294 = vmatpush.msrb.mxu0 %v33_v12  ;;  %322 = vmatpush.msrb.mxu1 %v67_v13 }
  0x48   :  { %353 = vmatpush.msrb.mxu2 %v95_v14  ;;  %381 = vmatpush.msrb.mxu3 %v129_v15 }
  0x49   :  { %295 = vmatpush.msrb.mxu0 %v31_v17  ;;  %323 = vmatpush.msrb.mxu1 %v65_v18 }
  0x4a   :  { %354 = vmatmul.f32.vlgmr.msrb.gmra.mxu2 %v625_v62  ;;  %382 = vmatpush.msrb.mxu3 %v127_v19  ;;  %v158_v62 = vld [vmem:[%s949_s2] sm:$0x3] }
  0x4b   :  { %296 = vmatmul.f32.vlgmr.msrb.gmra.mxu0 %v636_v1  ;;  %324 = vmatpush.msrb.mxu1 %v63_v20  ;;  %v160_v1 = vperm.slane %v158_v62, 0  ;;  %v161_v52 = vperm.slane %v158_v62, 1 }
  0x4c   :  { %383 = vmatmul.f32.vlgmr.msrb.gmra.mxu3 %v641_v2  ;;  %325 = vmatmul.f32.vlgmr.msrb.gmra.mxu1 %v664_v8 }
  0x52   :  { %357 = vmatmul.f32.gmra.mxu2 %v691_v16 }
  0x53   :  { %299 = vmatmul.f32.gmra.mxu0 %v708_v21 }
  0x54   :  { %386 = vmatmul.f32.gmra.mxu3 %v714_v22  ;;  %328 = vmatmul.f32.gmra.mxu1 %v732_v27 }
  0x5a   :  { %360 = vmatmul.f32.gmra.mxu2 %v763_v36 }
  0x5b   :  { %302 = vmatmul.f32.gmra.mxu0 %v780_v41 }
  0x5c   :  { %389 = vmatmul.f32.gmra.mxu3 %v786_v42  ;;  %331 = vmatmul.f32.gmra.mxu1 %v804_v47 }
  0x62   :  { %363 = vmatmul.f32.gmra.mxu2 %v835_v56 }
  0x63   :  { %305 = vmatmul.f32.gmra.mxu0 %v26_v61 }
  0x64   :  { %392 = vmatmul.f32.gmra.mxu3 %v29_v63  ;;  %334 = vmatmul.f32.gmra.mxu1 %v27_v6 }
  0xa0   :  { %v181_v2 = vpop.f32.mrf.mxu0 }
  0xa1   :  { %v182_v8 = vadd.f32 %v181_v2, %v160_v1 }
  0xa4   :  { %v210_v16 = vpop.f32.mrf.mxu1 }
  0xa5   :  { %v211_v21 = vadd.f32 %v210_v16, %v182_v8  ;;  %v239_v22 = vpop.f32.mrf.mxu2 }
  0xa7   :  { %v240_v23 = vadd.f32 %v239_v22, %v211_v21  ;;  %v268_v24 = vpop.f32.mrf.mxu3 }
  0xa9   :  { %v269_v25 = vadd.f32 %v268_v24, %v240_v23 }
  0xaa   :  { %v184_v26 = vpop.f32.mrf.mxu0 }
  0xab   :  { %v396_v27 = vmax.f32 %v269_v25, 0.0  ;;  %v185_v28 = vadd.f32 %v184_v26, %v160_v1 }
  0xad   :  { %404 = vst [vmem:[%s950_s3] sm:$0xff] %v396_v27  ;;  %v213_v29 = vpop.f32.mrf.mxu1 }
  0xae   :  { %v214_v30 = vadd.f32 %v213_v29, %v185_v28  ;;  %v242_v31 = vpop.f32.mrf.mxu2 }
  0xb0   :  { %v243_v32 = vadd.f32 %v242_v31, %v214_v30 }
  0xb1   :  { %v271_v33 = vpop.f32.mrf.mxu3 }
  0xb2   :  { %v272_v34 = vadd.f32 %v271_v33, %v243_v32 }
  0xb4   :  { %v398_v35 = vmax.f32 %v272_v34, 0.0  ;;  %v187_v36 = vpop.f32.mrf.mxu0 }
  0xb5   :  { %v188_v37 = vadd.f32 %v187_v36, %v160_v1 }
  0xb6   :  { %406 = vst [vmem:[%s950_s3 + $0x10] sm:$0xff] %v398_v35 }
  0xb7   :  { %v216_v38 = vpop.f32.mrf.mxu1 }
  0xb8   :  { %v217_v39 = vadd.f32 %v216_v38, %v188_v37  ;;  %v245_v40 = vpop.f32.mrf.mxu2 }
  0xba   :  { %v246_v41 = vadd.f32 %v245_v40, %v217_v39 }
  0xbb   :  { %v274_v42 = vpop.f32.mrf.mxu3 }
  0xbc   :  { %v275_v43 = vadd.f32 %v274_v42, %v246_v41 }
  0xbe   :  { %v400_v44 = vmax.f32 %v275_v43, 0.0  ;;  %v190_v45 = vpop.f32.mrf.mxu0 }
  0xbf   :  { %v191_v46 = vadd.f32 %v190_v45, %v160_v1 }
  0xc0   :  { %408 = vst [vmem:[%s950_s3 + $0x20] sm:$0xff] %v400_v44 }
  0xc1   :  { %v219_v47 = vpop.f32.mrf.mxu1 }
  0xc2   :  { %v220_v48 = vadd.f32 %v219_v47, %v191_v46  ;;  %v248_v49 = vpop.f32.mrf.mxu2 }
  0xc4   :  { %v249_v50 = vadd.f32 %v248_v49, %v220_v48 }
  0xc5   :  { %v277_v51 = vpop.f32.mrf.mxu3 }
  0xc6   :  { %v278_v53 = vadd.f32 %v277_v51, %v249_v50 }
  0xc8   :  { %v402_v54 = vmax.f32 %v278_v53, 0.0  ;;  %v297_v55 = vpop.f32.mrf.mxu0 }
  0xc9   :  { %v298_v56 = vadd.f32 %v297_v55, %v161_v52  ;;  %v326_v57 = vpop.f32.mrf.mxu1 }
  0xca   :  { %410 = vst [vmem:[%s950_s3 + $0x30] sm:$0xff] %v402_v54 }
  0xcb   :  { %v327_v58 = vadd.f32 %v326_v57, %v298_v56 }
  0xcd   :  { %v355_v59 = vpop.f32.mrf.mxu2 }
  0xce   :  { %v356_v60 = vadd.f32 %v355_v59, %v327_v58 }
  0xcf   :  { %v384_v61 = vpop.f32.mrf.mxu3 }
  0xd0   :  { %v385_v63 = vadd.f32 %v384_v61, %v356_v60  ;;  %v300_v0 = vpop.f32.mrf.mxu0 }
  0xd1   :  { %v301_v3 = vadd.f32 %v300_v0, %v161_v52  ;;  %v329_v4 = vpop.f32.mrf.mxu1 }
  0xd2   :  { %v397_v5 = vmax.f32 %v385_v63, 0.0 }
  0xd3   :  { %v330_v6 = vadd.f32 %v329_v4, %v301_v3 }
  0xd4   :  { %405 = vst [vmem:[%s950_s3 + $0x8] sm:$0xff] %v397_v5 }
  0xd5   :  { %v358_v7 = vpop.f32.mrf.mxu2 }
  0xd6   :  { %v359_v9 = vadd.f32 %v358_v7, %v330_v6 }
  0xd7   :  { %v387_v10 = vpop.f32.mrf.mxu3 }
  0xd8   :  { %v388_v11 = vadd.f32 %v387_v10, %v359_v9  ;;  %v303_v12 = vpop.f32.mrf.mxu0 }
  0xd9   :  { %v304_v13 = vadd.f32 %v303_v12, %v161_v52  ;;  %v332_v14 = vpop.f32.mrf.mxu1 }
  0xda   :  { %v399_v15 = vmax.f32 %v388_v11, 0.0 }
  0xdb   :  { %v333_v17 = vadd.f32 %v332_v14, %v304_v13 }
  0xdc   :  { %407 = vst [vmem:[%s950_s3 + $0x18] sm:$0xff] %v399_v15 }
  0xdd   :  { %v361_v18 = vpop.f32.mrf.mxu2 }
  0xde   :  { %v362_v19 = vadd.f32 %v361_v18, %v333_v17 }
  0xdf   :  { %v390_v20 = vpop.f32.mrf.mxu3 }
  0xe0   :  { %v391_v62 = vadd.f32 %v390_v20, %v362_v19  ;;  %v306_v1 = vpop.f32.mrf.mxu0 }
  0xe1   :  { %v307_v2 = vadd.f32 %v306_v1, %v161_v52  ;;  %v335_v8 = vpop.f32.mrf.mxu1 }
  0xe2   :  { %v401_v16 = vmax.f32 %v391_v62, 0.0 }
  0xe3   :  { %v336_v21 = vadd.f32 %v335_v8, %v307_v2 }
  0xe4   :  { %409 = vst [vmem:[%s950_s3 + $0x28] sm:$0xff] %v401_v16 }
  0xe5   :  { %v364_v22 = vpop.f32.mrf.mxu2 }
  0xe6   :  { %v365_v23 = vadd.f32 %v364_v22, %v336_v21 }
  0xe7   :  { %v393_v24 = vpop.f32.mrf.mxu3 }
  0xe8   :  { %v394_v25 = vadd.f32 %v393_v24, %v365_v23 }
  0xea   :  { %v403_v26 = vmax.f32 %v394_v25, 0.0 }
  0xec   :  { %411 = vst [vmem:[%s950_s3 + $0x38] sm:$0xff] %v403_v26 }

// kernel: tile.23
= control target key start
LH: loop header
LB: loop body
LE: loop exit
PB: predicated region body
PF: predicated region fallthrough
CT: control target
= control target key end

     0   :  { %s22_s0 = inlined_call_operand.vmem [shape: f32[32], index: 0, kind: input, shape index: {}]   ;;  %s23_s1 = inlined_call_operand.vmem [shape: f32[4,32], index: 1, kind: output, shape index: {}]  }
   0x1   :  { %v4_v0 = vld [vmem:[%s22_s0] ss:$0 sm:$0xff] }
   0x2   :  { %5 = vst [vmem:[%s23_s1] sm:$0xf] %v4_v0 }

// kernel: autoencoder_forward.10
= control target key start
LH: loop header
LB: loop body
LE: loop exit
PB: predicated region body
PF: predicated region fallthrough
CT: control target
= control target key end

     0   :  { %s562_s1 = inlined_call_operand.vmem [shape: f32[256,128], index: 1, kind: input, shape index: {}]   ;;  %s563_s2 = inlined_call_operand.vmem [shape: f32[1,128], index: 2, kind: input, shape index: {}]   ;;  %s564_s0 = inlined_call_operand.vmem [shape: f32[128,256], index: 0, kind: input, shape index: {}]   ;;  %s565_s3 = inlined_call_operand.vmem [shape: f32[128,128], index: 3, kind: output, shape index: {}]  }
   0x1   :  { %v61_v0 = vld [vmem:[%s562_s1 + $0x78] sm:$0xff]  ;;  %v60_v1 = vld [vmem:[%s562_s1 + $0x70] sm:$0xff]  ;;  %v59_v4 = vld [vmem:[%s562_s1 + $0x68] sm:$0xff] }
   0x2   :  { %v77_v2 = vld [vmem:[%s562_s1 + $0xf8] sm:$0xff]  ;;  %248 = vmatpush.msra.mxu2 %v61_v0  ;;  %v76_v3 = vld [vmem:[%s562_s1 + $0xf0] sm:$0xff]  ;;  %82 = vmatpush.msra.mxu0 %v61_v0  ;;  %v75_v5 = vld [vmem:[%s562_s1 + $0xe8] sm:$0xff] }
   0x3   :  { %264 = vmatpush.msra.mxu3 %v77_v2  ;;  %147 = vmatpush.msra.mxu1 %v77_v2  ;;  %v58_v6 = vld [vmem:[%s562_s1 + $0x60] sm:$0xff]  ;;  %v57_v8 = vld [vmem:[%s562_s1 + $0x58] sm:$0xff]  ;;  %v56_v10 = vld [vmem:[%s562_s1 + $0x50] sm:$0xff] }
   0x4   :  { %249 = vmatpush.msra.mxu2 %v60_v1  ;;  %83 = vmatpush.msra.mxu0 %v60_v1  ;;  %v74_v7 = vld [vmem:[%s562_s1 + $0xe0] sm:$0xff]  ;;  %v73_v9 = vld [vmem:[%s562_s1 + $0xd8] sm:$0xff]  ;;  %v72_v11 = vld [vmem:[%s562_s1 + $0xd0] sm:$0xff] }
   0x5   :  { %265 = vmatpush.msra.mxu3 %v76_v3  ;;  %148 = vmatpush.msra.mxu1 %v76_v3  ;;  %v55_v12 = vld [vmem:[%s562_s1 + $0x48] sm:$0xff]  ;;  %v54_v14 = vld [vmem:[%s562_s1 + $0x40] sm:$0xff]  ;;  %v53_v16 = vld [vmem:[%s562_s1 + $0x38] sm:$0xff] }
   0x6   :  { %250 = vmatpush.msra.mxu2 %v59_v4  ;;  %84 = vmatpush.msra.mxu0 %v59_v4  ;;  %v71_v13 = vld [vmem:[%s562_s1 + $0xc8] sm:$0xff]  ;;  %v70_v15 = vld [vmem:[%s562_s1 + $0xc0] sm:$0xff]  ;;  %v69_v17 = vld [vmem:[%s562_s1 + $0xb8] sm:$0xff] }
   0x7   :  { %266 = vmatpush.msra.mxu3 %v75_v5  ;;  %149 = vmatpush.msra.mxu1 %v75_v5  ;;  %v52_v18 = vld [vmem:[%s562_s1 + $0x30] sm:$0xff]  ;;  %v51_v20 = vld [vmem:[%s562_s1 + $0x28] sm:$0xff]  ;;  %v50_v22 = vld [vmem:[%s562_s1 + $0x20] sm:$0xff] }
   0x8   :  { %251 = vmatpush.msra.mxu2 %v58_v6  ;;  %85 = vmatpush.msra.mxu0 %v58_v6  ;;  %v68_v19 = vld [vmem:[%s562_s1 + $0xb0] sm:$0xff]  ;;  %v67_v21 = vld [vmem:[%s562_s1 + $0xa8] sm:$0xff]  ;;  %v66_v23 = vld [vmem:[%s562_s1 + $0xa0] sm:$0xff] }
   0x9   :  { %267 = vmatpush.msra.mxu3 %v74_v7  ;;  %150 = vmatpush.msra.mxu1 %v74_v7  ;;  %v49_v24 = vld [vmem:[%s562_s1 + $0x18] sm:$0xff]  ;;  %v48_v26 = vld [vmem:[%s562_s1 + $0x10] sm:$0xff]  ;;  %v47_v28 = vld [vmem:[%s562_s1 + $0x8] sm:$0xff] }
   0xa   :  { %252 = vmatpush.msra.mxu2 %v57_v8  ;;  %86 = vmatpush.msra.mxu0 %v57_v8  ;;  %v65_v25 = vld [vmem:[%s562_s1 + $0x98] sm:$0xff]  ;;  %v64_v27 = vld [vmem:[%s562_s1 + $0x90] sm:$0xff]  ;;  %v63_v29 = vld [vmem:[%s562_s1 + $0x88] sm:$0xff] }
   0xb   :  { %268 = vmatpush.msra.mxu3 %v73_v9  ;;  %151 = vmatpush.msra.mxu1 %v73_v9  ;;  %v46_v30 = vld [vmem:[%s562_s1] sm:$0xff]  ;;  %v31_v33 = vld [vmem:[%s564_s0 + $0x88] sm:$0xff]  ;;  %v32_v36 = vld [vmem:[%s564_s0 + $0x90] sm:$0xff] }
   0xc   :  { %253 = vmatpush.msra.mxu2 %v56_v10  ;;  %87 = vmatpush.msra.mxu0 %v56_v10  ;;  %v62_v31 = vld [vmem:[%s562_s1 + $0x80] sm:$0xff]  ;;  %v15_v35 = vld [vmem:[%s564_s0 + $0x8] sm:$0xff]  ;;  %v33_v37 = vld [vmem:[%s564_s0 + $0x98] sm:$0xff] }
   0xd   :  { %269 = vmatpush.msra.mxu3 %v72_v11  ;;  %152 = vmatpush.msra.mxu1 %v72_v11  ;;  %v30_v32 = vld [vmem:[%s564_s0 + $0x80] sm:$0xff]  ;;  %v16_v38 = vld [vmem:[%s564_s0 + $0x10] sm:$0xff]  ;;  %v17_v39 = vld [vmem:[%s564_s0 + $0x18] sm:$0xff] }
   0xe   :  { %254 = vmatpush.msra.mxu2 %v55_v12  ;;  %88 = vmatpush.msra.mxu0 %v55_v12  ;;  %v14_v34 = vld [vmem:[%s564_s0] sm:$0xff]  ;;  %v35_v41 = vld [vmem:[%s564_s0 + $0xa8] sm:$0xff]  ;;  %v36_v44 = vld [vmem:[%s564_s0 + $0xb0] sm:$0xff] }
   0xf   :  { %270 = vmatpush.msra.mxu3 %v71_v13  ;;  %153 = vmatpush.msra.mxu1 %v71_v13  ;;  %v34_v40 = vld [vmem:[%s564_s0 + $0xa0] sm:$0xff]  ;;  %v19_v43 = vld [vmem:[%s564_s0 + $0x28] sm:$0xff]  ;;  %v37_v45 = vld [vmem:[%s564_s0 + $0xb8] sm:$0xff] }
  0x10   :  { %255 = vmatpush.msra.mxu2 %v54_v14  ;;  %89 = vmatpush.msra.mxu0 %v54_v14  ;;  %v18_v42 = vld [vmem:[%s564_s0 + $0x20] sm:$0xff]  ;;  %v20_v46 = vld [vmem:[%s564_s0 + $0x30] sm:$0xff]  ;;  %v21_v47 = vld [vmem:[%s564_s0 + $0x38] sm:$0xff] }
  0x11   :  { %271 = vmatpush.msra.mxu3 %v70_v15  ;;  %154 = vmatpush.msra.mxu1 %v70_v15  ;;  %v38_v48 = vld [vmem:[%s564_s0 + $0xc0] sm:$0xff]  ;;  %v39_v49 = vld [vmem:[%s564_s0 + $0xc8] sm:$0xff]  ;;  %v40_v52 = vld [vmem:[%s564_s0 + $0xd0] sm:$0xff] }
  0x12   :  { %256 = vmatpush.msra.mxu2 %v53_v16  ;;  %90 = vmatpush.msra.mxu0 %v53_v16  ;;  %v22_v50 = vld [vmem:[%s564_s0 + $0x40] sm:$0xff]  ;;  %v23_v51 = vld [vmem:[%s564_s0 + $0x48] sm:$0xff]  ;;  %v41_v53 = vld [vmem:[%s564_s0 + $0xd8] sm:$0xff] }
  0x13   :  { %272 = vmatpush.msra.mxu3 %v69_v17  ;;  %155 = vmatpush.msra.mxu1 %v69_v17  ;;  %v24_v54 = vld [vmem:[%s564_s0 + $0x50] sm:$0xff]  ;;  %v25_v55 = vld [vmem:[%s564_s0 + $0x58] sm:$0xff]  ;;  %v42_v56 = vld [vmem:[%s564_s0 + $0xe0] sm:$0xff] }
  0x14   :  { %257 = vmatpush.msra.mxu2 %v52_v18  ;;  %91 = vmatpush.msra.mxu0 %v52_v18  ;;  %v43_v57 = vld [vmem:[%s564_s0 + $0xe8] sm:$0xff]  ;;  %v26_v58 = vld [vmem:[%s564_s0 + $0x60] sm:$0xff]  ;;  %v44_v60 = vld [vmem:[%s564_s0 + $0xf0] sm:$0xff] }
  0x15   :  { %273 = vmatpush.msra.mxu3 %v68_v19  ;;  %156 = vmatpush.msra.mxu1 %v68_v19  ;;  %v27_v59 = vld [vmem:[%s564_s0 + $0x68] sm:$0xff]  ;;  %v45_v61 = vld [vmem:[%s564_s0 + $0xf8] sm:$0xff]  ;;  %v28_v62 = vld [vmem:[%s564_s0 + $0x70] sm:$0xff] }
  0x16   :  { %258 = vmatpush.msra.mxu2 %v51_v20  ;;  %92 = vmatpush.msra.mxu0 %v51_v20  ;;  %v29_v63 = vld [vmem:[%s564_s0 + $0x78] sm:$0xff]  ;;  %v496_v0 = vld [vmem:[%s563_s2] ss:$0 sm:$0xff] }
  0x17   :  { %274 = vmatpush.msra.mxu3 %v67_v21  ;;  %157 = vmatpush.msra.mxu1 %v67_v21 }
  0x18   :  { %259 = vmatpush.msra.mxu2 %v50_v22  ;;  %93 = vmatpush.msra.mxu0 %v50_v22 }
  0x19   :  { %275 = vmatpush.msra.mxu3 %v66_v23  ;;  %158 = vmatpush.msra.mxu1 %v66_v23 }
  0x1a   :  { %260 = vmatpush.msra.mxu2 %v49_v24  ;;  %94 = vmatpush.msra.mxu0 %v49_v24 }
  0x1b   :  { %276 = vmatpush.msra.mxu3 %v65_v25  ;;  %159 = vmatpush.msra.mxu1 %v65_v25 }
  0x1c   :  { %261 = vmatpush.msra.mxu2 %v48_v26  ;;  %95 = vmatpush.msra.mxu0 %v48_v26 }
  0x1d   :  { %277 = vmatpush.msra.mxu3 %v64_v27  ;;  %160 = vmatpush.msra.mxu1 %v64_v27 }
  0x1e   :  { %262 = vmatpush.msra.mxu2 %v47_v28  ;;  %96 = vmatpush.msra.mxu0 %v47_v28 }
  0x1f   :  { %278 = vmatpush.msra.mxu3 %v63_v29  ;;  %161 = vmatpush.msra.mxu1 %v63_v29 }
  0x20   :  { %263 = vmatpush.msra.mxu2 %v46_v30  ;;  %97 = vmatpush.msra.mxu0 %v46_v30 }
  0x21   :  { %279 = vmatpush.msra.mxu3 %v62_v31  ;;  %122 = vmatmul.f32.vlgmr.msra.gmra.mxu2 %v30_v32 }
  0x22   :  { %187 = vmatmul.f32.vlgmr.msra.gmra.mxu3 %v31_v33  ;;  %162 = vmatpush.msra.mxu1 %v62_v31 }
  0x23   :  { %98 = vmatmul.f32.vlgmr.msra.gmra.mxu0 %v14_v34  ;;  %163 = vmatmul.f32.vlgmr.msra.gmra.mxu1 %v15_v35 }
  0x29   :  { %125 = vmatmul.f32.gmra.mxu2 %v32_v36 }
  0x2a   :  { %190 = vmatmul.f32.gmra.mxu3 %v33_v37 }
  0x2b   :  { %101 = vmatmul.f32.gmra.mxu0 %v16_v38  ;;  %166 = vmatmul.f32.gmra.mxu1 %v17_v39 }
  0x31   :  { %128 = vmatmul.f32.gmra.mxu2 %v34_v40 }
  0x32   :  { %193 = vmatmul.f32.gmra.mxu3 %v35_v41 }
  0x33   :  { %104 = vmatmul.f32.gmra.mxu0 %v18_v42  ;;  %169 = vmatmul.f32.gmra.mxu1 %v19_v43 }
  0x39   :  { %131 = vmatmul.f32.gmra.mxu2 %v36_v44 }
  0x3a   :  { %196 = vmatmul.f32.gmra.mxu3 %v37_v45 }
  0x3b   :  { %107 = vmatmul.f32.gmra.mxu0 %v20_v46  ;;  %172 = vmatmul.f32.gmra.mxu1 %v21_v47 }
  0x41   :  { %134 = vmatmul.f32.gmra.mxu2 %v38_v48 }
  0x42   :  { %199 = vmatmul.f32.gmra.mxu3 %v39_v49 }
  0x43   :  { %110 = vmatmul.f32.gmra.mxu0 %v22_v50  ;;  %175 = vmatmul.f32.gmra.mxu1 %v23_v51 }
  0x49   :  { %137 = vmatmul.f32.gmra.mxu2 %v40_v52 }
  0x4a   :  { %202 = vmatmul.f32.gmra.mxu3 %v41_v53 }
  0x4b   :  { %113 = vmatmul.f32.gmra.mxu0 %v24_v54  ;;  %178 = vmatmul.f32.gmra.mxu1 %v25_v55 }
  0x51   :  { %140 = vmatmul.f32.gmra.mxu2 %v42_v56 }
  0x52   :  { %205 = vmatmul.f32.gmra.mxu3 %v43_v57 }
  0x53   :  { %116 = vmatmul.f32.gmra.mxu0 %v26_v58  ;;  %181 = vmatmul.f32.gmra.mxu1 %v27_v59 }
  0x59   :  { %143 = vmatmul.f32.gmra.mxu2 %v44_v60 }
  0x5a   :  { %208 = vmatmul.f32.gmra.mxu3 %v45_v61 }
  0x5b   :  { %119 = vmatmul.f32.gmra.mxu0 %v28_v62  ;;  %184 = vmatmul.f32.gmra.mxu1 %v29_v63 }
  0xa0   :  { %v99_v1 = vpop.f32.mrf.mxu0  ;;  %v164_v2 = vpop.f32.mrf.mxu1 }
  0xa1   :  { %v100_v3 = vadd.f32 %v496_v0, %v99_v1 }
  0xa3   :  { %v165_v4 = vadd.f32 %v164_v2, %v100_v3 }
  0xa4   :  { %v123_v5 = vpop.f32.mrf.mxu2 }
  0xa5   :  { %v188_v6 = vpop.f32.mrf.mxu3  ;;  %v124_v7 = vadd.f32 %v496_v0, %v123_v5  ;;  %v212_v8 = vmax.f32 %v165_v4, 0.0 }
  0xa7   :  { %228 = vst [vmem:[%s565_s3] sm:$0xff] %v212_v8  ;;  %v189_v9 = vadd.f32 %v188_v6, %v124_v7 }
  0xa8   :  { %v102_v10 = vpop.f32.mrf.mxu0  ;;  %v167_v11 = vpop.f32.mrf.mxu1 }
  0xa9   :  { %v220_v12 = vmax.f32 %v189_v9, 0.0  ;;  %v103_v13 = vadd.f32 %v496_v0, %v102_v10 }
  0xab   :  { %236 = vst [vmem:[%s565_s3 + $0x40] sm:$0xff] %v220_v12  ;;  %v168_v14 = vadd.f32 %v167_v11, %v103_v13 }
  0xac   :  { %v126_v15 = vpop.f32.mrf.mxu2 }
  0xad   :  { %v191_v16 = vpop.f32.mrf.mxu3  ;;  %v127_v17 = vadd.f32 %v496_v0, %v126_v15  ;;  %v213_v18 = vmax.f32 %v168_v14, 0.0 }
  0xaf   :  { %229 = vst [vmem:[%s565_s3 + $0x8] sm:$0xff] %v213_v18  ;;  %v192_v19 = vadd.f32 %v191_v16, %v127_v17 }
  0xb0   :  { %v105_v20 = vpop.f32.mrf.mxu0  ;;  %v170_v21 = vpop.f32.mrf.mxu1 }
  0xb1   :  { %v221_v22 = vmax.f32 %v192_v19, 0.0  ;;  %v106_v23 = vadd.f32 %v496_v0, %v105_v20 }
  0xb3   :  { %237 = vst [vmem:[%s565_s3 + $0x48] sm:$0xff] %v221_v22  ;;  %v171_v24 = vadd.f32 %v170_v21, %v106_v23 }
  0xb4   :  { %v129_v25 = vpop.f32.mrf.mxu2 }
  0xb5   :  { %v194_v26 = vpop.f32.mrf.mxu3  ;;  %v130_v27 = vadd.f32 %v496_v0, %v129_v25  ;;  %v214_v28 = vmax.f32 %v171_v24, 0.0 }
  0xb7   :  { %230 = vst [vmem:[%s565_s3 + $0x10] sm:$0xff] %v214_v28  ;;  %v195_v29 = vadd.f32 %v194_v26, %v130_v27 }
  0xb8   :  { %v108_v30 = vpop.f32.mrf.mxu0  ;;  %v173_v31 = vpop.f32.mrf.mxu1 }
  0xb9   :  { %v222_v32 = vmax.f32 %v195_v29, 0.0  ;;  %v109_v33 = vadd.f32 %v496_v0, %v108_v30 }
  0xbb   :  { %238 = vst [vmem:[%s565_s3 + $0x50] sm:$0xff] %v222_v32  ;;  %v174_v34 = vadd.f32 %v173_v31, %v109_v33 }
  0xbc   :  { %v132_v35 = vpop.f32.mrf.mxu2 }
  0xbd   :  { %v197_v36 = vpop.f32.mrf.mxu3  ;;  %v133_v37 = vadd.f32 %v496_v0, %v132_v35  ;;  %v215_v38 = vmax.f32 %v174_v34, 0.0 }
  0xbf   :  { %231 = vst [vmem:[%s565_s3 + $0x18] sm:$0xff] %v215_v38  ;;  %v198_v39 = vadd.f32 %v197_v36, %v133_v37 }
  0xc0   :  { %v111_v40 = vpop.f32.mrf.mxu0  ;;  %v176_v41 = vpop.f32.mrf.mxu1 }
  0xc1   :  { %v223_v42 = vmax.f32 %v198_v39, 0.0  ;;  %v112_v43 = vadd.f32 %v496_v0, %v111_v40 }
  0xc3   :  { %239 = vst [vmem:[%s565_s3 + $0x58] sm:$0xff] %v223_v42  ;;  %v177_v44 = vadd.f32 %v176_v41, %v112_v43 }
  0xc4   :  { %v135_v45 = vpop.f32.mrf.mxu2 }
  0xc5   :  { %v200_v46 = vpop.f32.mrf.mxu3  ;;  %v136_v47 = vadd.f32 %v496_v0, %v135_v45  ;;  %v216_v48 = vmax.f32 %v177_v44, 0.0 }
  0xc7   :  { %232 = vst [vmem:[%s565_s3 + $0x20] sm:$0xff] %v216_v48  ;;  %v201_v49 = vadd.f32 %v200_v46, %v136_v47 }
  0xc8   :  { %v114_v50 = vpop.f32.mrf.mxu0  ;;  %v179_v51 = vpop.f32.mrf.mxu1 }
  0xc9   :  { %v224_v52 = vmax.f32 %v201_v49, 0.0  ;;  %v115_v53 = vadd.f32 %v496_v0, %v114_v50 }
  0xcb   :  { %240 = vst [vmem:[%s565_s3 + $0x60] sm:$0xff] %v224_v52  ;;  %v180_v54 = vadd.f32 %v179_v51, %v115_v53 }
  0xcc   :  { %v138_v55 = vpop.f32.mrf.mxu2 }
  0xcd   :  { %v203_v56 = vpop.f32.mrf.mxu3  ;;  %v139_v57 = vadd.f32 %v496_v0, %v138_v55  ;;  %v217_v58 = vmax.f32 %v180_v54, 0.0 }
  0xcf   :  { %233 = vst [vmem:[%s565_s3 + $0x28] sm:$0xff] %v217_v58  ;;  %v204_v59 = vadd.f32 %v203_v56, %v139_v57 }
  0xd0   :  { %v117_v60 = vpop.f32.mrf.mxu0  ;;  %v182_v61 = vpop.f32.mrf.mxu1 }
  0xd1   :  { %v225_v62 = vmax.f32 %v204_v59, 0.0  ;;  %v118_v63 = vadd.f32 %v496_v0, %v117_v60 }
  0xd3   :  { %241 = vst [vmem:[%s565_s3 + $0x68] sm:$0xff] %v225_v62  ;;  %v183_v1 = vadd.f32 %v182_v61, %v118_v63 }
  0xd4   :  { %v141_v2 = vpop.f32.mrf.mxu2 }
  0xd5   :  { %v206_v3 = vpop.f32.mrf.mxu3  ;;  %v142_v4 = vadd.f32 %v496_v0, %v141_v2  ;;  %v218_v5 = vmax.f32 %v183_v1, 0.0 }
  0xd7   :  { %234 = vst [vmem:[%s565_s3 + $0x30] sm:$0xff] %v218_v5  ;;  %v207_v6 = vadd.f32 %v206_v3, %v142_v4 }
  0xd8   :  { %v120_v7 = vpop.f32.mrf.mxu0  ;;  %v185_v8 = vpop.f32.mrf.mxu1 }
  0xd9   :  { %v226_v9 = vmax.f32 %v207_v6, 0.0  ;;  %v121_v10 = vadd.f32 %v496_v0, %v120_v7 }
  0xdb   :  { %242 = vst [vmem:[%s565_s3 + $0x70] sm:$0xff] %v226_v9  ;;  %v186_v11 = vadd.f32 %v185_v8, %v121_v10 }
  0xdc   :  { %v144_v12 = vpop.f32.mrf.mxu2 }
  0xdd   :  { %v209_v13 = vpop.f32.mrf.mxu3  ;;  %v145_v14 = vadd.f32 %v496_v0, %v144_v12  ;;  %v219_v15 = vmax.f32 %v186_v11, 0.0 }
  0xdf   :  { %235 = vst [vmem:[%s565_s3 + $0x38] sm:$0xff] %v219_v15  ;;  %v210_v16 = vadd.f32 %v209_v13, %v145_v14 }
  0xe1   :  { %v227_v17 = vmax.f32 %v210_v16, 0.0 }
  0xe3   :  { %243 = vst [vmem:[%s565_s3 + $0x78] sm:$0xff] %v227_v17 }

// kernel: tile.28
= control target key start
LH: loop header
LB: loop body
LE: loop exit
PB: predicated region body
PF: predicated region fallthrough
CT: control target
= control target key end

     0   :  { %s22_s0 = inlined_call_operand.vmem [shape: f32[3], index: 0, kind: input, shape index: {}]   ;;  %s23_s1 = inlined_call_operand.vmem [shape: f32[4,3], index: 1, kind: output, shape index: {}]  }
   0x1   :  { %v4_v0 = vld [vmem:[%s22_s0] ss:$0 sm:$0xff] }
   0x2   :  { %5 = vst [vmem:[%s23_s1] sm:$0xf] %v4_v0 }

// kernel: tile.29
= control target key start
LH: loop header
LB: loop body
LE: loop exit
PB: predicated region body
PF: predicated region fallthrough
CT: control target
= control target key end

     0   :  { %s37_s8 = smov 3   ;;  %s38_s9 = smov 6   ;;  %vm7_vm0 = vcmask 23552   ;;  %vm13_vm1 = vcmask 97352   ;;  %vm19_vm2 = vcmask 72752   ;;  %vm25_vm3 = vcmask 48152   ;;  %s55_s0 = inlined_call_operand.vmem [shape: f32[4,3], index: 0, kind: input, shape index: {}]   ;;  %s56_s1 = inlined_call_operand.vmem [shape: f32[12], index: 1, kind: output, shape index: {}]  }
   0x1   :  { %v4_v0 = vld [vmem:[%s55_s0] sm:$0xf]  ;;  %s36_s0 = smov 9  }
   0x2   :  { %5 = vst [vmem:[#allocation1] sm:$0xf] %v4_v0 }
   0x9   :  { %v10_v1 = vld [vmem:[#allocation1 + $0x3] sm:$0x1]   ;;  %v22_v2 = vld [vmem:[#allocation1 + $0x1] sm:$0x1]   ;;  %v16_v3 = vld [vmem:[#allocation1 + $0x2] sm:$0x1]  }
   0xa   :  { %11 = vrot.lane.b32.xlu0 %v10_v1, %s36_s0  ;;  %23 = vrot.lane.b32.xlu1 %v22_v2, %s37_s8  ;;  %v6_v4 = vld [vmem:[#allocation1] sm:$0x1]  }
   0xb   :  { %8 = vst.msk [vmem:[#allocation0] sm:$0x1] %vm7_vm0, %v6_v4  }
  0x12   :  { %17 = vrot.lane.b32.xlu0 %v16_v3, %s38_s9 }
  0x7c   :  { %v12_v5 = vpop.permute.xlu0 %11   ;;  %v24_v6 = vpop.permute.xlu1 %23  }
  0x7d   :  { %14 = vst.msk [vmem:[#allocation0] sm:$0x1] %vm13_vm1, %v12_v5  }
  0x84   :  { %v18_v7 = vpop.permute.xlu0 %17  }
  0x85   :  { %20 = vst.msk [vmem:[#allocation0] sm:$0x1] %vm19_vm2, %v18_v7  }
  0x86   :  { %26 = vst.msk [vmem:[#allocation0] sm:$0x1] %vm25_vm3, %v24_v6  }
  0x8d   :  { %v29_v8 = vld [vmem:[#allocation0] sm:$0x1] }
  0x8e   :  { %32 = vst [vmem:[%s56_s1] sm:$0x1] %v29_v8 }

// kernel: autoencoder_forward.11
= control target key start
LH: loop header
LB: loop body
LE: loop exit
PB: predicated region body
PF: predicated region fallthrough
CT: control target
= control target key end

     0   :  { %s587_s12 = smov 0   ;;  %s718_s0 = inlined_call_operand.vmem [shape: f32[512,128], index: 0, kind: input, shape index: {}]   ;;  %s719_s1 = inlined_call_operand.vmem [shape: f32[128,128], index: 1, kind: input, shape index: {}]   ;;  %s720_s2 = inlined_call_operand.vmem [shape: f32[1,128], index: 2, kind: input, shape index: {}]   ;;  %s721_s3 = inlined_call_operand.vmem [shape: f32[512,128], index: 3, kind: output, shape index: {}]  }
   0x1 LB: > { %s427_s13 = sadd.s32 4294967295, %s565_s12   ;;  %p431_p0 = scmp.ge.s32.totalorder %s565_s12, 1  ;;  %s565_s12 = sphi %s587_s12, %s13_s12  }
   0x2   : > { %p138_p1 = scmp.lt.s32.totalorder %s565_s12, 5 }
   0x4   : > { %p139_p2 = pnand %p431_p0, %p138_p1 }
   0x5   : > { %s432_s30 = sshll.u32 (!%p139_p2), %s427_s13, 4 }
   0x6   : > { %142 = sbr.rel (%p139_p2) target bundleno = 224 (0xe0), region = 32  ;;  %p163_p3 = scmp.lt.s32.totalorder (!%p139_p2), %s432_s30, 63 }
   0xb   : > { %v205_v0 = vld [vmem:[%s719_s1 + $0x78] sm:$0xff]  ;;  %v204_v1 = vld [vmem:[%s719_s1 + $0x70] sm:$0xff]  ;;  %v203_v2 = vld [vmem:[%s719_s1 + $0x68] sm:$0xff]  ;;  %s723_s30 = smov (!%p163_p3, %s432_s30), 63 }
   0xc   : > { %439 = vmatpush.msra.mxu2 %v205_v0  ;;  %440 = vmatpush.msra.mxu3 %v205_v0  ;;  %v202_v3 = vld [vmem:[%s719_s1 + $0x60] sm:$0xff]  ;;  %v201_v4 = vld [vmem:[%s719_s1 + $0x58] sm:$0xff]  ;;  %v200_v5 = vld [vmem:[%s719_s1 + $0x50] sm:$0xff]  ;;  %s433_s15 = sshll.u32 %s723_s30, 3 }
   0xd   : > { %210 = vmatpush.msra.mxu0 %v205_v0  ;;  %438 = vmatpush.msra.mxu1 %v205_v0  ;;  %v199_v6 = vld [vmem:[%s719_s1 + $0x48] sm:$0xff]  ;;  %v198_v7 = vld [vmem:[%s719_s1 + $0x40] sm:$0xff]  ;;  %v197_v8 = vld [vmem:[%s719_s1 + $0x38] sm:$0xff]  ;;  %s650_s22 = scalar_lea.vmem %s718_s0, %s433_s15  ;;  %s691_s29 = scalar_lea.vmem %s721_s3, %s433_s15 }
   0xe   : > { %442 = vmatpush.msra.mxu2 %v204_v1  ;;  %443 = vmatpush.msra.mxu3 %v204_v1  ;;  %v196_v9 = vld [vmem:[%s719_s1 + $0x30] sm:$0xff]  ;;  %v195_v10 = vld [vmem:[%s719_s1 + $0x28] sm:$0xff]  ;;  %v194_v11 = vld [vmem:[%s719_s1 + $0x20] sm:$0xff] }
   0xf   : > { %211 = vmatpush.msra.mxu0 %v204_v1  ;;  %441 = vmatpush.msra.mxu1 %v204_v1  ;;  %v193_v12 = vld [vmem:[%s719_s1 + $0x18] sm:$0xff]  ;;  %v192_v13 = vld [vmem:[%s719_s1 + $0x10] sm:$0xff]  ;;  %v191_v14 = vld [vmem:[%s719_s1 + $0x8] sm:$0xff] }
  0x10   : > { %445 = vmatpush.msra.mxu2 %v203_v2  ;;  %446 = vmatpush.msra.mxu3 %v203_v2  ;;  %v190_v15 = vld [vmem:[%s719_s1] sm:$0xff]  ;;  %v183_v20 = vld [vmem:[%s650_s22 + $0x48] sm:$0xff]  ;;  %v184_v24 = vld [vmem:[%s650_s22 + $0x50] sm:$0xff] }
  0x11   : > { %212 = vmatpush.msra.mxu0 %v203_v2  ;;  %444 = vmatpush.msra.mxu1 %v203_v2  ;;  %v182_v16 = vld [vmem:[%s650_s22 + $0x40] sm:$0xff]  ;;  %v187_v21 = vld [vmem:[%s650_s22 + $0x68] sm:$0xff]  ;;  %v188_v25 = vld [vmem:[%s650_s22 + $0x70] sm:$0xff] }
  0x12   : > { %448 = vmatpush.msra.mxu2 %v202_v3  ;;  %449 = vmatpush.msra.mxu3 %v202_v3  ;;  %v186_v17 = vld [vmem:[%s650_s22 + $0x60] sm:$0xff]  ;;  %v175_v22 = vld [vmem:[%s650_s22 + $0x8] sm:$0xff]  ;;  %v176_v26 = vld [vmem:[%s650_s22 + $0x10] sm:$0xff] }
  0x13   : > { %213 = vmatpush.msra.mxu0 %v202_v3  ;;  %447 = vmatpush.msra.mxu1 %v202_v3  ;;  %v174_v18 = vld [vmem:[%s650_s22] sm:$0xff]  ;;  %v179_v23 = vld [vmem:[%s650_s22 + $0x28] sm:$0xff]  ;;  %v180_v27 = vld [vmem:[%s650_s22 + $0x30] sm:$0xff] }
  0x14   : > { %451 = vmatpush.msra.mxu2 %v201_v4  ;;  %452 = vmatpush.msra.mxu3 %v201_v4  ;;  %v178_v19 = vld [vmem:[%s650_s22 + $0x20] sm:$0xff]  ;;  %v185_v28 = vld [vmem:[%s650_s22 + $0x58] sm:$0xff] }
  0x15   : > { %214 = vmatpush.msra.mxu0 %v201_v4  ;;  %450 = vmatpush.msra.mxu1 %v201_v4  ;;  %v189_v29 = vld [vmem:[%s650_s22 + $0x78] sm:$0xff]  ;;  %v674_v32 = vld [vmem:[%s720_s2] ss:$0 sm:$0xff] }
  0x16   : > { %454 = vmatpush.msra.mxu2 %v200_v5  ;;  %455 = vmatpush.msra.mxu3 %v200_v5  ;;  %v177_v30 = vld [vmem:[%s650_s22 + $0x18] sm:$0xff] }
  0x17   : > { %215 = vmatpush.msra.mxu0 %v200_v5  ;;  %453 = vmatpush.msra.mxu1 %v200_v5  ;;  %v181_v31 = vld [vmem:[%s650_s22 + $0x38] sm:$0xff] }
  0x18   : > { %457 = vmatpush.msra.mxu2 %v199_v6  ;;  %458 = vmatpush.msra.mxu3 %v199_v6 }
  0x19   : > { %216 = vmatpush.msra.mxu0 %v199_v6  ;;  %456 = vmatpush.msra.mxu1 %v199_v6 }
  0x1a   : > { %460 = vmatpush.msra.mxu2 %v198_v7  ;;  %461 = vmatpush.msra.mxu3 %v198_v7 }
  0x1b   : > { %217 = vmatpush.msra.mxu0 %v198_v7  ;;  %459 = vmatpush.msra.mxu1 %v198_v7 }
  0x1c   : > { %463 = vmatpush.msra.mxu2 %v197_v8  ;;  %464 = vmatpush.msra.mxu3 %v197_v8 }
  0x1d   : > { %218 = vmatpush.msra.mxu0 %v197_v8  ;;  %462 = vmatpush.msra.mxu1 %v197_v8 }
  0x1e   : > { %466 = vmatpush.msra.mxu2 %v196_v9  ;;  %467 = vmatpush.msra.mxu3 %v196_v9 }
  0x1f   : > { %219 = vmatpush.msra.mxu0 %v196_v9  ;;  %465 = vmatpush.msra.mxu1 %v196_v9 }
  0x20   : > { %469 = vmatpush.msra.mxu2 %v195_v10  ;;  %470 = vmatpush.msra.mxu3 %v195_v10 }
  0x21   : > { %220 = vmatpush.msra.mxu0 %v195_v10  ;;  %468 = vmatpush.msra.mxu1 %v195_v10 }
  0x22   : > { %472 = vmatpush.msra.mxu2 %v194_v11  ;;  %473 = vmatpush.msra.mxu3 %v194_v11 }
  0x23   : > { %221 = vmatpush.msra.mxu0 %v194_v11  ;;  %471 = vmatpush.msra.mxu1 %v194_v11 }
  0x24   : > { %475 = vmatpush.msra.mxu2 %v193_v12  ;;  %476 = vmatpush.msra.mxu3 %v193_v12 }
  0x25   : > { %222 = vmatpush.msra.mxu0 %v193_v12  ;;  %474 = vmatpush.msra.mxu1 %v193_v12 }
  0x26   : > { %478 = vmatpush.msra.mxu2 %v192_v13  ;;  %479 = vmatpush.msra.mxu3 %v192_v13 }
  0x27   : > { %223 = vmatpush.msra.mxu0 %v192_v13  ;;  %477 = vmatpush.msra.mxu1 %v192_v13 }
  0x28   : > { %481 = vmatpush.msra.mxu2 %v191_v14  ;;  %482 = vmatpush.msra.mxu3 %v191_v14 }
  0x29   : > { %224 = vmatpush.msra.mxu0 %v191_v14  ;;  %480 = vmatpush.msra.mxu1 %v191_v14 }
  0x2a   : > { %484 = vmatpush.msra.mxu2 %v190_v15  ;;  %485 = vmatpush.msra.mxu3 %v190_v15 }
  0x2b   : > { %250 = vmatmul.f32.vlgmr.msra.gmra.mxu2 %v182_v16  ;;  %262 = vmatmul.f32.vlgmr.msra.gmra.mxu3 %v186_v17 }
  0x2c   : > { %225 = vmatpush.msra.mxu0 %v190_v15  ;;  %483 = vmatpush.msra.mxu1 %v190_v15 }
  0x2d   : > { %226 = vmatmul.f32.vlgmr.msra.gmra.mxu0 %v174_v18  ;;  %238 = vmatmul.f32.vlgmr.msra.gmra.mxu1 %v178_v19 }
  0x33   : > { %253 = vmatmul.f32.gmra.mxu2 %v183_v20  ;;  %265 = vmatmul.f32.gmra.mxu3 %v187_v21 }
  0x35   : > { %229 = vmatmul.f32.gmra.mxu0 %v175_v22  ;;  %241 = vmatmul.f32.gmra.mxu1 %v179_v23 }
  0x3b   : > { %256 = vmatmul.f32.gmra.mxu2 %v184_v24  ;;  %268 = vmatmul.f32.gmra.mxu3 %v188_v25 }
  0x3d   : > { %232 = vmatmul.f32.gmra.mxu0 %v176_v26  ;;  %244 = vmatmul.f32.gmra.mxu1 %v180_v27 }
  0x43   : > { %259 = vmatmul.f32.gmra.mxu2 %v185_v28  ;;  %271 = vmatmul.f32.gmra.mxu3 %v189_v29 }
  0x45   : > { %235 = vmatmul.f32.gmra.mxu0 %v177_v30  ;;  %247 = vmatmul.f32.gmra.mxu1 %v181_v31 }
  0xaa   : > { %v227_v33 = vpop.f32.mrf.mxu0  ;;  %v239_v34 = vpop.f32.mrf.mxu1 }
  0xab   : > { %v228_v35 = vadd.f32 %v674_v32, %v227_v33  ;;  %v240_v36 = vadd.f32 %v674_v32, %v239_v34 }
  0xad   : > { %v275_v37 = vsub.f32 0.0, %v228_v35  ;;  %v279_v38 = vsub.f32 0.0, %v240_v36 }
  0xae   : > { %v251_v39 = vpop.f32.mrf.mxu2  ;;  %v263_v40 = vpop.f32.mrf.mxu3 }
  0xaf   : > { %v291_v41 = vmul.f32 1.442695, %v275_v37  ;;  %v299_v42 = vmul.f32 1.442695, %v279_v38  ;;  %v252_v43 = vadd.f32 %v674_v32, %v251_v39  ;;  %v264_v44 = vadd.f32 %v674_v32, %v263_v40 }
  0xb1   : > { %495 = vpow2.f32 %v291_v41  ;;  %v283_v45 = vsub.f32 0.0, %v252_v43  ;;  %v287_v46 = vsub.f32 0.0, %v264_v44 }
  0xb2   : > { %497 = vpow2.f32 %v299_v42  ;;  %v230_v47 = vpop.f32.mrf.mxu0  ;;  %v242_v48 = vpop.f32.mrf.mxu1 }
  0xb3   : > { %v307_v49 = vmul.f32 1.442695, %v283_v45  ;;  %v315_v50 = vmul.f32 1.442695, %v287_v46  ;;  %v231_v51 = vadd.f32 %v674_v32, %v230_v47  ;;  %v243_v52 = vadd.f32 %v674_v32, %v242_v48 }
  0xb5   : > { %499 = vpow2.f32 %v307_v49  ;;  %v276_v53 = vsub.f32 0.0, %v231_v51  ;;  %v280_v54 = vsub.f32 0.0, %v243_v52 }
  0xb6   : > { %501 = vpow2.f32 %v315_v50  ;;  %v254_v55 = vpop.f32.mrf.mxu2  ;;  %v266_v56 = vpop.f32.mrf.mxu3 }
  0xb7   : > { %v496_v57 = vpop.eup %495  ;;  %v293_v58 = vmul.f32 1.442695, %v276_v53  ;;  %v255_v59 = vadd.f32 %v674_v32, %v254_v55  ;;  %v267_v60 = vadd.f32 %v674_v32, %v266_v56  ;;  %v301_v63 = vmul.f32 1.442695, %v280_v54 }
  0xb8   : > { %v498_v61 = vpop.eup %497  ;;  %v323_v62 = vadd.f32 1.0, %v496_v57 }
  0xb9   : > { %v327_v0 = vadd.f32 1.0, %v498_v61  ;;  %503 = vpow2.f32 %v293_v58  ;;  %v284_v1 = vsub.f32 0.0, %v255_v59  ;;  %v288_v2 = vsub.f32 0.0, %v267_v60 }
  0xba   : > { %505 = vrcp.f32 %v323_v62  ;;  %v233_v3 = vpop.f32.mrf.mxu0  ;;  %v245_v4 = vpop.f32.mrf.mxu1 }
  0xbb   : > { %v500_v5 = vpop.eup %499  ;;  %507 = vrcp.f32 %v327_v0  ;;  %v309_v6 = vmul.f32 1.442695, %v284_v1  ;;  %v234_v7 = vadd.f32 %v674_v32, %v233_v3  ;;  %v317_v10 = vmul.f32 1.442695, %v288_v2 }
  0xbc   : > { %v502_v8 = vpop.eup %501  ;;  %v331_v9 = vadd.f32 1.0, %v500_v5  ;;  %509 = vpow2.f32 %v301_v63  ;;  %v246_v11 = vadd.f32 %v674_v32, %v245_v4 }
  0xbd   : > { %v335_v12 = vadd.f32 1.0, %v502_v8  ;;  %511 = vpow2.f32 %v309_v6  ;;  %v277_v13 = vsub.f32 0.0, %v234_v7 }
  0xbe   : > { %513 = vrcp.f32 %v331_v9  ;;  %v281_v14 = vsub.f32 0.0, %v246_v11  ;;  %v257_v15 = vpop.f32.mrf.mxu2  ;;  %v269_v16 = vpop.f32.mrf.mxu3 }
  0xbf   : > { %v504_v17 = vpop.eup %503  ;;  %515 = vrcp.f32 %v335_v12  ;;  %v295_v18 = vmul.f32 1.442695, %v277_v13  ;;  %v258_v19 = vadd.f32 %v674_v32, %v257_v15  ;;  %v270_v20 = vadd.f32 %v674_v32, %v269_v16 }
  0xc0   : > { %v506_v21 = vpop.eup %505  ;;  %v324_v22 = vadd.f32 1.0, %v504_v17  ;;  %517 = vpow2.f32 %v317_v10  ;;  %v303_v23 = vmul.f32 1.442695, %v281_v14 }
  0xc1   : > { %v508_v24 = vpop.eup %507  ;;  %355 = vst [vmem:[%s691_s29] sm:$0xff] %v506_v21  ;;  %519 = vpow2.f32 %v295_v18  ;;  %v285_v25 = vsub.f32 0.0, %v258_v19  ;;  %v289_v26 = vsub.f32 0.0, %v270_v20 }
  0xc2   : > { %v510_v27 = vpop.eup %509  ;;  %359 = vst [vmem:[%s691_s29 + $0x20] sm:$0xff] %v508_v24  ;;  %521 = vrcp.f32 %v324_v22  ;;  %v236_v28 = vpop.f32.mrf.mxu0 }
  0xc3   : > { %v248_v29 = vpop.f32.mrf.mxu1  ;;  %v512_v30 = vpop.eup %511  ;;  %v328_v31 = vadd.f32 1.0, %v510_v27  ;;  %523 = vpow2.f32 %v303_v23  ;;  %v311_v33 = vmul.f32 1.442695, %v285_v25  ;;  %v319_v36 = vmul.f32 1.442695, %v289_v26 }
  0xc4   : > { %v514_v34 = vpop.eup %513  ;;  %v332_v35 = vadd.f32 1.0, %v512_v30  ;;  %v237_v37 = vadd.f32 %v674_v32, %v236_v28  ;;  %v249_v38 = vadd.f32 %v674_v32, %v248_v29 }
  0xc5   : > { %v516_v39 = vpop.eup %515  ;;  %363 = vst [vmem:[%s691_s29 + $0x40] sm:$0xff] %v514_v34  ;;  %525 = vrcp.f32 %v328_v31 }
  0xc6   : > { %v518_v40 = vpop.eup %517  ;;  %367 = vst [vmem:[%s691_s29 + $0x60] sm:$0xff] %v516_v39  ;;  %527 = vrcp.f32 %v332_v35  ;;  %v278_v41 = vsub.f32 0.0, %v237_v37  ;;  %v282_v42 = vsub.f32 0.0, %v249_v38  ;;  %v260_v43 = vpop.f32.mrf.mxu2 }
  0xc7   : > { %v272_v44 = vpop.f32.mrf.mxu3  ;;  %v520_v45 = vpop.eup %519  ;;  %v336_v46 = vadd.f32 1.0, %v518_v40  ;;  %529 = vpow2.f32 %v311_v33  ;;  %v261_v47 = vadd.f32 %v674_v32, %v260_v43 }
  0xc8   : > { %v273_v48 = vadd.f32 %v674_v32, %v272_v44  ;;  %v522_v49 = vpop.eup %521  ;;  %v325_v50 = vadd.f32 1.0, %v520_v45  ;;  %531 = vpow2.f32 %v319_v36  ;;  %v297_v51 = vmul.f32 1.442695, %v278_v41 }
  0xc9   : > { %v524_v52 = vpop.eup %523  ;;  %356 = vst [vmem:[%s691_s29 + $0x8] sm:$0xff] %v522_v49  ;;  %533 = vrcp.f32 %v336_v46  ;;  %v305_v53 = vmul.f32 1.442695, %v282_v42  ;;  %v286_v54 = vsub.f32 0.0, %v261_v47 }
  0xca   : > { %v290_v55 = vsub.f32 0.0, %v273_v48  ;;  %535 = vrcp.f32 %v325_v50  ;;  %v329_v56 = vadd.f32 1.0, %v524_v52 }
  0xcb   : > { %v526_v57 = vpop.eup %525  ;;  %537 = vpow2.f32 %v297_v51  ;;  %v313_v58 = vmul.f32 1.442695, %v286_v54 }
  0xcc   : > { %v321_v59 = vmul.f32 1.442695, %v290_v55  ;;  %v528_v32 = vpop.eup %527  ;;  %360 = vst [vmem:[%s691_s29 + $0x28] sm:$0xff] %v526_v57  ;;  %539 = vrcp.f32 %v329_v56 }
  0xcd   : > { %v530_v60 = vpop.eup %529  ;;  %364 = vst [vmem:[%s691_s29 + $0x48] sm:$0xff] %v528_v32  ;;  %541 = vpow2.f32 %v305_v53 }
  0xce   : > { %v532_v61 = vpop.eup %531  ;;  %v333_v62 = vadd.f32 1.0, %v530_v60  ;;  %543 = vpow2.f32 %v313_v58 }
  0xcf   : > { %v534_v63 = vpop.eup %533  ;;  %v337_v0 = vadd.f32 1.0, %v532_v61  ;;  %545 = vpow2.f32 %v321_v59 }
  0xd0   : > { %v536_v1 = vpop.eup %535  ;;  %368 = vst [vmem:[%s691_s29 + $0x68] sm:$0xff] %v534_v63  ;;  %547 = vrcp.f32 %v333_v62 }
  0xd1   : > { %v538_v2 = vpop.eup %537  ;;  %357 = vst [vmem:[%s691_s29 + $0x10] sm:$0xff] %v536_v1  ;;  %549 = vrcp.f32 %v337_v0 }
  0xd2   : > { %v540_v3 = vpop.eup %539  ;;  %v326_v4 = vadd.f32 1.0, %v538_v2 }
  0xd3   : > { %v542_v5 = vpop.eup %541  ;;  %361 = vst [vmem:[%s691_s29 + $0x30] sm:$0xff] %v540_v3 }
  0xd4   : > { %v544_v6 = vpop.eup %543  ;;  %551 = vrcp.f32 %v326_v4  ;;  %v330_v7 = vadd.f32 1.0, %v542_v5 }
  0xd5   : > { %v546_v8 = vpop.eup %545  ;;  %v334_v9 = vadd.f32 1.0, %v544_v6 }
  0xd6   : > { %v548_v10 = vpop.eup %547  ;;  %553 = vrcp.f32 %v330_v7  ;;  %v338_v11 = vadd.f32 1.0, %v546_v8 }
  0xd7   : > { %v550_v12 = vpop.eup %549  ;;  %365 = vst [vmem:[%s691_s29 + $0x50] sm:$0xff] %v548_v10  ;;  %555 = vrcp.f32 %v334_v9 }
  0xd8   : > { %369 = vst [vmem:[%s691_s29 + $0x70] sm:$0xff] %v550_v12  ;;  %557 = vrcp.f32 %v338_v11 }
  0xda   : > { %v552_v13 = vpop.eup %551 }
  0xdb   : > { %358 = vst [vmem:[%s691_s29 + $0x18] sm:$0xff] %v552_v13 }
  0xdc   : > { %v554_v14 = vpop.eup %553 }
  0xdd   : > { %v556_v15 = vpop.eup %555  ;;  %362 = vst [vmem:[%s691_s29 + $0x38] sm:$0xff] %v554_v14 }
  0xde   : > { %v558_v16 = vpop.eup %557  ;;  %366 = vst [vmem:[%s691_s29 + $0x58] sm:$0xff] %v556_v15 }
  0xdf   : > { %370 = vst [vmem:[%s691_s29 + $0x78] sm:$0xff] %v558_v16 }
  0xe0 PF: > { %s13_s12 = sadd.s32 1, %s565_s12  }
  0xe1   : > { %p10_p4 = scmp.ge.s32.totalorder %s13_s12, 6  }
  0xe3   :  { %12 = sbr.rel (!%p10_p4) target bundleno = 1 (0x1), region = 62 }

</bundles_post_ra>
